<compile_context>
chip_gen: v7x
topology: tpu7x:2x2x1
jax: 0.10.0
libtpu: 0.0.40
codegen_flags: <defaults>
</compile_context>

<pallas_src>
import jax
import jax.numpy as jnp
from jax import lax
from jax.experimental import pallas as pl
from jax.experimental.pallas import tpu as pltpu

EPS = 1e-5  # torch BatchNorm default
_VMEM_LIMIT = 32 * 1024 * 1024


def _pick_block(n, bytes_per_item, target_bytes=2 << 20, min_steps=1):
    """Largest divisor of n with ~target_bytes per block; optionally keep >= min_steps steps."""
    b = max(1, min(n, int(target_bytes // max(int(bytes_per_item), 1))))
    if min_steps > 1 and n >= min_steps:
        b = min(b, max(1, n // min_steps))
    while n % b:
        b -= 1
    return b


# --------------------------------------------------------------------------------------
# Kernel 1: batch statistics.  Input is a lane-dense (M, L) view with L = reps*C; the kernel
# reduces over rows, the wrapper folds the `reps` factor and forms mean / biased variance.
# --------------------------------------------------------------------------------------
def _bn_stats_kernel(x_ref, sum_ref, ssq_ref):
    @pl.when(pl.program_id(0) == 0)
    def _init():
        sum_ref[...] = jnp.zeros_like(sum_ref)
        ssq_ref[...] = jnp.zeros_like(ssq_ref)

    x = x_ref[...]                                      # (block_m, L) f32
    sum_ref[...] += jnp.sum(x, axis=0, keepdims=True)   # (1, L)
    ssq_ref[...] += jnp.sum(x * x, axis=0, keepdims=True)


def bn_stats(x2d, C):
    """x2d: (M, L) with L = reps*C, channel fastest.  Returns per-channel mean, biased var."""
    M, L = x2d.shape
    block_m = _pick_block(M, L * 4, min_steps=1)        # usually the whole array in one step
    s, q = pl.pallas_call(
        _bn_stats_kernel,
        out_shape=(jax.ShapeDtypeStruct((1, L), jnp.float32),
                   jax.ShapeDtypeStruct((1, L), jnp.float32)),
        grid=(M // block_m,),
        in_specs=[pl.BlockSpec((block_m, L), lambda i: (i, 0))],
        out_specs=(pl.BlockSpec((1, L), lambda i: (0, 0)),
                   pl.BlockSpec((1, L), lambda i: (0, 0))),
        compiler_params=pltpu.CompilerParams(
            dimension_semantics=("arbitrary",),
            vmem_limit_bytes=_VMEM_LIMIT),
    )(x2d)
    reps = L // C
    count = M * reps
    mean = s.reshape(reps, C).sum(axis=0) / count
    ex2 = q.reshape(reps, C).sum(axis=0) / count
    var = jnp.maximum(ex2 - mean * mean, 0.0)           # biased variance, clamped
    return mean, var


# --------------------------------------------------------------------------------------
# Kernel 2: fused BatchNorm affine + grouped conv as a single full-width MXU matmul.
# Input block:  (NB, H, W*C)  normalized in-kernel (scale/shift tiled per (w, c)).
# Rows:         (NB*H, KH*W*C) built from KH height-shifted slices of an H-zero-padded scratch.
# Weight:       (KH*W*C, W*C) -- folds KW taps + W-direction zero padding + group structure.
# Output block: (NB, H, W*C) lane-dense (column order chosen by the wrapper).
# --------------------------------------------------------------------------------------
def _make_norm_conv_kernel(NB, H, WC, KH, PH, OUT):
    assert KH == 2 * PH + 1

    def compute(x_ref, scale_ref, shift_ref, bw_ref, bias_ref, o_ref, pad_ref):
        scale = scale_ref[...].reshape(1, 1, WC)
        shift = shift_ref[...].reshape(1, 1, WC)
        xn = x_ref[...] * scale + shift                        # (NB, H, WC) normalized
        if pad_ref is None:                                    # KH == 1: no height padding
            rows = xn
        else:
            zero = jnp.zeros((NB, PH, WC), jnp.float32)
            pad_ref[:, :PH, :] = zero                          # top zero border
            pad_ref[:, PH + H:, :] = zero                      # bottom zero border
            pad_ref[:, PH:PH + H, :] = xn                      # interior = normalized block
            rows = jnp.concatenate(
                [pad_ref[:, kh:kh + H, :] for kh in range(KH)], axis=-1)  # (NB, H, KH*WC)
        out = jnp.dot(rows.reshape(NB * H, KH * WC), bw_ref[...],
                      preferred_element_type=jnp.float32)      # one MXU call, K = KH*WC
        out = out + bias_ref[...]
        o_ref[...] = out.reshape(NB, H, OUT).astype(o_ref.dtype)

    if PH > 0:
        def kernel(x_ref, s_ref, h_ref, w_ref, b_ref, o_ref, pad_ref):
            compute(x_ref, s_ref, h_ref, w_ref, b_ref, o_ref, pad_ref)
    else:
        def kernel(x_ref, s_ref, h_ref, w_ref, b_ref, o_ref):
            compute(x_ref, s_ref, h_ref, w_ref, b_ref, o_ref, None)
    return kernel


def grouped_norm_conv(x_flat, scale_row, shift_row, big_w, bias_row, *, KH, PH, block_n):
    N, H, WC = x_flat.shape
    Kdim, OUT = int(big_w.shape[0]), int(big_w.shape[1])
    kernel = _make_norm_conv_kernel(block_n, H, WC, KH, PH, OUT)
    scratch = [pltpu.VMEM((block_n, H + 2 * PH, WC), jnp.float32)] if PH > 0 else []
    return pl.pallas_call(
        kernel,
        out_shape=jax.ShapeDtypeStruct((N, H, OUT), jnp.float32),
        grid=(N // block_n,),
        in_specs=[
            pl.BlockSpec((block_n, H, WC), lambda i: (i, 0, 0)),
            pl.BlockSpec((1, WC), lambda i: (0, 0)),
            pl.BlockSpec((1, WC), lambda i: (0, 0)),
            pl.BlockSpec((Kdim, OUT), lambda i: (0, 0)),
            pl.BlockSpec((1, OUT), lambda i: (0, 0)),
        ],
        out_specs=pl.BlockSpec((block_n, H, OUT), lambda i: (i, 0, 0)),
        scratch_shapes=scratch,
        compiler_params=pltpu.CompilerParams(
            dimension_semantics=("parallel",),
            vmem_limit_bytes=_VMEM_LIMIT),
    )(x_flat, scale_row, shift_row, big_w, bias_row)


# --------------------------------------------------------------------------------------
# Weight packing: PyTorch grouped weight -> block-diagonal taps -> full-width matmul weight.
# --------------------------------------------------------------------------------------
def _block_diag_weight(w, heads):
    """(C_out, C_in/g, KH, KW) grouped weight -> dense block-diagonal (KH, KW, C_in, C_out)."""
    C = int(w.shape[0])
    Cg = C // heads
    KH, KW = int(w.shape[2]), int(w.shape[3])
    wg = w.reshape(heads, Cg, Cg, KH, KW).astype(jnp.float32)
    full = jnp.zeros((KH, KW, C, C), jnp.float32)
    for g in range(heads):
        blk = jnp.transpose(wg[g], (2, 3, 1, 0))               # (kh, kw, ci, co)
        full = full.at[:, :, g * Cg:(g + 1) * Cg, g * Cg:(g + 1) * Cg].set(blk)
    return full


def _full_width_weight(w_full, W, channels_major_out):
    """(KH, KW, C, C) taps -> (KH*W*C, W*C) weight folding KW taps + W-direction zero padding.
    Rows: kh*(W*C) + p*C + ci.  Columns: w*C + co (spatial-major) or co*W + w (channel-major)."""
    KH, KW, C, _ = (int(s) for s in w_full.shape)
    PW = KW // 2
    if channels_major_out:
        bw = jnp.zeros((KH, W, C, C, W), jnp.float32)          # [kh, p, ci, co, w]
    else:
        bw = jnp.zeros((KH, W, C, W, C), jnp.float32)          # [kh, p, ci, w, co]
    for kh in range(KH):
        for kw in range(KW):
            for w in range(W):
                p = w + kw - PW
                if 0 <= p < W:                                  # taps into W-pad are just absent
                    if channels_major_out:
                        bw = bw.at[kh, p, :, :, w].set(w_full[kh, kw])
                    else:
                        bw = bw.at[kh, p, :, w, :].set(w_full[kh, kw])
    return bw.reshape(KH * W * C, W * C)


def _bn_affine(mean, var, gamma, beta):
    inv_std = 1.0 / jnp.sqrt(var + EPS)
    scale = gamma.astype(jnp.float32) * inv_std
    shift = beta.astype(jnp.float32) - mean * scale
    return scale, shift


# --------------------------------------------------------------------------------------
# Full DECOUPLED forward pass.
# --------------------------------------------------------------------------------------
def decoupled_forward(x, params, heads):
    B, T, H, W, C = x.shape
    N2, N1 = B * T, B * H * W

    # ---- stage 1: x.view(B*T, C, H, W) -> BatchNorm2d -> grouped Conv2d ----
    x2 = jnp.transpose(x.reshape(N2, C, H, W), (0, 2, 3, 1))        # NCHW -> NHWC (one copy)
    x2f = x2.reshape(N2, H, W * C)                                  # lane-dense view
    mean2, var2 = bn_stats(x2f.reshape(N2 * H, W * C), C)
    scale2, shift2 = _bn_affine(mean2, var2, params["g2d"], params["b2d_bn"])
    KH2 = int(params["w2d"].shape[2])
    bw2 = _full_width_weight(_block_diag_weight(params["w2d"], heads), W,
                             channels_major_out=False)
    blk2 = _pick_block(N2, 2 * H * W * C * 4, min_steps=2)
    y2f = grouped_norm_conv(
        x2f, jnp.tile(scale2, W)[None], jnp.tile(shift2, W)[None], bw2,
        jnp.tile(params["b2d"].astype(jnp.float32), W)[None],
        KH=KH2, PH=KH2 // 2, block_n=blk2)                          # (N2, H, W*C)  == NHWC

    # ---- stage 2: y.view(B*H*W, C, T) -> BatchNorm1d -> grouped Conv1d ----
    y2_nchw = jnp.transpose(y2f.reshape(N2, H, W, C), (0, 3, 1, 2)) # back to torch NCHW layout
    x1 = jnp.transpose(y2_nchw.reshape(N1, C, T), (0, 2, 1))        # raw view, then NCT -> NTC
    x1f = x1.reshape(N1, 1, T * C)                                  # lane-dense view
    mean1, var1 = bn_stats(x1.reshape(N1, T * C), C)
    scale1, shift1 = _bn_affine(mean1, var1, params["g1d"], params["b1d_bn"])
    bw1 = _full_width_weight(
        _block_diag_weight(params["w1d"][:, :, None, :], heads), T,
        channels_major_out=True)                                    # columns in (c, t) order
    blk1 = _pick_block(N1, 2 * T * C * 4, min_steps=2)
    y1f = grouped_norm_conv(
        x1f, jnp.tile(scale1, T)[None], jnp.tile(shift1, T)[None], bw1,
        jnp.repeat(params["b1d"].astype(jnp.float32), T)[None],
        KH=1, PH=0, block_n=blk1)                                   # (N1, 1, C*T) == NCT flat

    # y1f's contiguous layout equals torch's (B*H*W, C, T); the final .view is a raw reshape.
    return y1f.reshape(B, T, H, W, C)


# --------------------------------------------------------------------------------------
# Pure-JAX reference (mirrors the PyTorch module in training mode) for validation.
# --------------------------------------------------------------------------------------
def reference_forward(x, params, heads):
    B, T, H, W, C = x.shape

    def bn(v, gamma, beta, axes):
        mean = jnp.mean(v, axis=axes, keepdims=True)
        var = jnp.mean(jnp.square(v - mean), axis=axes, keepdims=True)
        shp = [1] * v.ndim
        shp[1] = C
        return (v - mean) / jnp.sqrt(var + EPS) * gamma.reshape(shp) + beta.reshape(shp)

    x2 = x.reshape(B * T, C, H, W)
    x2 = bn(x2, params["g2d"], params["b2d_bn"], (0, 2, 3))
    x2 = lax.conv_general_dilated(
        x2, params["w2d"], (1, 1), ((1, 1), (1, 1)),
        dimension_numbers=("NCHW", "OIHW", "NCHW"),
        feature_group_count=heads, precision=lax.Precision.HIGHEST)
    x2 = x2 + params["b2d"].reshape(1, C, 1, 1)

    x1 = x2.reshape(B * H * W, C, T)
    x1 = bn(x1, params["g1d"], params["b1d_bn"], (0, 2))
    x1 = lax.conv_general_dilated(
        x1[:, :, None, :], params["w1d"][:, :, None, :], (1, 1), ((0, 0), (1, 1)),
        dimension_numbers=("NCHW", "OIHW", "NCHW"),
        feature_group_count=heads, precision=lax.Precision.HIGHEST)[:, :, 0, :]
    x1 = x1 + params["b1d"].reshape(1, C, 1)
    return x1.reshape(B, T, H, W, C)


if __name__ == "__main__":
    B, T, H, W = 2, 8, 8, 8
    C, heads, K = 32, 4, 3
    Cg = C // heads

    keys = jax.random.split(jax.random.PRNGKey(0), 9)
    x = jax.random.normal(keys[0], (B, T, H, W, C), jnp.float32)
    params = {
        "g2d":    1.0 + 0.1 * jax.random.normal(keys[1], (C,), jnp.float32),
        "b2d_bn": 0.1 * jax.random.normal(keys[2], (C,), jnp.float32),
        "w2d":    0.1 * jax.random.normal(keys[3], (C, Cg, K, K), jnp.float32),
        "b2d":    0.1 * jax.random.normal(keys[4], (C,), jnp.float32),
        "g1d":    1.0 + 0.1 * jax.random.normal(keys[5], (C,), jnp.float32),
        "b1d_bn": 0.1 * jax.random.normal(keys[6], (C,), jnp.float32),
        "w1d":    0.1 * jax.random.normal(keys[7], (C, Cg, K), jnp.float32),
        "b1d":    0.1 * jax.random.normal(keys[8], (C,), jnp.float32),
    }

    fwd = jax.jit(lambda xv, pv: decoupled_forward(xv, pv, heads))
    out = jax.block_until_ready(fwd(x, params))

    ref = reference_forward(x, params, heads)
    assert out.shape == (B, T, H, W, C) and out.dtype == jnp.float32
    max_err = float(jnp.max(jnp.abs(out - ref)))
    if max_err > 2e-2:
        raise AssertionError(f"Pallas/reference mismatch: max abs err {max_err}")
    print("KERNEL_OK")
</pallas_src>

<mosaic_0001>
module attributes {stable_mosaic.version = 11 : i64} {
  func.func @_bn_stats_kernel(%arg0: i32, %arg1: memref<128x256xf32, #tpu.memory_space<vmem>>, %arg2: memref<1x256xf32, #tpu.memory_space<vmem>>, %arg3: memref<1x256xf32, #tpu.memory_space<vmem>>) attributes {dimension_semantics = [#tpu.dimension_semantics<arbitrary>], iteration_bounds = array<i64: 1>, scalar_prefetch = 0 : i64, scratch_operands = 0 : i64, tpu.core_type = #tpu.core_type<tc>, window_params = [{transform_indices = @transform_0, window_bounds = array<i64: 128, 256>}, {pipeline_mode = #tpu.pipeline_mode<synchronous>, transform_indices = @transform_1, window_bounds = array<i64: 1, 256>}, {pipeline_mode = #tpu.pipeline_mode<synchronous>, transform_indices = @transform_2, window_bounds = array<i64: 1, 256>}]} {
    %c0_i32 = arith.constant 0 : i32
    %0 = arith.cmpi eq, %arg0, %c0_i32 : i32
    %1 = arith.extui %0 : i1 to i32
    %c0_i32_0 = arith.constant 0 : i32
    %2 = arith.cmpi ne, %1, %c0_i32_0 : i32
    scf.if %2 {
      %cst_11 = arith.constant 0.000000e+00 : f32
      %15 = vector.broadcast %cst_11 : f32 to vector<1x256xf32>
      %c0_12 = arith.constant 0 : index
      %c0_13 = arith.constant 0 : index
      %16 = vector.load %arg2[%c0_12, %c0_13] : memref<1x256xf32, #tpu.memory_space<vmem>>, vector<1x256xf32>
      tpu.vector_store %arg2[%c0_12, %c0_13], %15 {strides = array<i32>} : memref<1x256xf32, #tpu.memory_space<vmem>>, vector<1x256xf32>,
      %cst_14 = arith.constant 0.000000e+00 : f32
      %17 = vector.broadcast %cst_14 : f32 to vector<1x256xf32>
      %c0_15 = arith.constant 0 : index
      %c0_16 = arith.constant 0 : index
      %18 = vector.load %arg3[%c0_15, %c0_16] : memref<1x256xf32, #tpu.memory_space<vmem>>, vector<1x256xf32>
      tpu.vector_store %arg3[%c0_15, %c0_16], %17 {strides = array<i32>} : memref<1x256xf32, #tpu.memory_space<vmem>>, vector<1x256xf32>,
    } else {
    }
    %c0 = arith.constant 0 : index
    %c0_1 = arith.constant 0 : index
    %3 = vector.load %arg1[%c0, %c0_1] : memref<128x256xf32, #tpu.memory_space<vmem>>, vector<128x256xf32>
    %c0_2 = arith.constant 0 : index
    %c0_3 = arith.constant 0 : index
    %4 = vector.load %arg2[%c0_2, %c0_3] : memref<1x256xf32, #tpu.memory_space<vmem>>, vector<1x256xf32>
    %cst = arith.constant dense<0.000000e+00> : vector<256xf32>
    %5 = vector.multi_reduction <add>, %3, %cst [0] : vector<128x256xf32> to vector<256xf32>
    %6 = vector.shape_cast %5 : vector<256xf32> to vector<1x256xf32>
    %7 = arith.addf %4, %6 : vector<1x256xf32>
    %c0_4 = arith.constant 0 : index
    %c0_5 = arith.constant 0 : index
    %8 = vector.load %arg2[%c0_4, %c0_5] : memref<1x256xf32, #tpu.memory_space<vmem>>, vector<1x256xf32>
    tpu.vector_store %arg2[%c0_4, %c0_5], %7 {strides = array<i32>} : memref<1x256xf32, #tpu.memory_space<vmem>>, vector<1x256xf32>,
    %c0_6 = arith.constant 0 : index
    %c0_7 = arith.constant 0 : index
    %9 = vector.load %arg3[%c0_6, %c0_7] : memref<1x256xf32, #tpu.memory_space<vmem>>, vector<1x256xf32>
    %10 = arith.mulf %3, %3 : vector<128x256xf32>
    %cst_8 = arith.constant dense<0.000000e+00> : vector<256xf32>
    %11 = vector.multi_reduction <add>, %10, %cst_8 [0] : vector<128x256xf32> to vector<256xf32>
    %12 = vector.shape_cast %11 : vector<256xf32> to vector<1x256xf32>
    %13 = arith.addf %9, %12 : vector<1x256xf32>
    %c0_9 = arith.constant 0 : index
    %c0_10 = arith.constant 0 : index
    %14 = vector.load %arg3[%c0_9, %c0_10] : memref<1x256xf32, #tpu.memory_space<vmem>>, vector<1x256xf32>
    tpu.vector_store %arg3[%c0_9, %c0_10], %13 {strides = array<i32>} : memref<1x256xf32, #tpu.memory_space<vmem>>, vector<1x256xf32>,
    return
  }
  func.func @transform_0(%arg0: i32) -> (i32, i32) {
    %c0_i32 = arith.constant 0 : i32
    %c0_i32_0 = arith.constant 0 : i32
    return %arg0, %c0_i32 : i32, i32
  }
  func.func @transform_1(%arg0: i32) -> (i32, i32) {
    %c0_i32 = arith.constant 0 : i32
    %c0_i32_0 = arith.constant 0 : i32
    %c0_i32_1 = arith.constant 0 : i32
    return %c0_i32, %c0_i32_0 : i32, i32
  }
  func.func @transform_2(%arg0: i32) -> (i32, i32) {
    %c0_i32 = arith.constant 0 : i32
    %c0_i32_0 = arith.constant 0 : i32
    %c0_i32_1 = arith.constant 0 : i32
    return %c0_i32, %c0_i32_0 : i32, i32
  }
}

module attributes {stable_mosaic.version = 11 : i64} {
  func.func @kernel(%arg0: i32, %arg1: memref<8x8x256xf32, #tpu.memory_space<vmem>>, %arg2: memref<1x256xf32, #tpu.memory_space<vmem>>, %arg3: memref<1x256xf32, #tpu.memory_space<vmem>>, %arg4: memref<768x256xf32, #tpu.memory_space<vmem>>, %arg5: memref<1x256xf32, #tpu.memory_space<vmem>>, %arg6: memref<8x8x256xf32, #tpu.memory_space<vmem>>, %arg7: memref<8x10x256xf32, #tpu.memory_space<vmem>>) attributes {dimension_semantics = [#tpu.dimension_semantics<parallel>], iteration_bounds = array<i64: 2>, scalar_prefetch = 0 : i64, scratch_operands = 1 : i64, tpu.core_type = #tpu.core_type<tc>, window_params = [{transform_indices = @transform_0, window_bounds = array<i64: 8, 8, 256>}, {pipeline_mode = #tpu.pipeline_mode<synchronous>, transform_indices = @transform_1, window_bounds = array<i64: 1, 256>}, {pipeline_mode = #tpu.pipeline_mode<synchronous>, transform_indices = @transform_2, window_bounds = array<i64: 1, 256>}, {pipeline_mode = #tpu.pipeline_mode<synchronous>, transform_indices = @transform_3, window_bounds = array<i64: 768, 256>}, {pipeline_mode = #tpu.pipeline_mode<synchronous>, transform_indices = @transform_4, window_bounds = array<i64: 1, 256>}, {transform_indices = @transform_5, window_bounds = array<i64: 8, 8, 256>}]} {
    %c0 = arith.constant 0 : index
    %c0_0 = arith.constant 0 : index
    %0 = vector.load %arg2[%c0, %c0_0] : memref<1x256xf32, #tpu.memory_space<vmem>>, vector<1x256xf32>
    %1 = vector.shape_cast %0 : vector<1x256xf32> to vector<1x1x256xf32>
    %c0_1 = arith.constant 0 : index
    %c0_2 = arith.constant 0 : index
    %2 = vector.load %arg3[%c0_1, %c0_2] : memref<1x256xf32, #tpu.memory_space<vmem>>, vector<1x256xf32>
    %3 = vector.shape_cast %2 : vector<1x256xf32> to vector<1x1x256xf32>
    %c0_3 = arith.constant 0 : index
    %c0_4 = arith.constant 0 : index
    %c0_5 = arith.constant 0 : index
    %4 = vector.load %arg1[%c0_3, %c0_4, %c0_5] : memref<8x8x256xf32, #tpu.memory_space<vmem>>, vector<8x8x256xf32>
    %5 = vector.broadcast %1 : vector<1x1x256xf32> to vector<8x8x256xf32>
    %6 = arith.mulf %4, %5 : vector<8x8x256xf32>
    %7 = vector.broadcast %3 : vector<1x1x256xf32> to vector<8x8x256xf32>
    %8 = arith.addf %6, %7 : vector<8x8x256xf32>
    %cst = arith.constant 0.000000e+00 : f32
    %9 = vector.broadcast %cst : f32 to vector<8x1x256xf32>
    %c0_6 = arith.constant 0 : index
    %c0_7 = arith.constant 0 : index
    %c0_8 = arith.constant 0 : index
    %10 = vector.load %arg7[%c0_6, %c0_7, %c0_8] : memref<8x10x256xf32, #tpu.memory_space<vmem>>, vector<8x1x256xf32>
    tpu.vector_store %arg7[%c0_6, %c0_7, %c0_8], %9 {strides = array<i32>} : memref<8x10x256xf32, #tpu.memory_space<vmem>>, vector<8x1x256xf32>,
    %c0_9 = arith.constant 0 : index
    %c9 = arith.constant 9 : index
    %c0_10 = arith.constant 0 : index
    %11 = vector.load %arg7[%c0_9, %c9, %c0_10] : memref<8x10x256xf32, #tpu.memory_space<vmem>>, vector<8x1x256xf32>
    tpu.vector_store %arg7[%c0_9, %c9, %c0_10], %9 {strides = array<i32>} : memref<8x10x256xf32, #tpu.memory_space<vmem>>, vector<8x1x256xf32>,
    %c0_11 = arith.constant 0 : index
    %c1 = arith.constant 1 : index
    %c0_12 = arith.constant 0 : index
    %12 = vector.load %arg7[%c0_11, %c1, %c0_12] : memref<8x10x256xf32, #tpu.memory_space<vmem>>, vector<8x8x256xf32>
    tpu.vector_store %arg7[%c0_11, %c1, %c0_12], %8 {strides = array<i32>} : memref<8x10x256xf32, #tpu.memory_space<vmem>>, vector<8x8x256xf32>,
    %c0_13 = arith.constant 0 : index
    %c0_14 = arith.constant 0 : index
    %c0_15 = arith.constant 0 : index
    %13 = vector.load %arg7[%c0_13, %c0_14, %c0_15] : memref<8x10x256xf32, #tpu.memory_space<vmem>>, vector<8x8x256xf32>
    %c0_16 = arith.constant 0 : index
    %c1_17 = arith.constant 1 : index
    %c0_18 = arith.constant 0 : index
    %14 = vector.load %arg7[%c0_16, %c1_17, %c0_18] : memref<8x10x256xf32, #tpu.memory_space<vmem>>, vector<8x8x256xf32>
    %c0_19 = arith.constant 0 : index
    %c2 = arith.constant 2 : index
    %c0_20 = arith.constant 0 : index
    %15 = vector.load %arg7[%c0_19, %c2, %c0_20] : memref<8x10x256xf32, #tpu.memory_space<vmem>>, vector<8x8x256xf32>
    %16 = tpu.concatenate %13, %14, %15 in 2 : vector<8x8x256xf32>, vector<8x8x256xf32>, vector<8x8x256xf32> -> vector<8x8x768xf32>
    %17 = vector.shape_cast %16 : vector<8x8x768xf32> to vector<64x768xf32>
    %c0_21 = arith.constant 0 : index
    %c0_22 = arith.constant 0 : index
    %18 = vector.load %arg4[%c0_21, %c0_22] : memref<768x256xf32, #tpu.memory_space<vmem>>, vector<768x256xf32>
    %cst_23 = arith.constant dense<0.000000e+00> : vector<64x256xf32>
    %19 = tpu.matmul %17, %18, %cst_23 {dimension_numbers = #tpu.dot_dimension_numbers<[1], [0], [0], [1], [0, 0, 1, 1], [], []>} : vector<64x768xf32>, vector<768x256xf32>, vector<64x256xf32> -> vector<64x256xf32>
    %c0_24 = arith.constant 0 : index
    %c0_25 = arith.constant 0 : index
    %20 = vector.load %arg5[%c0_24, %c0_25] : memref<1x256xf32, #tpu.memory_space<vmem>>, vector<1x256xf32>
    %21 = vector.broadcast %20 : vector<1x256xf32> to vector<64x256xf32>
    %22 = arith.addf %19, %21 : vector<64x256xf32>
    %23 = vector.shape_cast %22 : vector<64x256xf32> to vector<8x8x256xf32>
    %c0_26 = arith.constant 0 : index
    %c0_27 = arith.constant 0 : index
    %c0_28 = arith.constant 0 : index
    %24 = vector.load %arg6[%c0_26, %c0_27, %c0_28] : memref<8x8x256xf32, #tpu.memory_space<vmem>>, vector<8x8x256xf32>
    tpu.vector_store %arg6[%c0_26, %c0_27, %c0_28], %23 {strides = array<i32>} : memref<8x8x256xf32, #tpu.memory_space<vmem>>, vector<8x8x256xf32>,
    return
  }
  func.func @transform_0(%arg0: i32) -> (i32, i32, i32) {
    %c0_i32 = arith.constant 0 : i32
    %c0_i32_0 = arith.constant 0 : i32
    %c0_i32_1 = arith.constant 0 : i32
    return %arg0, %c0_i32, %c0_i32_0 : i32, i32, i32
  }
  func.func @transform_1(%arg0: i32) -> (i32, i32) {
    %c0_i32 = arith.constant 0 : i32
    %c0_i32_0 = arith.constant 0 : i32
    %c0_i32_1 = arith.constant 0 : i32
    return %c0_i32, %c0_i32_0 : i32, i32
  }
  func.func @transform_2(%arg0: i32) -> (i32, i32) {
    %c0_i32 = arith.constant 0 : i32
    %c0_i32_0 = arith.constant 0 : i32
    %c0_i32_1 = arith.constant 0 : i32
    return %c0_i32, %c0_i32_0 : i32, i32
  }
  func.func @transform_3(%arg0: i32) -> (i32, i32) {
    %c0_i32 = arith.constant 0 : i32
    %c0_i32_0 = arith.constant 0 : i32
    %c0_i32_1 = arith.constant 0 : i32
    return %c0_i32, %c0_i32_0 : i32, i32
  }
  func.func @transform_4(%arg0: i32) -> (i32, i32) {
    %c0_i32 = arith.constant 0 : i32
    %c0_i32_0 = arith.constant 0 : i32
    %c0_i32_1 = arith.constant 0 : i32
    return %c0_i32, %c0_i32_0 : i32, i32
  }
  func.func @transform_5(%arg0: i32) -> (i32, i32, i32) {
    %c0_i32 = arith.constant 0 : i32
    %c0_i32_0 = arith.constant 0 : i32
    %c0_i32_1 = arith.constant 0 : i32
    return %arg0, %c0_i32, %c0_i32_0 : i32, i32, i32
  }
}

module attributes {stable_mosaic.version = 11 : i64} {
  func.func @kernel(%arg0: i32, %arg1: memref<64x1x256xf32, #tpu.memory_space<vmem>>, %arg2: memref<1x256xf32, #tpu.memory_space<vmem>>, %arg3: memref<1x256xf32, #tpu.memory_space<vmem>>, %arg4: memref<256x256xf32, #tpu.memory_space<vmem>>, %arg5: memref<1x256xf32, #tpu.memory_space<vmem>>, %arg6: memref<64x1x256xf32, #tpu.memory_space<vmem>>) attributes {dimension_semantics = [#tpu.dimension_semantics<parallel>], iteration_bounds = array<i64: 2>, scalar_prefetch = 0 : i64, scratch_operands = 0 : i64, tpu.core_type = #tpu.core_type<tc>, window_params = [{transform_indices = @transform_0, window_bounds = array<i64: 64, 1, 256>}, {pipeline_mode = #tpu.pipeline_mode<synchronous>, transform_indices = @transform_1, window_bounds = array<i64: 1, 256>}, {pipeline_mode = #tpu.pipeline_mode<synchronous>, transform_indices = @transform_2, window_bounds = array<i64: 1, 256>}, {pipeline_mode = #tpu.pipeline_mode<synchronous>, transform_indices = @transform_3, window_bounds = array<i64: 256, 256>}, {pipeline_mode = #tpu.pipeline_mode<synchronous>, transform_indices = @transform_4, window_bounds = array<i64: 1, 256>}, {transform_indices = @transform_5, window_bounds = array<i64: 64, 1, 256>}]} {
    %c0 = arith.constant 0 : index
    %c0_0 = arith.constant 0 : index
    %0 = vector.load %arg2[%c0, %c0_0] : memref<1x256xf32, #tpu.memory_space<vmem>>, vector<1x256xf32>
    %1 = vector.shape_cast %0 : vector<1x256xf32> to vector<1x1x256xf32>
    %c0_1 = arith.constant 0 : index
    %c0_2 = arith.constant 0 : index
    %2 = vector.load %arg3[%c0_1, %c0_2] : memref<1x256xf32, #tpu.memory_space<vmem>>, vector<1x256xf32>
    %3 = vector.shape_cast %2 : vector<1x256xf32> to vector<1x1x256xf32>
    %c0_3 = arith.constant 0 : index
    %c0_4 = arith.constant 0 : index
    %c0_5 = arith.constant 0 : index
    %4 = vector.load %arg1[%c0_3, %c0_4, %c0_5] : memref<64x1x256xf32, #tpu.memory_space<vmem>>, vector<64x1x256xf32>
    %5 = vector.broadcast %1 : vector<1x1x256xf32> to vector<64x1x256xf32>
    %6 = arith.mulf %4, %5 : vector<64x1x256xf32>
    %7 = vector.broadcast %3 : vector<1x1x256xf32> to vector<64x1x256xf32>
    %8 = arith.addf %6, %7 : vector<64x1x256xf32>
    %9 = vector.shape_cast %8 : vector<64x1x256xf32> to vector<64x256xf32>
    %c0_6 = arith.constant 0 : index
    %c0_7 = arith.constant 0 : index
    %10 = vector.load %arg4[%c0_6, %c0_7] : memref<256x256xf32, #tpu.memory_space<vmem>>, vector<256x256xf32>
    %cst = arith.constant dense<0.000000e+00> : vector<64x256xf32>
    %11 = tpu.matmul %9, %10, %cst {dimension_numbers = #tpu.dot_dimension_numbers<[1], [0], [0], [1], [0, 0, 1, 1], [], []>} : vector<64x256xf32>, vector<256x256xf32>, vector<64x256xf32> -> vector<64x256xf32>
    %c0_8 = arith.constant 0 : index
    %c0_9 = arith.constant 0 : index
    %12 = vector.load %arg5[%c0_8, %c0_9] : memref<1x256xf32, #tpu.memory_space<vmem>>, vector<1x256xf32>
    %13 = vector.broadcast %12 : vector<1x256xf32> to vector<64x256xf32>
    %14 = arith.addf %11, %13 : vector<64x256xf32>
    %15 = vector.shape_cast %14 : vector<64x256xf32> to vector<64x1x256xf32>
    %c0_10 = arith.constant 0 : index
    %c0_11 = arith.constant 0 : index
    %c0_12 = arith.constant 0 : index
    %16 = vector.load %arg6[%c0_10, %c0_11, %c0_12] : memref<64x1x256xf32, #tpu.memory_space<vmem>>, vector<64x1x256xf32>
    tpu.vector_store %arg6[%c0_10, %c0_11, %c0_12], %15 {strides = array<i32>} : memref<64x1x256xf32, #tpu.memory_space<vmem>>, vector<64x1x256xf32>,
    return
  }
  func.func @transform_0(%arg0: i32) -> (i32, i32, i32) {
    %c0_i32 = arith.constant 0 : i32
    %c0_i32_0 = arith.constant 0 : i32
    %c0_i32_1 = arith.constant 0 : i32
    return %arg0, %c0_i32, %c0_i32_0 : i32, i32, i32
  }
  func.func @transform_1(%arg0: i32) -> (i32, i32) {
    %c0_i32 = arith.constant 0 : i32
    %c0_i32_0 = arith.constant 0 : i32
    %c0_i32_1 = arith.constant 0 : i32
    return %c0_i32, %c0_i32_0 : i32, i32
  }
  func.func @transform_2(%arg0: i32) -> (i32, i32) {
    %c0_i32 = arith.constant 0 : i32
    %c0_i32_0 = arith.constant 0 : i32
    %c0_i32_1 = arith.constant 0 : i32
    return %c0_i32, %c0_i32_0 : i32, i32
  }
  func.func @transform_3(%arg0: i32) -> (i32, i32) {
    %c0_i32 = arith.constant 0 : i32
    %c0_i32_0 = arith.constant 0 : i32
    %c0_i32_1 = arith.constant 0 : i32
    return %c0_i32, %c0_i32_0 : i32, i32
  }
  func.func @transform_4(%arg0: i32) -> (i32, i32) {
    %c0_i32 = arith.constant 0 : i32
    %c0_i32_0 = arith.constant 0 : i32
    %c0_i32_1 = arith.constant 0 : i32
    return %c0_i32, %c0_i32_0 : i32, i32
  }
  func.func @transform_5(%arg0: i32) -> (i32, i32, i32) {
    %c0_i32 = arith.constant 0 : i32
    %c0_i32_0 = arith.constant 0 : i32
    %c0_i32_1 = arith.constant 0 : i32
    return %arg0, %c0_i32, %c0_i32_0 : i32, i32, i32
  }
}

</mosaic_0001>

<bundles_post_ra>
// kernel: _lambda_.4
= control target key start
LH: loop header
LB: loop body
LE: loop exit
PB: predicated region body
PF: predicated region fallthrough
CT: control target
= control target key end

     0   :  { %v14_v0 = vlaneseq  ;;  %v224_v7 = vmov 0.0   ;;  %s369_s0 = inlined_call_operand.vmem [shape: f32[128,256], index: 0, kind: input, shape index: {}]   ;;  %s370_s1 = inlined_call_operand.vmem [shape: f32[1,256], index: 1, kind: output, shape index: {0}]   ;;  %s371_s2 = inlined_call_operand.vmem [shape: f32[1,256], index: 2, kind: output, shape index: {1}]  }
   0x1   :  { %v20_v1 = vld [vmem:[%s369_s0] sm:$0xff]  ;;  %v22_v2 = vld [vmem:[%s369_s0 + $0x10] sm:$0xff]  ;;  %v21_v4 = vld [vmem:[%s369_s0 + $0x8] sm:$0xff] }
   0x2   :  { %vm248_vm0 = vcmp.lt.s32.totalorder %v14_v0, 256  ;;  %v23_v5 = vld [vmem:[%s369_s0 + $0x18] sm:$0xff]  ;;  %v53_v6 = vadd.f32 %v22_v2, %v20_v1  ;;  %v24_v8 = vld [vmem:[%s369_s0 + $0x20] sm:$0xff]  ;;  %v25_v10 = vld [vmem:[%s369_s0 + $0x28] sm:$0xff]  ;;  %v120_v22 = vmul.f32 %v20_v1, %v20_v1  ;;  %v121_v25 = vmul.f32 %v21_v4, %v21_v4 }
   0x3   :  { %18 = vst.msk [vmem:[%s370_s1] sm:$0x3] %vm248_vm0, %v224_v7  ;;  %v74_v9 = vadd.f32 %v23_v5, %v21_v4  ;;  %19 = vst.msk [vmem:[%s371_s2] sm:$0x3] %vm248_vm0, %v224_v7  ;;  %v26_v12 = vld [vmem:[%s369_s0 + $0x30] sm:$0xff]  ;;  %v27_v14 = vld [vmem:[%s369_s0 + $0x38] sm:$0xff]  ;;  %v122_v26 = vmul.f32 %v22_v2, %v22_v2  ;;  %v123_v27 = vmul.f32 %v23_v5, %v23_v5 }
   0x4   :  { %v54_v11 = vadd.f32 %v53_v6, %v24_v8  ;;  %v28_v16 = vld [vmem:[%s369_s0 + $0x40] sm:$0xff]  ;;  %v29_v18 = vld [vmem:[%s369_s0 + $0x48] sm:$0xff]  ;;  %v30_v20 = vld [vmem:[%s369_s0 + $0x50] sm:$0xff]  ;;  %v124_v32 = vmul.f32 %v24_v8, %v24_v8  ;;  %v125_v33 = vmul.f32 %v25_v10, %v25_v10  ;;  %v126_v36 = vmul.f32 %v26_v12, %v26_v12 }
   0x5   :  { %v75_v13 = vadd.f32 %v74_v9, %v25_v10  ;;  %v31_v23 = vld [vmem:[%s369_s0 + $0x58] sm:$0xff]  ;;  %v32_v28 = vld [vmem:[%s369_s0 + $0x60] sm:$0xff]  ;;  %v33_v30 = vld [vmem:[%s369_s0 + $0x68] sm:$0xff]  ;;  %v127_v39 = vmul.f32 %v27_v14, %v27_v14  ;;  %v152_v40 = vadd.f32 %v122_v26, %v120_v22  ;;  %v173_v41 = vadd.f32 %v123_v27, %v121_v25 }
   0x6   :  { %v55_v15 = vadd.f32 %v54_v11, %v26_v12  ;;  %v34_v34 = vld [vmem:[%s369_s0 + $0x70] sm:$0xff]  ;;  %v35_v37 = vld [vmem:[%s369_s0 + $0x78] sm:$0xff]  ;;  %v36_v42 = vld [vmem:[%s369_s0 + $0x80] sm:$0xff]  ;;  %v128_v44 = vmul.f32 %v28_v16, %v28_v16  ;;  %v129_v47 = vmul.f32 %v29_v18, %v29_v18  ;;  %v130_v52 = vmul.f32 %v30_v20, %v30_v20 }
   0x7   :  { %v76_v17 = vadd.f32 %v75_v13, %v27_v14  ;;  %v37_v45 = vld [vmem:[%s369_s0 + $0x88] sm:$0xff]  ;;  %v153_v48 = vadd.f32 %v152_v40, %v124_v32  ;;  %v174_v49 = vadd.f32 %v173_v41, %v125_v33  ;;  %v38_v50 = vld [vmem:[%s369_s0 + $0x90] sm:$0xff]  ;;  %v39_v53 = vld [vmem:[%s369_s0 + $0x98] sm:$0xff]  ;;  %v131_v55 = vmul.f32 %v31_v23, %v31_v23 }
   0x8   :  { %v56_v19 = vadd.f32 %v55_v15, %v28_v16  ;;  %v40_v58 = vld [vmem:[%s369_s0 + $0xa0] sm:$0xff]  ;;  %v132_v60 = vmul.f32 %v32_v28, %v32_v28  ;;  %v41_v61 = vld [vmem:[%s369_s0 + $0xa8] sm:$0xff]  ;;  %v133_v63 = vmul.f32 %v33_v30, %v33_v30  ;;  %v42_v4 = vld [vmem:[%s369_s0 + $0xb0] sm:$0xff]  ;;  %v134_v6 = vmul.f32 %v34_v34, %v34_v34 }
   0x9   :  { %v77_v21 = vadd.f32 %v76_v17, %v29_v18  ;;  %v154_v56 = vadd.f32 %v153_v48, %v126_v36  ;;  %v175_v57 = vadd.f32 %v174_v49, %v127_v39  ;;  %v43_v7 = vld [vmem:[%s369_s0 + $0xb8] sm:$0xff]  ;;  %v135_v9 = vmul.f32 %v35_v37, %v35_v37  ;;  %v44_v12 = vld [vmem:[%s369_s0 + $0xc0] sm:$0xff]  ;;  %v45_v15 = vld [vmem:[%s369_s0 + $0xc8] sm:$0xff] }
   0xa   :  { %v57_v24 = vadd.f32 %v56_v19, %v30_v20  ;;  %v136_v14 = vmul.f32 %v36_v42, %v36_v42  ;;  %v137_v17 = vmul.f32 %v37_v45, %v37_v45  ;;  %v46_v20 = vld [vmem:[%s369_s0 + $0xd0] sm:$0xff]  ;;  %v138_v22 = vmul.f32 %v38_v50, %v38_v50  ;;  %v51_v39 = vld [vmem:[%s369_s0 + $0xf8] sm:$0xff] }
   0xb   :  { %v78_v29 = vadd.f32 %v77_v21, %v31_v23  ;;  %v155_v1 = vadd.f32 %v154_v56, %v128_v44  ;;  %v176_v2 = vadd.f32 %v175_v57, %v129_v47  ;;  %v47_v23 = vld [vmem:[%s369_s0 + $0xd8] sm:$0xff]  ;;  %v139_v25 = vmul.f32 %v39_v53, %v39_v53  ;;  %v50_v36 = vld [vmem:[%s369_s0 + $0xf0] sm:$0xff] }
   0xc   :  { %v58_v31 = vadd.f32 %v57_v24, %v32_v28  ;;  %v48_v28 = vld [vmem:[%s369_s0 + $0xe0] sm:$0xff]  ;;  %v141_v33 = vmul.f32 %v41_v61, %v41_v61  ;;  %v143_v41 = vmul.f32 %v43_v7, %v43_v7  ;;  %v145_v47 = vmul.f32 %v45_v15, %v45_v15 }
   0xd   :  { %v79_v35 = vadd.f32 %v78_v29, %v33_v30  ;;  %v156_v10 = vadd.f32 %v155_v1, %v130_v52  ;;  %v177_v11 = vadd.f32 %v176_v2, %v131_v55  ;;  %v140_v30 = vmul.f32 %v40_v58, %v40_v58 }
   0xe   :  { %v59_v38 = vadd.f32 %v58_v31, %v34_v34  ;;  %v49_v31 = vld [vmem:[%s369_s0 + $0xe8] sm:$0xff]  ;;  %v225_v57 = vmov 1966171168   ;;  %v150_v2 = vmul.f32 %v50_v36, %v50_v36 }
   0xf   :  { %v80_v43 = vadd.f32 %v79_v35, %v35_v37  ;;  %v157_v18 = vadd.f32 %v156_v10, %v132_v60  ;;  %v178_v19 = vadd.f32 %v177_v11, %v133_v63  ;;  %v102_v10 = vshrl.u32 %v14_v0, 7 }
  0x10   :  { %v60_v46 = vadd.f32 %v59_v38, %v36_v42  ;;  %v142_v38 = vmul.f32 %v42_v4, %v42_v4 }
  0x11   :  { %v81_v51 = vadd.f32 %v80_v43, %v37_v45  ;;  %v158_v26 = vadd.f32 %v157_v18, %v134_v6  ;;  %v179_v27 = vadd.f32 %v178_v19, %v135_v9  ;;  %v144_v45 = vmul.f32 %v44_v12, %v44_v12 }
  0x12   :  { %v61_v54 = vadd.f32 %v60_v46, %v38_v50 }
  0x13   :  { %v82_v59 = vadd.f32 %v81_v51, %v39_v53  ;;  %v159_v34 = vadd.f32 %v158_v26, %v136_v14  ;;  %v180_v35 = vadd.f32 %v179_v27, %v137_v17  ;;  %v146_v51 = vmul.f32 %v46_v20, %v46_v20  ;;  %v52_v26 = vld [vmem:[%s370_s1] sm:$0x3] }
  0x14   :  { %v62_v62 = vadd.f32 %v61_v54, %v40_v58  ;;  %v147_v53 = vmul.f32 %v47_v23, %v47_v23  ;;  %v99_v58 = vunpack.c.l.s4 %v225_v57 }
  0x15   :  { %v83_v5 = vadd.f32 %v82_v59, %v41_v61  ;;  %v160_v42 = vadd.f32 %v159_v34, %v138_v22  ;;  %v181_v43 = vadd.f32 %v180_v35, %v139_v25  ;;  %v148_v59 = vmul.f32 %v48_v28, %v48_v28 }
  0x16   :  { %v63_v8 = vadd.f32 %v62_v62, %v42_v4  ;;  %v149_v61 = vmul.f32 %v49_v31, %v49_v31  ;;  %v100_v9 = vunpack.c.0.s8 %v99_v58 }
  0x17   :  { %v84_v13 = vadd.f32 %v83_v5, %v43_v7  ;;  %v161_v48 = vadd.f32 %v160_v42, %v140_v30  ;;  %v182_v49 = vadd.f32 %v181_v43, %v141_v33  ;;  %v151_v5 = vmul.f32 %v51_v39, %v51_v39 }
  0x18   :  { %v64_v16 = vadd.f32 %v63_v8, %v44_v12  ;;  %v103_v19 = vsub.s32 %v100_v9, %v102_v10 }
  0x19   :  { %v85_v21 = vadd.f32 %v84_v13, %v45_v15  ;;  %v162_v54 = vadd.f32 %v161_v48, %v142_v38  ;;  %v183_v55 = vadd.f32 %v182_v49, %v143_v41  ;;  %v119_v38 = vld [vmem:[%s371_s2] sm:$0x3] }
  0x1a   :  { %v65_v24 = vadd.f32 %v64_v16, %v46_v20 }
  0x1b   :  { %v86_v29 = vadd.f32 %v85_v21, %v47_v23  ;;  %v163_v62 = vadd.f32 %v162_v54, %v144_v45  ;;  %v184_v63 = vadd.f32 %v183_v55, %v145_v47 }
  0x1c   :  { %v66_v32 = vadd.f32 %v65_v24, %v48_v28 }
  0x1d   :  { %v87_v37 = vadd.f32 %v86_v29, %v49_v31  ;;  %v164_v6 = vadd.f32 %v163_v62, %v146_v51  ;;  %v185_v7 = vadd.f32 %v184_v63, %v147_v53 }
  0x1e   :  { %v67_v40 = vadd.f32 %v66_v32, %v50_v36 }
  0x1f   :  { %v88_v44 = vadd.f32 %v87_v37, %v51_v39  ;;  %v165_v12 = vadd.f32 %v164_v6, %v148_v59  ;;  %v186_v13 = vadd.f32 %v185_v7, %v149_v61 }
  0x20   :  { %v68_v46 = vrot.slane %v67_v40, 4 }
  0x21   :  { %v89_v50 = vrot.slane %v88_v44, 4  ;;  %v166_v16 = vadd.f32 %v165_v12, %v150_v2  ;;  %v187_v17 = vadd.f32 %v186_v13, %v151_v5 }
  0x22   :  { %v69_v52 = vadd.f32 %v68_v46, %v67_v40 }
  0x23   :  { %v90_v56 = vadd.f32 %v89_v50, %v88_v44  ;;  %v167_v20 = vrot.slane %v166_v16, 4  ;;  %v188_v21 = vrot.slane %v187_v17, 4 }
  0x24   :  { %v70_v60 = vrot.slane %v69_v52, 2 }
  0x25   :  { %v91_v1 = vrot.slane %v90_v56, 2  ;;  %v168_v23 = vadd.f32 %v167_v20, %v166_v16  ;;  %v189_v24 = vadd.f32 %v188_v21, %v187_v17 }
  0x26   :  { %v71_v4 = vadd.f32 %v70_v60, %v69_v52 }
  0x27   :  { %v92_v8 = vadd.f32 %v91_v1, %v90_v56  ;;  %v169_v0 = vrot.slane %v168_v23, 2  ;;  %v190_v27 = vrot.slane %v189_v24, 2 }
  0x28   :  { %v72_v11 = vrot.slane %v71_v4, 1 }
  0x29   :  { %v93_v14 = vrot.slane %v92_v8, 1  ;;  %v170_v29 = vadd.f32 %v169_v0, %v168_v23  ;;  %v191_v30 = vadd.f32 %v190_v27, %v189_v24 }
  0x2a   :  { %v73_v15 = vadd.f32 %v72_v11, %v71_v4 }
  0x2b   :  { %v94_v18 = vadd.f32 %v93_v14, %v92_v8  ;;  %v171_v32 = vrot.slane %v170_v29, 1  ;;  %v192_v33 = vrot.slane %v191_v30, 1 }
  0x2d   :  { %v97_v22 = vcombine.low %v73_v15, %v94_v18  ;;  %v172_v34 = vadd.f32 %v171_v32, %v170_v29  ;;  %v193_v35 = vadd.f32 %v192_v33, %v191_v30 }
  0x2f   :  { %v104_v25 = vrot.slane %v97_v22, %v103_v19  ;;  %v196_v36 = vcombine.low %v172_v34, %v193_v35 }
  0x31   :  { %v111_v28 = vrot.slane %v104_v25, %v103_v19  ;;  %v203_v37 = vrot.slane %v196_v36, %v103_v19 }
  0x33   :  { %v113_v31 = vadd.f32 %v111_v28, %v52_v26  ;;  %v210_v39 = vrot.slane %v203_v37, %v103_v19 }
  0x35   :  { %118 = vst.msk [vmem:[%s370_s1] sm:$0x3] %vm248_vm0, %v113_v31  ;;  %v212_v40 = vadd.f32 %v210_v39, %v119_v38 }
  0x37   :  { %213 = vst.msk [vmem:[%s371_s2] sm:$0x3] %vm248_vm0, %v212_v40 }

// kernel: tile.28
= control target key start
LH: loop header
LB: loop body
LE: loop exit
PB: predicated region body
PF: predicated region fallthrough
CT: control target
= control target key end

     0   :  { %s22_s0 = inlined_call_operand.vmem [shape: f32[32], index: 0, kind: input, shape index: {}]   ;;  %s23_s1 = inlined_call_operand.vmem [shape: f32[8,32], index: 1, kind: output, shape index: {}]  }
   0x1   :  { %v4_v0 = vld [vmem:[%s22_s0] ss:$0 sm:$0xff] }
   0x2   :  { %5 = vst [vmem:[%s23_s1] sm:$0xff] %v4_v0 }

// kernel: tile.29
= control target key start
LH: loop header
LB: loop body
LE: loop exit
PB: predicated region body
PF: predicated region fallthrough
CT: control target
= control target key end

     0   :  { %s7_s6 = smov 3  ;;  %s14_s9 = smov 3  ;;  %vm4_vm0 = vcmask 261120   ;;  %vm11_vm1 = vcmask 1048320   ;;  %vm18_vm2 = vcmask 785920   ;;  %vm25_vm3 = vcmask 523520   ;;  %s76_s0 = inlined_call_operand.vmem [shape: f32[8,32], index: 0, kind: input, shape index: {}]   ;;  %s77_s1 = inlined_call_operand.vmem [shape: f32[1,256], index: 1, kind: output, shape index: {}]  }
   0x1   :  { %v38_v0 = vld [vmem:[%s76_s0 + $0x3] ss:$4 sm:%s7_s6]   ;;  %s45_s10 = smov 96   ;;  %s21_s11 = smov 3  ;;  %v39_v1 = vld [vmem:[%s76_s0 + $0x2] ss:$4 sm:%s14_s9]  }
   0x2   :  { %9 = vrot.lane.b32.xlu0 %v38_v0, %s45_s10  ;;  %v40_v2 = vld [vmem:[%s76_s0 + $0x1] ss:$4 sm:%s21_s11]   ;;  %s2_s16 = smov 3  ;;  %s46_s17 = smov 32  }
   0x3   :  { %23 = vrot.lane.b32.xlu1 %v40_v2, %s46_s17  ;;  %v3_v3 = vld [vmem:[%s76_s0] ss:$4 sm:%s2_s16]   ;;  %s47_s0 = smov 64  }
   0x4   :  { %5 = vst.msk [vmem:[#allocation0] ss:$8 sm:$0x3] %vm4_vm0, %v3_v3  }
   0x6   :  { %16 = vrot.lane.b32.xlu0 %v39_v1, %s47_s0 }
  0x74   :  { %v10_v4 = vpop.permute.xlu0 %9  }
  0x75   :  { %12 = vst.msk [vmem:[#allocation0] ss:$8 sm:$0x3] %vm11_vm1, %v10_v4   ;;  %v24_v5 = vpop.permute.xlu1 %23  }
  0x78   :  { %v17_v6 = vpop.permute.xlu0 %16  }
  0x79   :  { %19 = vst.msk [vmem:[#allocation0] ss:$8 sm:$0x3] %vm18_vm2, %v17_v6  }
  0x7a   :  { %26 = vst.msk [vmem:[#allocation0] ss:$8 sm:$0x3] %vm25_vm3, %v24_v5  }
  0x81   :  { %v30_v7 = vld [vmem:[#allocation0] sm:$0x1]  ;;  %v34_v8 = vld [vmem:[#allocation0 + $0x8] sm:$0x1] }
  0x82   :  { %32 = vst [vmem:[%s77_s1] sm:$0x1] %v30_v7  ;;  %41 = vst [vmem:[%s77_s1 + $0x1] sm:$0x1] %v34_v8 }

// kernel: _lambda_.5
= control target key start
LH: loop header
LB: loop body
LE: loop exit
PB: predicated region body
PF: predicated region fallthrough
CT: control target
= control target key end

     0   :  { %s1662_s18 = smov 0   ;;  %s2458_s0 = inlined_call_operand.vmem [shape: f32[16,8,256], index: 0, kind: input, shape index: {}]   ;;  %s2459_s1 = inlined_call_operand.vmem [shape: f32[1,256], index: 1, kind: input, shape index: {}]   ;;  %s2460_s2 = inlined_call_operand.vmem [shape: f32[1,256], index: 2, kind: input, shape index: {}]   ;;  %s2461_s3 = inlined_call_operand.vmem [shape: f32[768,256], index: 3, kind: input, shape index: {}]   ;;  %s2462_s4 = inlined_call_operand.vmem [shape: f32[1,256], index: 4, kind: input, shape index: {}]   ;;  %s2463_s5 = inlined_call_operand.vmem [shape: f32[16,8,256], index: 5, kind: output, shape index: {}]  }
   0x1 LB: > { %s1327_s19 = sadd.s32 4294967295, %s1629_s18   ;;  %p1331_p0 = scmp.ge.s32.totalorder %s1629_s18, 1  ;;  %s1629_s18 = sphi %s1662_s18, %s15_s18  }
   0x2   : > { %p189_p1 = scmp.lt.s32.totalorder %s1629_s18, 3 }
   0x4   : > { %p190_p2 = pnand %p1331_p0, %p189_p1 }
   0x5   : > { %v711_v0 = vld [vmem:[%s2461_s3 + $0x8] sm:$0xff] (!%p190_p2)  ;;  %v713_v1 = vld [vmem:[%s2461_s3 + $0x18] sm:$0xff] (!%p190_p2)  ;;  %v252_v3 = vlaneseq (!%p190_p2)  ;;  %v710_v6 = vld [vmem:[%s2461_s3] sm:$0xff] (!%p190_p2)  ;;  %v1631_v18 = vmov (!%p190_p2), 0.0   ;;  %s1332_s12 = sshll.u32 (!%p190_p2), %s1327_s19, 3  ;;  %vm548_vm1 = vcmask (!%p190_p2), 1046528  }
   0x6   : > { %193 = sbr.rel (%p190_p2) target bundleno = 371 (0x173), region = 40  ;;  %v775_v2 = vld [vmem:[%s2461_s3 + $0x208] sm:$0xff] (!%p190_p2)  ;;  %v1342_v4 = vpack.c.bf16 (!%p190_p2), %v713_v1, %v711_v0  ;;  %v777_v5 = vld [vmem:[%s2461_s3 + $0x218] sm:$0xff] (!%p190_p2)  ;;  %v712_v7 = vld [vmem:[%s2461_s3 + $0x10] sm:$0xff] (!%p190_p2)  ;;  %p220_p3 = scmp.lt.s32.totalorder (!%p190_p2), %s1332_s12, 15  ;;  %vm645_vm2 = vcmask (!%p190_p2), 1045504  }
   0x7   : > { %v1406_v8 = vpack.c.bf16 (!%p190_p2), %v777_v5, %v775_v2  ;;  %v1344_v9 = vpack.c.bf16 (!%p190_p2), %v712_v7, %v710_v6  ;;  %v774_v10 = vld [vmem:[%s2461_s3 + $0x200] sm:$0xff] (!%p190_p2)  ;;  %v776_v11 = vld [vmem:[%s2461_s3 + $0x210] sm:$0xff] (!%p190_p2)  ;;  %v715_v12 = vld [vmem:[%s2461_s3 + $0x28] sm:$0xff] (!%p190_p2)  ;;  %vm1698_vm0 = vcmp.lt.s32.totalorder (!%p190_p2), %v252_v3, 256 }
   0x8   : > { %1343 = vmatprep.subr.bf16.mxu1 (!%p190_p2), %v1342_v4  ;;  %v1408_v14 = vpack.c.bf16 (!%p190_p2), %v776_v11, %v774_v10  ;;  %v717_v15 = vld [vmem:[%s2461_s3 + $0x38] sm:$0xff] (!%p190_p2)  ;;  %v779_v16 = vld [vmem:[%s2461_s3 + $0x228] sm:$0xff] (!%p190_p2)  ;;  %309 = vst.msk [vmem:[#allocation2] ss:$8 sm:$0x3] (!%p190_p2), %vm1698_vm0, %v1631_v18  ;;  %v714_v21 = vld [vmem:[%s2461_s3 + $0x20] sm:$0xff] (!%p190_p2) }
   0x9   : > { %v781_v17 = vld [vmem:[%s2461_s3 + $0x238] sm:$0xff] (!%p190_p2)  ;;  %312 = vst.msk [vmem:[#allocation2 + $0x20] ss:$8 sm:$0x3] (!%p190_p2), %vm1698_vm0, %v1631_v18  ;;  %1407 = vmatprep.subr.bf16.mxu0 (!%p190_p2), %v1406_v8  ;;  %1345 = vmatpush1.bf16.msra.mxu1 (!%p190_p2), %v1344_v9  ;;  %v1346_v19 = vpack.c.bf16 (!%p190_p2), %v717_v15, %v715_v12  ;;  %v716_v22 = vld [vmem:[%s2461_s3 + $0x30] sm:$0xff] (!%p190_p2)  ;;  %v778_v23 = vld [vmem:[%s2461_s3 + $0x220] sm:$0xff] (!%p190_p2) }
   0xa   : > { %315 = vst.msk [vmem:[#allocation2 + $0x40] ss:$8 sm:$0x3] (!%p190_p2), %vm1698_vm0, %v1631_v18  ;;  %318 = vst.msk [vmem:[#allocation2 + $0x60] ss:$8 sm:$0x3] (!%p190_p2), %vm1698_vm0, %v1631_v18  ;;  %v1410_v20 = vpack.c.bf16 (!%p190_p2), %v781_v17, %v779_v16  ;;  %1409 = vmatpush1.bf16.msra.mxu0 (!%p190_p2), %v1408_v14  ;;  %v1348_v24 = vpack.c.bf16 (!%p190_p2), %v716_v22, %v714_v21 }
   0xb   : > { %321 = vst.msk [vmem:[#allocation2 + $0x80] ss:$8 sm:$0x3] (!%p190_p2), %vm1698_vm0, %v1631_v18  ;;  %324 = vst.msk [vmem:[#allocation2 + $0xa0] ss:$8 sm:$0x3] (!%p190_p2), %vm1698_vm0, %v1631_v18  ;;  %1347 = vmatprep.subr.bf16.mxu1 (!%p190_p2), %v1346_v19 }
   0xc   : > { %327 = vst.msk [vmem:[#allocation2 + $0xc0] ss:$8 sm:$0x3] (!%p190_p2), %vm1698_vm0, %v1631_v18  ;;  %330 = vst.msk [vmem:[#allocation2 + $0xe0] ss:$8 sm:$0x3] (!%p190_p2), %vm1698_vm0, %v1631_v18  ;;  %1411 = vmatprep.subr.bf16.mxu0 (!%p190_p2), %v1410_v20 }
   0xd   : > { %333 = vst.msk [vmem:[#allocation2 + $0x11] ss:$8 sm:$0x3] %vm1698_vm0, %v1631_v18  ;;  %336 = vst.msk [vmem:[#allocation2 + $0x31] ss:$8 sm:$0x3] %vm1698_vm0, %v1631_v18  ;;  %1349 = vmatpush1.bf16.msra.mxu1 %v1348_v24 }
   0xe   : > { %339 = vst.msk [vmem:[#allocation2 + $0x51] ss:$8 sm:$0x3] %vm1698_vm0, %v1631_v18  ;;  %342 = vst.msk [vmem:[#allocation2 + $0x71] ss:$8 sm:$0x3] %vm1698_vm0, %v1631_v18 }
   0xf   : > { %345 = vst.msk [vmem:[#allocation2 + $0x91] ss:$8 sm:$0x3] %vm1698_vm0, %v1631_v18  ;;  %348 = vst.msk [vmem:[#allocation2 + $0xb1] ss:$8 sm:$0x3] %vm1698_vm0, %v1631_v18 }
  0x10   : > { %351 = vst.msk [vmem:[#allocation2 + $0xd1] ss:$8 sm:$0x3] %vm1698_vm0, %v1631_v18  ;;  %354 = vst.msk [vmem:[#allocation2 + $0xf1] ss:$8 sm:$0x3] %vm1698_vm0, %v1631_v18 }
  0x11   : > { %v780_v25 = vld [vmem:[%s2461_s3 + $0x230] sm:$0xff]  ;;  %v719_v26 = vld [vmem:[%s2461_s3 + $0x48] sm:$0xff]  ;;  %v721_v27 = vld [vmem:[%s2461_s3 + $0x58] sm:$0xff]  ;;  %s2467_s12 = smov (!%p220_p3, %s1332_s12), 15 }
  0x12   : > { %v1412_v28 = vpack.c.bf16 %v780_v25, %v778_v23  ;;  %v1350_v29 = vpack.c.bf16 %v721_v27, %v719_v26  ;;  %v783_v30 = vld [vmem:[%s2461_s3 + $0x248] sm:$0xff]  ;;  %v785_v31 = vld [vmem:[%s2461_s3 + $0x258] sm:$0xff]  ;;  %v718_v32 = vld [vmem:[%s2461_s3 + $0x40] sm:$0xff]  ;;  %s1340_s8 = sshll.u32 %s2467_s12, 4 }
  0x13   : > { %v1414_v33 = vpack.c.bf16 %v785_v31, %v783_v30  ;;  %v720_v34 = vld [vmem:[%s2461_s3 + $0x50] sm:$0xff]  ;;  %v782_v35 = vld [vmem:[%s2461_s3 + $0x240] sm:$0xff]  ;;  %v723_v38 = vld [vmem:[%s2461_s3 + $0x68] sm:$0xff]  ;;  %s2008_s29 = scalar_lea.vmem %s2458_s0, %s1340_s8  ;;  %s2429_s16 = scalar_lea.vmem %s2463_s5, %s1340_s8 }
  0x14   : > { %v784_v36 = vld [vmem:[%s2461_s3 + $0x250] sm:$0xff]  ;;  %v1352_v37 = vpack.c.bf16 %v720_v34, %v718_v32  ;;  %v725_v39 = vld [vmem:[%s2461_s3 + $0x78] sm:$0xff]  ;;  %v787_v40 = vld [vmem:[%s2461_s3 + $0x268] sm:$0xff]  ;;  %1413 = vmatpush1.bf16.msra.mxu0 %v1412_v28  ;;  %1351 = vmatprep.subr.bf16.mxu1 %v1350_v29 }
  0x15   : > { %v1416_v41 = vpack.c.bf16 %v784_v36, %v782_v35  ;;  %v1354_v42 = vpack.c.bf16 %v725_v39, %v723_v38  ;;  %v789_v43 = vld [vmem:[%s2461_s3 + $0x278] sm:$0xff]  ;;  %v722_v44 = vld [vmem:[%s2461_s3 + $0x60] sm:$0xff]  ;;  %v724_v45 = vld [vmem:[%s2461_s3 + $0x70] sm:$0xff]  ;;  %1415 = vmatprep.subr.bf16.mxu0 %v1414_v33 }
  0x16   : > { %v1418_v46 = vpack.c.bf16 %v789_v43, %v787_v40  ;;  %v786_v47 = vld [vmem:[%s2461_s3 + $0x260] sm:$0xff]  ;;  %v788_v48 = vld [vmem:[%s2461_s3 + $0x270] sm:$0xff]  ;;  %v727_v49 = vld [vmem:[%s2461_s3 + $0x88] sm:$0xff]  ;;  %1353 = vmatpush1.bf16.msra.mxu1 %v1352_v37  ;;  %v1356_v53 = vpack.c.bf16 %v724_v45, %v722_v44 }
  0x17   : > { %v729_v50 = vld [vmem:[%s2461_s3 + $0x98] sm:$0xff]  ;;  %v791_v51 = vld [vmem:[%s2461_s3 + $0x288] sm:$0xff]  ;;  %1355 = vmatprep.subr.bf16.mxu1 %v1354_v42  ;;  %v1420_v54 = vpack.c.bf16 %v788_v48, %v786_v47  ;;  %v726_v56 = vld [vmem:[%s2461_s3 + $0x80] sm:$0xff] }
  0x18   : > { %v793_v52 = vld [vmem:[%s2461_s3 + $0x298] sm:$0xff]  ;;  %1417 = vmatpush1.bf16.msra.mxu0 %v1416_v41  ;;  %v1358_v55 = vpack.c.bf16 %v729_v50, %v727_v49  ;;  %v728_v57 = vld [vmem:[%s2461_s3 + $0x90] sm:$0xff]  ;;  %v790_v58 = vld [vmem:[%s2461_s3 + $0x280] sm:$0xff] }
  0x19   : > { %1419 = vmatprep.subr.bf16.mxu0 %v1418_v46  ;;  %v1422_v59 = vpack.c.bf16 %v793_v52, %v791_v51  ;;  %v792_v60 = vld [vmem:[%s2461_s3 + $0x290] sm:$0xff]  ;;  %v731_v61 = vld [vmem:[%s2461_s3 + $0xa8] sm:$0xff]  ;;  %v733_v62 = vld [vmem:[%s2461_s3 + $0xb8] sm:$0xff]  ;;  %v1360_v1 = vpack.c.bf16 %v728_v57, %v726_v56 }
  0x1a   : > { %v795_v63 = vld [vmem:[%s2461_s3 + $0x2a8] sm:$0xff]  ;;  %v797_v0 = vld [vmem:[%s2461_s3 + $0x2b8] sm:$0xff]  ;;  %1357 = vmatpush1.bf16.msra.mxu1 %v1356_v53  ;;  %v1424_v2 = vpack.c.bf16 %v792_v60, %v790_v58  ;;  %v1362_v4 = vpack.c.bf16 %v733_v62, %v731_v61  ;;  %v730_v5 = vld [vmem:[%s2461_s3 + $0xa0] sm:$0xff]  ;;  %v253_v62 = vshrl.u32 %v252_v3, 7 }
  0x1b   : > { %1359 = vmatprep.subr.bf16.mxu1 %v1358_v55  ;;  %v732_v6 = vld [vmem:[%s2461_s3 + $0xb0] sm:$0xff]  ;;  %v794_v7 = vld [vmem:[%s2461_s3 + $0x2a0] sm:$0xff]  ;;  %v1426_v8 = vpack.c.bf16 %v797_v0, %v795_v63  ;;  %v735_v10 = vld [vmem:[%s2461_s3 + $0xc8] sm:$0xff] }
  0x1c   : > { %1421 = vmatpush1.bf16.msra.mxu0 %v1420_v54  ;;  %v796_v9 = vld [vmem:[%s2461_s3 + $0x2b0] sm:$0xff]  ;;  %v737_v11 = vld [vmem:[%s2461_s3 + $0xd8] sm:$0xff]  ;;  %v799_v12 = vld [vmem:[%s2461_s3 + $0x2c8] sm:$0xff]  ;;  %v1364_v14 = vpack.c.bf16 %v732_v6, %v730_v5 }
  0x1d   : > { %1423 = vmatprep.subr.bf16.mxu0 %v1422_v59  ;;  %v801_v13 = vld [vmem:[%s2461_s3 + $0x2d8] sm:$0xff]  ;;  %v1428_v15 = vpack.c.bf16 %v796_v9, %v794_v7  ;;  %v1366_v16 = vpack.c.bf16 %v737_v11, %v735_v10  ;;  %v734_v17 = vld [vmem:[%s2461_s3 + $0xc0] sm:$0xff]  ;;  %v736_v18 = vld [vmem:[%s2461_s3 + $0xd0] sm:$0xff]  ;;  %v1990_v11 = vsub.s32 1, %v253_v62 }
  0x1e   : > { %1361 = vmatpush1.bf16.msra.mxu1 %v1360_v1  ;;  %v798_v19 = vld [vmem:[%s2461_s3 + $0x2c0] sm:$0xff]  ;;  %v1430_v20 = vpack.c.bf16 %v801_v13, %v799_v12  ;;  %v800_v21 = vld [vmem:[%s2461_s3 + $0x2d0] sm:$0xff]  ;;  %v739_v22 = vld [vmem:[%s2461_s3 + $0xe8] sm:$0xff]  ;;  %v1368_v26 = vpack.c.bf16 %v736_v18, %v734_v17  ;;  %v1992_v12 = vsub.s32 0, %v253_v62 }
  0x1f   : > { %1363 = vmatprep.subr.bf16.mxu1 %v1362_v4  ;;  %v741_v23 = vld [vmem:[%s2461_s3 + $0xf8] sm:$0xff]  ;;  %v803_v24 = vld [vmem:[%s2461_s3 + $0x2e8] sm:$0xff]  ;;  %v1432_v27 = vpack.c.bf16 %v800_v21, %v798_v19  ;;  %v738_v29 = vld [vmem:[%s2461_s3 + $0xe0] sm:$0xff] }
  0x20   : > { %1425 = vmatpush1.bf16.msra.mxu0 %v1424_v2  ;;  %v805_v25 = vld [vmem:[%s2461_s3 + $0x2f8] sm:$0xff]  ;;  %v1370_v28 = vpack.c.bf16 %v741_v23, %v739_v22  ;;  %v740_v30 = vld [vmem:[%s2461_s3 + $0xf0] sm:$0xff]  ;;  %v802_v31 = vld [vmem:[%s2461_s3 + $0x2e0] sm:$0xff] }
  0x21   : > { %1427 = vmatprep.subr.bf16.mxu0 %v1426_v8  ;;  %v1434_v32 = vpack.c.bf16 %v805_v25, %v803_v24  ;;  %v804_v33 = vld [vmem:[%s2461_s3 + $0x2f0] sm:$0xff]  ;;  %v743_v34 = vld [vmem:[%s2461_s3 + $0x108] sm:$0xff]  ;;  %v745_v35 = vld [vmem:[%s2461_s3 + $0x118] sm:$0xff]  ;;  %v1372_v38 = vpack.c.bf16 %v740_v30, %v738_v29 }
  0x22   : > { %1365 = vmatpush1.bf16.msra.mxu1 %v1364_v14  ;;  %v807_v36 = vld [vmem:[%s2461_s3 + $0x308] sm:$0xff]  ;;  %v809_v37 = vld [vmem:[%s2461_s3 + $0x318] sm:$0xff]  ;;  %v1436_v39 = vpack.c.bf16 %v804_v33, %v802_v31  ;;  %v1374_v40 = vpack.c.bf16 %v745_v35, %v743_v34  ;;  %v742_v41 = vld [vmem:[%s2461_s3 + $0x100] sm:$0xff] }
  0x23   : > { %1367 = vmatprep.subr.bf16.mxu1 %v1366_v16  ;;  %v744_v42 = vld [vmem:[%s2461_s3 + $0x110] sm:$0xff]  ;;  %v806_v43 = vld [vmem:[%s2461_s3 + $0x300] sm:$0xff]  ;;  %v1438_v44 = vpack.c.bf16 %v809_v37, %v807_v36  ;;  %v747_v46 = vld [vmem:[%s2461_s3 + $0x128] sm:$0xff] }
  0x24   : > { %1429 = vmatpush1.bf16.msra.mxu0 %v1428_v15  ;;  %v808_v45 = vld [vmem:[%s2461_s3 + $0x310] sm:$0xff]  ;;  %v749_v47 = vld [vmem:[%s2461_s3 + $0x138] sm:$0xff]  ;;  %v811_v48 = vld [vmem:[%s2461_s3 + $0x328] sm:$0xff]  ;;  %v1376_v50 = vpack.c.bf16 %v744_v42, %v742_v41 }
  0x25   : > { %1431 = vmatprep.subr.bf16.mxu0 %v1430_v20  ;;  %v813_v49 = vld [vmem:[%s2461_s3 + $0x338] sm:$0xff]  ;;  %v1440_v51 = vpack.c.bf16 %v808_v45, %v806_v43  ;;  %v1378_v52 = vpack.c.bf16 %v749_v47, %v747_v46  ;;  %v746_v53 = vld [vmem:[%s2461_s3 + $0x120] sm:$0xff]  ;;  %v748_v54 = vld [vmem:[%s2461_s3 + $0x130] sm:$0xff] }
  0x26   : > { %1369 = vmatpush1.bf16.msra.mxu1 %v1368_v26  ;;  %v810_v55 = vld [vmem:[%s2461_s3 + $0x320] sm:$0xff]  ;;  %v1442_v56 = vpack.c.bf16 %v813_v49, %v811_v48  ;;  %v812_v57 = vld [vmem:[%s2461_s3 + $0x330] sm:$0xff]  ;;  %v751_v58 = vld [vmem:[%s2461_s3 + $0x148] sm:$0xff]  ;;  %v1380_v63 = vpack.c.bf16 %v748_v54, %v746_v53 }
  0x27   : > { %1371 = vmatprep.subr.bf16.mxu1 %v1370_v28  ;;  %v753_v59 = vld [vmem:[%s2461_s3 + $0x158] sm:$0xff]  ;;  %v815_v60 = vld [vmem:[%s2461_s3 + $0x348] sm:$0xff]  ;;  %v1444_v0 = vpack.c.bf16 %v812_v57, %v810_v55  ;;  %v750_v2 = vld [vmem:[%s2461_s3 + $0x140] sm:$0xff] }
  0x28   : > { %1433 = vmatpush1.bf16.msra.mxu0 %v1432_v27  ;;  %v817_v61 = vld [vmem:[%s2461_s3 + $0x358] sm:$0xff]  ;;  %v1382_v1 = vpack.c.bf16 %v753_v59, %v751_v58  ;;  %v752_v4 = vld [vmem:[%s2461_s3 + $0x150] sm:$0xff]  ;;  %v814_v5 = vld [vmem:[%s2461_s3 + $0x340] sm:$0xff] }
  0x29   : > { %1435 = vmatprep.subr.bf16.mxu0 %v1434_v32  ;;  %v1446_v3 = vpack.c.bf16 %v817_v61, %v815_v60  ;;  %v816_v6 = vld [vmem:[%s2461_s3 + $0x350] sm:$0xff]  ;;  %v755_v7 = vld [vmem:[%s2461_s3 + $0x168] sm:$0xff]  ;;  %v757_v8 = vld [vmem:[%s2461_s3 + $0x178] sm:$0xff]  ;;  %v1384_v13 = vpack.c.bf16 %v752_v4, %v750_v2 }
  0x2a   : > { %1373 = vmatpush1.bf16.msra.mxu1 %v1372_v38  ;;  %v819_v9 = vld [vmem:[%s2461_s3 + $0x368] sm:$0xff]  ;;  %v821_v10 = vld [vmem:[%s2461_s3 + $0x378] sm:$0xff]  ;;  %v754_v14 = vld [vmem:[%s2461_s3 + $0x160] sm:$0xff]  ;;  %v1448_v17 = vpack.c.bf16 %v816_v6, %v814_v5  ;;  %v1386_v18 = vpack.c.bf16 %v757_v8, %v755_v7 }
  0x2b   : > { %1375 = vmatprep.subr.bf16.mxu1 %v1374_v40  ;;  %v756_v15 = vld [vmem:[%s2461_s3 + $0x170] sm:$0xff]  ;;  %v818_v16 = vld [vmem:[%s2461_s3 + $0x360] sm:$0xff]  ;;  %v759_v20 = vld [vmem:[%s2461_s3 + $0x188] sm:$0xff]  ;;  %v1450_v22 = vpack.c.bf16 %v821_v10, %v819_v9 }
  0x2c   : > { %1437 = vmatpush1.bf16.msra.mxu0 %v1436_v39  ;;  %v820_v19 = vld [vmem:[%s2461_s3 + $0x370] sm:$0xff]  ;;  %v761_v21 = vld [vmem:[%s2461_s3 + $0x198] sm:$0xff]  ;;  %v823_v23 = vld [vmem:[%s2461_s3 + $0x388] sm:$0xff]  ;;  %v1388_v31 = vpack.c.bf16 %v756_v15, %v754_v14 }
  0x2d   : > { %1439 = vmatprep.subr.bf16.mxu0 %v1438_v44  ;;  %v825_v24 = vld [vmem:[%s2461_s3 + $0x398] sm:$0xff]  ;;  %v233_v25 = vld [vmem:[%s2459_s1] sm:$0x3]  ;;  %v236_v27 = vld [vmem:[%s2008_s29 + $0x8] sm:$0xff]  ;;  %v1452_v32 = vpack.c.bf16 %v820_v19, %v818_v16  ;;  %v1390_v35 = vpack.c.bf16 %v761_v21, %v759_v20 }
  0x2e   : > { %1377 = vmatpush1.bf16.msra.mxu1 %v1376_v50  ;;  %v234_v26 = vld [vmem:[%s2460_s2] sm:$0x3]  ;;  %v2033_v28 = vrot.slane %v233_v25, %v1990_v11  ;;  %v2037_v30 = vrot.slane %v233_v25, %v1992_v12  ;;  %v760_v37 = vld [vmem:[%s2461_s3 + $0x190] sm:$0xff]  ;;  %v1454_v41 = vpack.c.bf16 %v825_v24, %v823_v23  ;;  %v763_v43 = vld [vmem:[%s2461_s3 + $0x1a8] sm:$0xff] }
  0x2f   : > { %1379 = vmatprep.subr.bf16.mxu1 %v1378_v52  ;;  %v235_v29 = vld [vmem:[%s2008_s29] sm:$0xff]  ;;  %v2040_v33 = vrot.slane %v234_v26, %v1990_v11  ;;  %v2043_v34 = vrot.slane %v234_v26, %v1992_v12  ;;  %v824_v42 = vld [vmem:[%s2461_s3 + $0x390] sm:$0xff]  ;;  %v765_v44 = vld [vmem:[%s2461_s3 + $0x1b8] sm:$0xff] }
  0x30   : > { %1441 = vmatpush1.bf16.msra.mxu0 %v1440_v51  ;;  %v758_v36 = vld [vmem:[%s2461_s3 + $0x180] sm:$0xff]  ;;  %v263_v39 = vmul.f32 %v2033_v28, %v236_v27  ;;  %v262_v40 = vmul.f32 %v2037_v30, %v235_v29  ;;  %v827_v45 = vld [vmem:[%s2461_s3 + $0x3a8] sm:$0xff]  ;;  %v829_v46 = vld [vmem:[%s2461_s3 + $0x3b8] sm:$0xff]  ;;  %v1394_v51 = vpack.c.bf16 %v765_v44, %v763_v43 }
  0x31   : > { %1443 = vmatprep.subr.bf16.mxu0 %v1442_v56  ;;  %v822_v38 = vld [vmem:[%s2461_s3 + $0x380] sm:$0xff]  ;;  %v1392_v49 = vpack.c.bf16 %v760_v37, %v758_v36  ;;  %v764_v53 = vld [vmem:[%s2461_s3 + $0x1b0] sm:$0xff]  ;;  %v1458_v57 = vpack.c.bf16 %v829_v46, %v827_v45  ;;  %v767_v59 = vld [vmem:[%s2461_s3 + $0x1c8] sm:$0xff] }
  0x32   : > { %1381 = vmatpush1.bf16.msra.mxu1 %v1380_v63  ;;  %v290_v47 = vadd.f32 %v2040_v33, %v263_v39  ;;  %v289_v48 = vadd.f32 %v2043_v34, %v262_v40  ;;  %v1456_v50 = vpack.c.bf16 %v824_v42, %v822_v38  ;;  %v762_v52 = vld [vmem:[%s2461_s3 + $0x1a0] sm:$0xff]  ;;  %v828_v58 = vld [vmem:[%s2461_s3 + $0x3b0] sm:$0xff]  ;;  %v769_v60 = vld [vmem:[%s2461_s3 + $0x1d8] sm:$0xff] }
  0x33   : > { %1383 = vmatprep.subr.bf16.mxu1 %v1382_v1  ;;  %v826_v54 = vld [vmem:[%s2461_s3 + $0x3a0] sm:$0xff]  ;;  %v831_v61 = vld [vmem:[%s2461_s3 + $0x3c8] sm:$0xff]  ;;  %v833_v62 = vld [vmem:[%s2461_s3 + $0x3d8] sm:$0xff]  ;;  %v1396_v63 = vpack.c.bf16 %v764_v53, %v762_v52  ;;  %v1398_v4 = vpack.c.bf16 %v769_v60, %v767_v59 }
  0x34   : > { %1445 = vmatpush1.bf16.msra.mxu0 %v1444_v0  ;;  %v373_v55 = vrot.slane %v290_v47, 7  ;;  %v372_v56 = vrot.slane %v289_v48, 7  ;;  %v766_v0 = vld [vmem:[%s2461_s3 + $0x1c0] sm:$0xff]  ;;  %v768_v1 = vld [vmem:[%s2461_s3 + $0x1d0] sm:$0xff]  ;;  %v1460_v2 = vpack.c.bf16 %v828_v58, %v826_v54  ;;  %v771_v6 = vld [vmem:[%s2461_s3 + $0x1e8] sm:$0xff]  ;;  %v1462_v7 = vpack.c.bf16 %v833_v62, %v831_v61 }
  0x35   : > { %1447 = vmatprep.subr.bf16.mxu0 %v1446_v3  ;;  %v830_v5 = vld [vmem:[%s2461_s3 + $0x3c0] sm:$0xff]  ;;  %v832_v3 = vld [vmem:[%s2461_s3 + $0x3d0] sm:$0xff]  ;;  %v773_v8 = vld [vmem:[%s2461_s3 + $0x1f8] sm:$0xff] }
  0x36   : > { %1385 = vmatpush1.bf16.msra.mxu1 %v1384_v13  ;;  %405 = vst [vmem:[#allocation2 + $0x8] sm:$0xfe] %v373_v55  ;;  %407 = vst [vmem:[#allocation2 + $0x18] sm:$0x1] %v373_v55  ;;  %v835_v9 = vld [vmem:[%s2461_s3 + $0x3e8] sm:$0xff]  ;;  %v238_v10 = vld [vmem:[%s2008_s29 + $0x18] sm:$0xff]  ;;  %v1402_v23 = vpack.c.bf16 %v773_v8, %v771_v6 }
  0x37   : > { %1387 = vmatprep.subr.bf16.mxu1 %v1386_v18  ;;  %404 = vst [vmem:[#allocation2] sm:$0xfe] %v372_v56  ;;  %406 = vst [vmem:[#allocation2 + $0x10] sm:$0x1] %v372_v56  ;;  %v837_v13 = vld [vmem:[%s2461_s3 + $0x3f8] sm:$0xff]  ;;  %v2125_v14 = vld [vmem:[%s2461_s3 + $0x1e0] sm:$0xff]  ;;  %v265_v15 = vmul.f32 %v2033_v28, %v238_v10  ;;  %v1464_v18 = vpack.c.bf16 %v832_v3, %v830_v5 }
  0x38   : > { %1449 = vmatpush1.bf16.msra.mxu0 %v1448_v17  ;;  %v237_v16 = vld [vmem:[%s2008_s29 + $0x10] sm:$0xff]  ;;  %v1400_v17 = vpack.c.bf16 %v768_v1, %v766_v0  ;;  %v2135_v20 = vld [vmem:[%s2461_s3 + $0x3e0] sm:$0xff]  ;;  %v839_v25 = vld [vmem:[%s2461_s3 + $0x408] sm:$0xff] }
  0x39   : > { %1451 = vmatprep.subr.bf16.mxu0 %v1450_v22  ;;  %v772_v19 = vld [vmem:[%s2461_s3 + $0x1f0] sm:$0xff]  ;;  %v264_v21 = vmul.f32 %v2037_v30, %v237_v16  ;;  %v240_v22 = vld [vmem:[%s2008_s29 + $0x28] sm:$0xff]  ;;  %v292_v26 = vadd.f32 %v2040_v33, %v265_v15  ;;  %v239_v29 = vld [vmem:[%s2008_s29 + $0x20] sm:$0xff] }
  0x3a   : > { %1389 = vmatpush1.bf16.msra.mxu1 %v1388_v31  ;;  %v836_v24 = vld [vmem:[%s2461_s3 + $0x3f0] sm:$0xff]  ;;  %v267_v27 = vmul.f32 %v2033_v28, %v240_v22  ;;  %v1466_v31 = vpack.c.bf16 %v837_v13, %v835_v9  ;;  %v841_v36 = vld [vmem:[%s2461_s3 + $0x418] sm:$0xff]  ;;  %v266_v38 = vmul.f32 %v2037_v30, %v239_v29  ;;  %v1404_v39 = vpack.c.bf16 %v772_v19, %v2125_v14  ;;  %v838_v48 = vld [vmem:[%s2461_s3 + $0x400] sm:$0xff] }
  0x3b   : > { %1391 = vmatprep.subr.bf16.mxu1 %v1390_v35  ;;  %v291_v37 = vadd.f32 %v2043_v34, %v264_v21  ;;  %v375_v43 = vrot.slane %v292_v26, 7  ;;  %v1468_v45 = vpack.c.bf16 %v836_v24, %v2135_v20  ;;  %v1470_v52 = vpack.c.bf16 %v841_v36, %v839_v25  ;;  %v843_v55 = vld [vmem:[%s2461_s3 + $0x428] sm:$0xff]  ;;  %v845_v56 = vld [vmem:[%s2461_s3 + $0x438] sm:$0xff]  ;;  %v241_v62 = vld [vmem:[%s2008_s29 + $0x30] sm:$0xff] }
  0x3c   : > { %1453 = vmatpush1.bf16.msra.mxu0 %v1452_v32  ;;  %v294_v44 = vadd.f32 %v2040_v33, %v267_v27  ;;  %v242_v58 = vld [vmem:[%s2008_s29 + $0x38] sm:$0xff]  ;;  %v268_v0 = vmul.f32 %v2037_v30, %v241_v62  ;;  %v244_v1 = vld [vmem:[%s2008_s29 + $0x48] sm:$0xff]  ;;  %v1474_v5 = vpack.c.bf16 %v845_v56, %v843_v55  ;;  %v844_v3 = vld [vmem:[%s2461_s3 + $0x430] sm:$0xff] }
  0x3d   : > { %1455 = vmatprep.subr.bf16.mxu0 %v1454_v41  ;;  %v437_v32 = vld [vmem:[#allocation2 + $0x8] sm:$0xff]  ;;  %v455_v40 = vld [vmem:[#allocation2 + $0x18] sm:$0x1]  ;;  %409 = vst [vmem:[#allocation2 + $0x28] sm:$0xfe] %v375_v43  ;;  %v269_v61 = vmul.f32 %v2033_v28, %v242_v58  ;;  %v243_v8 = vld [vmem:[%s2008_s29 + $0x40] sm:$0xff] }
  0x3e   : > { %1393 = vmatpush1.bf16.msra.mxu1 %v1392_v49  ;;  %v453_v35 = vld [vmem:[#allocation2 + $0x8] sm:$0xfe]  ;;  %978 = vmatprep.mubr.f32.mxu1 %v437_v32  ;;  %v452_v42 = vld [vmem:[#allocation2] sm:$0xfe]  ;;  %v553_v46 = vrot.slane %v455_v40, 1  ;;  %v840_v49 = vld [vmem:[%s2461_s3 + $0x410] sm:$0xff]  ;;  %v295_v14 = vadd.f32 %v2043_v34, %v268_v0  ;;  %v270_v15 = vmul.f32 %v2037_v30, %v243_v8 }
  0x3f   : > { %1395 = vmatprep.subr.bf16.mxu1 %v1394_v51  ;;  %v552_v41 = vrot.slane %v453_v35, 1  ;;  %v454_v47 = vld [vmem:[#allocation2 + $0x10] sm:$0x1]  ;;  %v293_v51 = vadd.f32 %v2043_v34, %v266_v38  ;;  %v549_v53 = vrot.slane %v452_v42, 1  ;;  %411 = vst [vmem:[#allocation2 + $0x38] sm:$0x1] %v375_v43  ;;  %v296_v6 = vadd.f32 %v2040_v33, %v269_v61 }
  0x40   : > { %1457 = vmatpush1.bf16.msra.mxu0 %v1456_v50  ;;  %v374_v50 = vrot.slane %v291_v37, 7  ;;  %v550_v54 = vrot.slane %v454_v47, 1  ;;  %v847_v10 = vld [vmem:[%s2461_s3 + $0x448] sm:$0xff]  ;;  %v849_v13 = vld [vmem:[%s2461_s3 + $0x458] sm:$0xff]  ;;  %v245_v20 = vld [vmem:[%s2008_s29 + $0x50] sm:$0xff]  ;;  %v378_v26 = vrot.slane %v295_v14, 7  ;;  %v297_v27 = vadd.f32 %v2043_v34, %v270_v15 }
  0x41   : > { %1459 = vmatprep.subr.bf16.mxu0 %v1458_v57  ;;  %v377_v57 = vrot.slane %v294_v44, 7  ;;  %v554_v59 = vsel %vm548_vm1, %v552_v41, %v553_v46  ;;  %v376_v60 = vrot.slane %v293_v51, 7  ;;  %v246_v16 = vld [vmem:[%s2008_s29 + $0x58] sm:$0xff]  ;;  %v846_v22 = vld [vmem:[%s2461_s3 + $0x440] sm:$0xff]  ;;  %v851_v24 = vld [vmem:[%s2461_s3 + $0x468] sm:$0xff]  ;;  %v272_v29 = vmul.f32 %v2037_v30, %v245_v20 }
  0x42   : > { %1397 = vmatpush1.bf16.msra.mxu1 %v1396_v63  ;;  %408 = vst [vmem:[#allocation2 + $0x20] sm:$0xfe] %v374_v50  ;;  %410 = vst [vmem:[#allocation2 + $0x30] sm:$0x1] %v374_v50  ;;  %1091 = vmatprep.mubr.f32.mxu0 %v554_v59  ;;  %v842_v63 = vld [vmem:[%s2461_s3 + $0x420] sm:$0xff]  ;;  %v551_v9 = vsel %vm548_vm1, %v549_v53, %v550_v54  ;;  %v273_v19 = vmul.f32 %v2033_v28, %v246_v16  ;;  %v853_v25 = vld [vmem:[%s2461_s3 + $0x478] sm:$0xff] }
  0x43   : > { %1399 = vmatprep.subr.bf16.mxu1 %v1398_v4  ;;  %413 = vst [vmem:[#allocation2 + $0x48] sm:$0xfe] %v377_v57  ;;  %415 = vst [vmem:[#allocation2 + $0x58] sm:$0x1] %v377_v57  ;;  %v1472_v4 = vpack.c.bf16 %v840_v49, %v838_v48  ;;  %v1476_v21 = vpack.c.bf16 %v844_v3, %v842_v63  ;;  %v1478_v32 = vpack.c.bf16 %v849_v13, %v847_v10  ;;  %v850_v47 = vld [vmem:[%s2461_s3 + $0x460] sm:$0xff]  ;;  %v852_v48 = vld [vmem:[%s2461_s3 + $0x470] sm:$0xff] }
  0x44   : > { %1461 = vmatpush1.bf16.msra.mxu0 %v1460_v2  ;;  %v436_v2 = vld [vmem:[#allocation2] sm:$0xff]  ;;  %412 = vst [vmem:[#allocation2 + $0x40] sm:$0xfe] %v376_v60  ;;  %414 = vst [vmem:[#allocation2 + $0x50] sm:$0x1] %v376_v60  ;;  %v439_v35 = vld [vmem:[#allocation2 + $0x28] sm:$0xff]  ;;  %v299_v46 = vadd.f32 %v2043_v34, %v272_v29  ;;  %v1482_v60 = vpack.c.bf16 %v853_v25, %v851_v24  ;;  %v1484_v13 = vpack.c.bf16 %v852_v48, %v850_v47 }
  0x45   : > { %1463 = vmatprep.subr.bf16.mxu0 %v1462_v7  ;;  %v271_v7 = vmul.f32 %v2033_v28, %v244_v1  ;;  %v457_v36 = vld [vmem:[#allocation2 + $0x28] sm:$0xfe]  ;;  %416 = vst [vmem:[#allocation2 + $0x60] sm:$0xfe] %v378_v26  ;;  %418 = vst [vmem:[#allocation2 + $0x70] sm:$0x1] %v378_v26 }
  0x46   : > { %1401 = vmatpush1.bf16.msra.mxu1 %v1400_v17  ;;  %v379_v17 = vrot.slane %v296_v6, 7  ;;  %v459_v37 = vld [vmem:[#allocation2 + $0x38] sm:$0x1]  ;;  %v558_v42 = vrot.slane %v457_v36, 1  ;;  %v382_v0 = vrot.slane %v299_v46, 7  ;;  %v247_v3 = vld [vmem:[%s2008_s29 + $0x60] sm:$0xff] }
  0x47   : > { %1403 = vmatprep.subr.bf16.mxu1 %v1402_v23  ;;  %v848_v23 = vld [vmem:[%s2461_s3 + $0x450] sm:$0xff]  ;;  %v559_v43 = vrot.slane %v459_v37, 1  ;;  %v855_v6 = vld [vmem:[%s2461_s3 + $0x488] sm:$0xff]  ;;  %v250_v10 = vld [vmem:[%s2008_s29 + $0x78] sm:$0xff] }
  0x48   : > { %1465 = vmatpush1.bf16.msra.mxu0 %v1464_v18  ;;  %v298_v18 = vadd.f32 %v2040_v33, %v271_v7  ;;  %417 = vst [vmem:[#allocation2 + $0x68] sm:$0xfe] %v379_v17  ;;  %419 = vst [vmem:[#allocation2 + $0x78] sm:$0x1] %v379_v17  ;;  %v1480_v59 = vpack.c.bf16 %v848_v23, %v846_v22  ;;  %v857_v7 = vld [vmem:[%s2461_s3 + $0x498] sm:$0xff]  ;;  %v854_v14 = vld [vmem:[%s2461_s3 + $0x480] sm:$0xff] }
  0x49   : > { %1467 = vmatprep.subr.bf16.mxu0 %v1466_v31  ;;  %v248_v31 = vld [vmem:[%s2008_s29 + $0x68] sm:$0xff]  ;;  %v438_v41 = vld [vmem:[#allocation2 + $0x20] sm:$0xff]  ;;  %v458_v49 = vld [vmem:[#allocation2 + $0x30] sm:$0x1]  ;;  %v560_v53 = vsel %vm548_vm1, %v558_v42, %v559_v43  ;;  %424 = vst [vmem:[#allocation2 + $0xa0] sm:$0xfe] %v382_v0 }
  0x4a   : > { %1405 = vmatpush1.bf16.msra.mxu1 %v1404_v39  ;;  %v381_v38 = vrot.slane %v298_v18, 7  ;;  %v300_v39 = vadd.f32 %v2040_v33, %v273_v19  ;;  %v275_v40 = vmul.f32 %v2033_v28, %v248_v31  ;;  %v456_v44 = vld [vmem:[#allocation2 + $0x20] sm:$0xfe]  ;;  %v461_v51 = vld [vmem:[#allocation2 + $0x48] sm:$0xfe]  ;;  %v556_v54 = vrot.slane %v458_v49, 1 }
  0x4b   : > { %1534 = vmatprep.subr.bf16.mxu1 %v1470_v52  ;;  %v555_v50 = vrot.slane %v456_v44, 1  ;;  %v441_v55 = vld [vmem:[#allocation2 + $0x48] sm:$0xff]  ;;  %v463_v56 = vld [vmem:[#allocation2 + $0x58] sm:$0x1]  ;;  %v564_v57 = vrot.slane %v461_v51, 1  ;;  %v856_v15 = vld [vmem:[%s2461_s3 + $0x490] sm:$0xff]  ;;  %v277_v19 = vmul.f32 %v2033_v28, %v250_v10 }
  0x4c   : > { %1469 = vmatpush1.bf16.msra.mxu0 %v1468_v45  ;;  %v380_v45 = vrot.slane %v297_v27, 7  ;;  %421 = vst [vmem:[#allocation2 + $0x88] sm:$0xfe] %v381_v38  ;;  %423 = vst [vmem:[#allocation2 + $0x98] sm:$0x1] %v381_v38  ;;  %v383_v58 = vrot.slane %v300_v39, 7  ;;  %v1486_v27 = vpack.c.bf16 %v857_v7, %v855_v6  ;;  %v1488_v48 = vpack.c.bf16 %v856_v15, %v854_v14 }
  0x4d   : > { %1471 = vmatprep.subr.bf16.mxu0 %v1470_v52  ;;  %979 = vmatmul.mubr.f32.vlgmr.msra.gmra.mrb[0].mxu1 %v436_v2  ;;  %v302_v52 = vadd.f32 %v2040_v33, %v275_v40  ;;  %v565_v61 = vrot.slane %v463_v56, 1  ;;  %v460_v62 = vld [vmem:[#allocation2 + $0x40] sm:$0xfe]  ;;  %v462_v63 = vld [vmem:[#allocation2 + $0x50] sm:$0x1]  ;;  %v557_v1 = vsel %vm548_vm1, %v555_v50, %v556_v54  ;;  %v859_v20 = vld [vmem:[%s2461_s3 + $0x4a8] sm:$0xff] }
  0x4e   : > { %1550 = vmatpush1.bf16.msra.mxu1 %v1472_v4  ;;  %984 = vmatprep.mubr.f32.mxu1 %v439_v35  ;;  %420 = vst [vmem:[#allocation2 + $0x80] sm:$0xfe] %v380_v45  ;;  %422 = vst [vmem:[#allocation2 + $0x90] sm:$0x1] %v380_v45  ;;  %v561_v2 = vrot.slane %v460_v62, 1  ;;  %v440_v16 = vld [vmem:[#allocation2 + $0x40] sm:$0xff]  ;;  %v304_v35 = vadd.f32 %v2040_v33, %v277_v19 }
  0x4f   : > { %1092 = vmatmul.mubr.f32.vlgmr.msra.gmra.mrb[0].mxu0 %v551_v9  ;;  %1535 = vmatprep.subr.bf16.mxu1 %v1474_v5  ;;  %425 = vst [vmem:[#allocation2 + $0xa8] sm:$0xfe] %v383_v58  ;;  %427 = vst [vmem:[#allocation2 + $0xb8] sm:$0x1] %v383_v58  ;;  %v566_v8 = vsel %vm548_vm1, %v564_v57, %v565_v61  ;;  %v274_v9 = vmul.f32 %v2037_v30, %v247_v3  ;;  %v465_v17 = vld [vmem:[#allocation2 + $0x68] sm:$0xfe] }
  0x50   : > { %1473 = vmatpush1.bf16.msra.mxu0 %v1472_v4  ;;  %1097 = vmatprep.mubr.f32.mxu0 %v560_v53  ;;  %v562_v4 = vrot.slane %v462_v63, 1  ;;  %426 = vst [vmem:[#allocation2 + $0xb0] sm:$0x1] %v382_v0  ;;  %v467_v18 = vld [vmem:[#allocation2 + $0x78] sm:$0x1]  ;;  %v443_v22 = vld [vmem:[#allocation2 + $0x68] sm:$0xff] }
  0x51   : > { %1475 = vmatprep.subr.bf16.mxu0 %v1474_v5  ;;  %985 = vmatmul.mubr.f32.gmra.mrb[2].mxu1 %v438_v41  ;;  %v385_v5 = vrot.slane %v302_v52, 7  ;;  %v570_v23 = vrot.slane %v465_v17, 1  ;;  %v571_v24 = vrot.slane %v467_v18, 1  ;;  %v464_v25 = vld [vmem:[#allocation2 + $0x60] sm:$0xfe]  ;;  %v301_v26 = vadd.f32 %v2043_v34, %v274_v9  ;;  %v861_v28 = vld [vmem:[%s2461_s3 + $0x4b8] sm:$0xff] }
  0x52   : > { %1551 = vmatpush1.bf16.msra.mxu1 %v1476_v21  ;;  %990 = vmatprep.mubr.f32.mxu1 %v441_v55  ;;  %v466_v29 = vld [vmem:[#allocation2 + $0x70] sm:$0x1]  ;;  %v567_v31 = vrot.slane %v464_v25, 1  ;;  %v858_v36 = vld [vmem:[%s2461_s3 + $0x4a0] sm:$0xff]  ;;  %v863_v33 = vld [vmem:[%s2461_s3 + $0x4c8] sm:$0xff]  ;;  %v387_v47 = vrot.slane %v304_v35, 7  ;;  %v1490_v55 = vpack.c.bf16 %v861_v28, %v859_v20 }
  0x53   : > { %1536 = vmatprep.subr.bf16.mxu1 %v1478_v32  ;;  %1098 = vmatmul.mubr.f32.gmra.mrb[2].mxu0 %v557_v1  ;;  %429 = vst [vmem:[#allocation2 + $0xc8] sm:$0xfe] %v385_v5  ;;  %431 = vst [vmem:[#allocation2 + $0xd8] sm:$0x1] %v385_v5  ;;  %v860_v37 = vld [vmem:[%s2461_s3 + $0x4b0] sm:$0xff]  ;;  %v442_v38 = vld [vmem:[#allocation2 + $0x60] sm:$0xff]  ;;  %v572_v39 = vsel %vm548_vm1, %v570_v23, %v571_v24 }
  0x54   : > { %1477 = vmatpush1.bf16.msra.mxu0 %v1476_v21  ;;  %1103 = vmatprep.mubr.f32.mxu0 %v566_v8  ;;  %v563_v21 = vsel %vm548_vm1, %v561_v2, %v562_v4  ;;  %v568_v40 = vrot.slane %v466_v29, 1  ;;  %v471_v41 = vld [vmem:[#allocation2 + $0x98] sm:$0x1]  ;;  %v384_v43 = vrot.slane %v301_v26, 7  ;;  %v445_v50 = vld [vmem:[#allocation2 + $0x88] sm:$0xff]  ;;  %v249_v54 = vld [vmem:[%s2008_s29 + $0x70] sm:$0xff]  ;;  %v1492_v0 = vpack.c.bf16 %v860_v37, %v858_v36 }
  0x55   : > { %1479 = vmatprep.subr.bf16.mxu0 %v1478_v32  ;;  %v469_v32 = vld [vmem:[#allocation2 + $0x88] sm:$0xfe]  ;;  %991 = vmatmul.mubr.f32.gmra.mrb[4].mxu1 %v440_v16  ;;  %v577_v44 = vrot.slane %v471_v41, 1  ;;  %v468_v45 = vld [vmem:[#allocation2 + $0x80] sm:$0xfe]  ;;  %v865_v56 = vld [vmem:[%s2461_s3 + $0x4d8] sm:$0xff]  ;;  %v276_v61 = vmul.f32 %v2037_v30, %v249_v54 }
  0x56   : > { %1552 = vmatpush1.bf16.msra.mxu1 %v1480_v59  ;;  %v576_v42 = vrot.slane %v469_v32, 1  ;;  %996 = vmatprep.mubr.f32.mxu1 %v443_v22  ;;  %v470_v46 = vld [vmem:[#allocation2 + $0x90] sm:$0x1]  ;;  %v569_v49 = vsel %vm548_vm1, %v567_v31, %v568_v40  ;;  %v573_v51 = vrot.slane %v468_v45, 1  ;;  %v473_v53 = vld [vmem:[#allocation2 + $0xa8] sm:$0xfe]  ;;  %v1494_v3 = vpack.c.bf16 %v865_v56, %v863_v33 }
  0x57   : > { %1537 = vmatprep.subr.bf16.mxu1 %v1482_v60  ;;  %1104 = vmatmul.mubr.f32.gmra.mrb[4].mxu0 %v563_v21  ;;  %v574_v52 = vrot.slane %v470_v46, 1  ;;  %428 = vst [vmem:[#allocation2 + $0xc0] sm:$0xfe] %v384_v43  ;;  %430 = vst [vmem:[#allocation2 + $0xd0] sm:$0x1] %v384_v43  ;;  %v444_v1 = vld [vmem:[#allocation2 + $0x80] sm:$0xff]  ;;  %v303_v5 = vadd.f32 %v2043_v34, %v276_v61 }
  0x58   : > { %1481 = vmatpush1.bf16.msra.mxu0 %v1480_v59  ;;  %1109 = vmatprep.mubr.f32.mxu0 %v572_v39  ;;  %v578_v57 = vsel %vm548_vm1, %v576_v42, %v577_v44  ;;  %v475_v58 = vld [vmem:[#allocation2 + $0xb8] sm:$0x1]  ;;  %v582_v59 = vrot.slane %v473_v53, 1  ;;  %433 = vst [vmem:[#allocation2 + $0xe8] sm:$0xfe] %v387_v47  ;;  %v447_v7 = vld [vmem:[#allocation2 + $0xa8] sm:$0xff] }
  0x59   : > { %1483 = vmatprep.subr.bf16.mxu0 %v1482_v60  ;;  %v472_v60 = vld [vmem:[#allocation2 + $0xa0] sm:$0xfe]  ;;  %435 = vst [vmem:[#allocation2 + $0xf8] sm:$0x1] %v387_v47  ;;  %997 = vmatmul.mubr.f32.gmra.mrb[6].mxu1 %v442_v38  ;;  %v583_v62 = vrot.slane %v475_v58, 1  ;;  %v575_v6 = vsel %vm548_vm1, %v573_v51, %v574_v52  ;;  %v864_v10 = vld [vmem:[%s2461_s3 + $0x4d0] sm:$0xff] }
  0x5a   : > { %1553 = vmatpush1.bf16.msra.mxu1 %v1484_v13  ;;  %v474_v63 = vld [vmem:[#allocation2 + $0xb0] sm:$0x1]  ;;  %1002 = vmatprep.mubr.f32.mxu1 %v445_v50  ;;  %v477_v2 = vld [vmem:[#allocation2 + $0xc8] sm:$0xfe]  ;;  %v479_v4 = vld [vmem:[#allocation2 + $0xd8] sm:$0x1] }
  0x5b   : > { %1538 = vmatprep.subr.bf16.mxu1 %v1486_v27  ;;  %1110 = vmatmul.mubr.f32.gmra.mrb[6].mxu0 %v569_v49  ;;  %v579_v8 = vrot.slane %v472_v60, 1  ;;  %v580_v30 = vrot.slane %v474_v63, 1  ;;  %v862_v9 = vld [vmem:[%s2461_s3 + $0x4c0] sm:$0xff]  ;;  %v584_v34 = vsel %vm548_vm1, %v582_v59, %v583_v62  ;;  %v589_v14 = vrot.slane %v479_v4, 1  ;;  %v867_v16 = vld [vmem:[%s2461_s3 + $0x4e8] sm:$0xff]  ;;  %v869_v17 = vld [vmem:[%s2461_s3 + $0x4f8] sm:$0xff] }
  0x5c   : > { %1485 = vmatpush1.bf16.msra.mxu0 %v1484_v13  ;;  %1115 = vmatprep.mubr.f32.mxu0 %v578_v57  ;;  %v588_v13 = vrot.slane %v477_v2, 1  ;;  %v386_v15 = vrot.slane %v303_v5, 7  ;;  %v446_v18 = vld [vmem:[#allocation2 + $0xa0] sm:$0xff]  ;;  %v868_v20 = vld [vmem:[%s2461_s3 + $0x4f0] sm:$0xff]  ;;  %v449_v21 = vld [vmem:[#allocation2 + $0xc8] sm:$0xff]  ;;  %v1496_v24 = vpack.c.bf16 %v864_v10, %v862_v9  ;;  %v1498_v31 = vpack.c.bf16 %v869_v17, %v867_v16 }
  0x5d   : > { %1487 = vmatprep.subr.bf16.mxu0 %v1486_v27  ;;  %1003 = vmatmul.mubr.f32.gmra.mrb[8].mxu1 %v444_v1  ;;  %v866_v19 = vld [vmem:[%s2461_s3 + $0x4e0] sm:$0xff]  ;;  %v581_v25 = vsel %vm548_vm1, %v579_v8, %v580_v30  ;;  %v501_v29 = vld [vmem:[#allocation2 + $0x88] sm:$0xfc]  ;;  %v503_v38 = vld [vmem:[#allocation2 + $0x98] sm:$0x3] }
  0x5e   : > { %1554 = vmatpush1.bf16.msra.mxu1 %v1488_v48  ;;  %1008 = vmatprep.mubr.f32.mxu1 %v447_v7  ;;  %v476_v22 = vld [vmem:[#allocation2 + $0xc0] sm:$0xfe]  ;;  %v478_v23 = vld [vmem:[#allocation2 + $0xd0] sm:$0x1]  ;;  %432 = vst [vmem:[#allocation2 + $0xe0] sm:$0xfe] %v386_v15  ;;  %v590_v35 = vsel %vm548_vm1, %v588_v13, %v589_v14  ;;  %v1500_v33 = vpack.c.bf16 %v868_v20, %v866_v19 }
  0x5f   : > { %1539 = vmatprep.subr.bf16.mxu1 %v1490_v55  ;;  %1116 = vmatmul.mubr.f32.gmra.mrb[8].mxu0 %v575_v6  ;;  %434 = vst [vmem:[#allocation2 + $0xf0] sm:$0x1] %v386_v15  ;;  %v585_v26 = vrot.slane %v476_v22, 1  ;;  %v586_v27 = vrot.slane %v478_v23, 1  ;;  %v481_v28 = vld [vmem:[#allocation2 + $0xe8] sm:$0xfe] }
  0x60   : > { %1489 = vmatpush1.bf16.msra.mxu0 %v1488_v48  ;;  %1121 = vmatprep.mubr.f32.mxu0 %v584_v34  ;;  %v871_v32 = vld [vmem:[%s2461_s3 + $0x508] sm:$0xff]  ;;  %v483_v36 = vld [vmem:[#allocation2 + $0xf8] sm:$0x1]  ;;  %v594_v37 = vrot.slane %v481_v28, 1  ;;  %v448_v43 = vld [vmem:[#allocation2 + $0xc0] sm:$0xff]  ;;  %v673_v46 = vrot.slane %v501_v29, 2 }
  0x61   : > { %1491 = vmatprep.subr.bf16.mxu0 %v1490_v55  ;;  %v873_v39 = vld [vmem:[%s2461_s3 + $0x518] sm:$0xff]  ;;  %1009 = vmatmul.mubr.f32.gmra.mrb[10].mxu1 %v446_v18  ;;  %v595_v40 = vrot.slane %v483_v36, 1  ;;  %v485_v41 = vld [vmem:[#allocation2 + $0x8] sm:$0xfc]  ;;  %v587_v44 = vsel %vm548_vm1, %v585_v26, %v586_v27  ;;  %v674_v47 = vrot.slane %v503_v38, 2  ;;  %v870_v49 = vld [vmem:[%s2461_s3 + $0x500] sm:$0xff] }
  0x62   : > { %1555 = vmatpush1.bf16.msra.mxu1 %v1492_v0  ;;  %v487_v42 = vld [vmem:[#allocation2 + $0x18] sm:$0x3]  ;;  %1014 = vmatprep.mubr.f32.mxu1 %v449_v21  ;;  %v451_v45 = vld [vmem:[#allocation2 + $0xe8] sm:$0xff]  ;;  %v1502_v48 = vpack.c.bf16 %v873_v39, %v871_v32  ;;  %v872_v50 = vld [vmem:[%s2461_s3 + $0x510] sm:$0xff]  ;;  %v649_v53 = vrot.slane %v485_v41, 2 }
  0x63   : > { %1540 = vmatprep.subr.bf16.mxu1 %v1494_v3  ;;  %1122 = vmatmul.mubr.f32.gmra.mrb[10].mxu0 %v581_v25  ;;  %v875_v51 = vld [vmem:[%s2461_s3 + $0x528] sm:$0xff]  ;;  %v596_v52 = vsel %vm548_vm1, %v594_v37, %v595_v40  ;;  %v650_v54 = vrot.slane %v487_v42, 2  ;;  %v877_v55 = vld [vmem:[%s2461_s3 + $0x538] sm:$0xff]  ;;  %v1504_v61 = vpack.c.bf16 %v872_v50, %v870_v49  ;;  %v675_v62 = vsel %vm645_vm2, %v673_v46, %v674_v47  ;;  %v876_v1 = vld [vmem:[%s2461_s3 + $0x530] sm:$0xff] }
  0x64   : > { %1493 = vmatpush1.bf16.msra.mxu0 %v1492_v0  ;;  %1127 = vmatprep.mubr.f32.mxu0 %v590_v35  ;;  %v1506_v63 = vpack.c.bf16 %v877_v55, %v875_v51  ;;  %v874_v0 = vld [vmem:[%s2461_s3 + $0x520] sm:$0xff]  ;;  %v879_v5 = vld [vmem:[%s2461_s3 + $0x548] sm:$0xff]  ;;  %v880_v30 = vld [vmem:[%s2461_s3 + $0x550] sm:$0xff] }
  0x65   : > { %1495 = vmatprep.subr.bf16.mxu0 %v1494_v3  ;;  %1015 = vmatmul.mubr.f32.gmra.mrb[12].mxu1 %v448_v43  ;;  %v480_v56 = vld [vmem:[#allocation2 + $0xe0] sm:$0xfe]  ;;  %v651_v4 = vsel %vm645_vm2, %v649_v53, %v650_v54  ;;  %v881_v3 = vld [vmem:[%s2461_s3 + $0x558] sm:$0xff]  ;;  %v1508_v6 = vpack.c.bf16 %v876_v1, %v874_v0  ;;  %v883_v9 = vld [vmem:[%s2461_s3 + $0x568] sm:$0xff] }
  0x66   : > { %1556 = vmatpush1.bf16.msra.mxu1 %v1496_v24  ;;  %v482_v57 = vld [vmem:[#allocation2 + $0xf0] sm:$0x1]  ;;  %1020 = vmatprep.mubr.f32.mxu1 %v451_v45  ;;  %v450_v58 = vld [vmem:[#allocation2 + $0xe0] sm:$0xff]  ;;  %v591_v59 = vrot.slane %v480_v56, 1  ;;  %v1510_v7 = vpack.c.bf16 %v881_v3, %v879_v5  ;;  %v885_v10 = vld [vmem:[%s2461_s3 + $0x578] sm:$0xff] }
  0x67   : > { %1541 = vmatprep.subr.bf16.mxu1 %v1498_v31  ;;  %1128 = vmatmul.mubr.f32.gmra.mrb[12].mxu0 %v587_v44  ;;  %v592_v60 = vrot.slane %v482_v57, 1  ;;  %v878_v8 = vld [vmem:[%s2461_s3 + $0x540] sm:$0xff]  ;;  %v1514_v13 = vpack.c.bf16 %v885_v10, %v883_v9  ;;  %v884_v15 = vld [vmem:[%s2461_s3 + $0x570] sm:$0xff]  ;;  %v887_v16 = vld [vmem:[%s2461_s3 + $0x588] sm:$0xff] }
  0x68   : > { %1497 = vmatpush1.bf16.msra.mxu0 %v1496_v24  ;;  %1133 = vmatprep.mubr.f32.mxu0 %v596_v52  ;;  %v1512_v34 = vpack.c.bf16 %v880_v30, %v878_v8  ;;  %v882_v14 = vld [vmem:[%s2461_s3 + $0x560] sm:$0xff]  ;;  %v889_v17 = vld [vmem:[%s2461_s3 + $0x598] sm:$0xff]  ;;  %v888_v21 = vld [vmem:[%s2461_s3 + $0x590] sm:$0xff] }
  0x69   : > { %1499 = vmatprep.subr.bf16.mxu0 %v1498_v31  ;;  %v593_v2 = vsel %vm548_vm1, %v591_v59, %v592_v60  ;;  %1021 = vmatmul.mubr.f32.gmra.mrb[14].mxu1 %v450_v58  ;;  %v1516_v18 = vpack.c.bf16 %v884_v15, %v882_v14  ;;  %v1518_v19 = vpack.c.bf16 %v889_v17, %v887_v16  ;;  %v886_v20 = vld [vmem:[%s2461_s3 + $0x580] sm:$0xff]  ;;  %v891_v22 = vld [vmem:[%s2461_s3 + $0x5a8] sm:$0xff]  ;;  %v893_v23 = vld [vmem:[%s2461_s3 + $0x5b8] sm:$0xff] }
  0x6a   : > { %1557 = vmatpush1.bf16.msra.mxu1 %v1500_v33  ;;  %1228 = vmatprep.mubr.f32.mxu1 %v675_v62  ;;  %v1520_v24 = vpack.c.bf16 %v888_v21, %v886_v20  ;;  %v1522_v25 = vpack.c.bf16 %v893_v23, %v891_v22  ;;  %v890_v26 = vld [vmem:[%s2461_s3 + $0x5a0] sm:$0xff]  ;;  %v892_v27 = vld [vmem:[%s2461_s3 + $0x5b0] sm:$0xff]  ;;  %v895_v28 = vld [vmem:[%s2461_s3 + $0x5c8] sm:$0xff] }
  0x6b   : > { %1542 = vmatprep.subr.bf16.mxu1 %v1502_v48  ;;  %1134 = vmatmul.mubr.f32.gmra.mrb[14].mxu0 %v593_v2  ;;  %v897_v29 = vld [vmem:[%s2461_s3 + $0x5d8] sm:$0xff]  ;;  %v1524_v31 = vpack.c.bf16 %v892_v27, %v890_v26  ;;  %v894_v35 = vld [vmem:[%s2461_s3 + $0x5c0] sm:$0xff]  ;;  %v896_v36 = vld [vmem:[%s2461_s3 + $0x5d0] sm:$0xff] }
  0x6c   : > { %1501 = vmatpush1.bf16.msra.mxu0 %v1500_v33  ;;  %1204 = vmatprep.mubr.f32.mxu0 %v651_v4  ;;  %v1526_v32 = vpack.c.bf16 %v897_v29, %v895_v28  ;;  %v899_v37 = vld [vmem:[%s2461_s3 + $0x5e8] sm:$0xff]  ;;  %v901_v38 = vld [vmem:[%s2461_s3 + $0x5f8] sm:$0xff]  ;;  %v484_v39 = vld [vmem:[#allocation2] sm:$0xfc]  ;;  %v1528_v41 = vpack.c.bf16 %v896_v36, %v894_v35 }
  0x6d   : > { %1503 = vmatprep.subr.bf16.mxu0 %v1502_v48  ;;  %v486_v40 = vld [vmem:[#allocation2 + $0x10] sm:$0x3]  ;;  %v898_v42 = vld [vmem:[%s2461_s3 + $0x5e0] sm:$0xff]  ;;  %v1530_v44 = vpack.c.bf16 %v901_v38, %v899_v37  ;;  %v505_v46 = vld [vmem:[#allocation2 + $0xa8] sm:$0xfc]  ;;  %v646_v48 = vrot.slane %v484_v39, 2 }
  0x6e   : > { %1558 = vmatpush1.bf16.msra.mxu1 %v1504_v61  ;;  %v500_v43 = vld [vmem:[#allocation2 + $0x80] sm:$0xfc]  ;;  %v502_v33 = vld [vmem:[#allocation2 + $0x90] sm:$0x3]  ;;  %v507_v47 = vld [vmem:[#allocation2 + $0xb8] sm:$0x3] }
  0x6f   : > { %1543 = vmatprep.subr.bf16.mxu1 %v1506_v63  ;;  %v900_v45 = vld [vmem:[%s2461_s3 + $0x5f0] sm:$0xff]  ;;  %v647_v49 = vrot.slane %v486_v40, 2  ;;  %v489_v50 = vld [vmem:[#allocation2 + $0x28] sm:$0xfc]  ;;  %v670_v51 = vrot.slane %v500_v43, 2  ;;  %v671_v52 = vrot.slane %v502_v33, 2 }
  0x70   : > { %1505 = vmatpush1.bf16.msra.mxu0 %v1504_v61  ;;  %v491_v53 = vld [vmem:[#allocation2 + $0x38] sm:$0x3]  ;;  %v488_v54 = vld [vmem:[#allocation2 + $0x20] sm:$0xfc]  ;;  %v1532_v55 = vpack.c.bf16 %v900_v45, %v898_v42  ;;  %v679_v56 = vrot.slane %v505_v46, 2  ;;  %v680_v57 = vrot.slane %v507_v47, 2 }
  0x71   : > { %1507 = vmatprep.subr.bf16.mxu0 %v1506_v63  ;;  %v504_v58 = vld [vmem:[#allocation2 + $0xa0] sm:$0xfc]  ;;  %v506_v59 = vld [vmem:[#allocation2 + $0xb0] sm:$0x3]  ;;  %v509_v61 = vld [vmem:[#allocation2 + $0xc8] sm:$0xfc]  ;;  %v672_v1 = vsel %vm645_vm2, %v670_v51, %v671_v52  ;;  %v648_v10 = vsel %vm645_vm2, %v646_v48, %v647_v49 }
  0x72   : > { %1559 = vmatpush1.bf16.msra.mxu1 %v1508_v6  ;;  %v490_v60 = vld [vmem:[#allocation2 + $0x30] sm:$0x3]  ;;  %v511_v62 = vld [vmem:[#allocation2 + $0xd8] sm:$0x3]  ;;  %v655_v63 = vrot.slane %v489_v50, 2  ;;  %v656_v0 = vrot.slane %v491_v53, 2 }
  0x73   : > { %1544 = vmatprep.subr.bf16.mxu1 %v1510_v7  ;;  %v676_v2 = vrot.slane %v504_v58, 2  ;;  %v677_v4 = vrot.slane %v506_v59, 2  ;;  %v493_v5 = vld [vmem:[#allocation2 + $0x48] sm:$0xfc]  ;;  %v495_v3 = vld [vmem:[#allocation2 + $0x58] sm:$0x3] }
  0x74   : > { %1509 = vmatpush1.bf16.msra.mxu0 %v1508_v6  ;;  %v652_v6 = vrot.slane %v488_v54, 2  ;;  %v685_v8 = vrot.slane %v509_v61, 2  ;;  %v686_v30 = vrot.slane %v511_v62, 2  ;;  %v492_v9 = vld [vmem:[#allocation2 + $0x40] sm:$0xfc]  ;;  %v657_v16 = vsel %vm645_vm2, %v655_v63, %v656_v0 }
  0x75   : > { %1511 = vmatprep.subr.bf16.mxu0 %v1510_v7  ;;  %v653_v7 = vrot.slane %v490_v60, 2  ;;  %v508_v14 = vld [vmem:[#allocation2 + $0xc0] sm:$0xfc]  ;;  %v510_v15 = vld [vmem:[#allocation2 + $0xd0] sm:$0x3]  ;;  %v661_v17 = vrot.slane %v493_v5, 2  ;;  %v678_v21 = vsel %vm645_vm2, %v676_v2, %v677_v4 }
  0x76   : > { %1560 = vmatpush1.bf16.msra.mxu1 %v1512_v34  ;;  %v515_v20 = vld [vmem:[#allocation2 + $0xf8] sm:$0x3]  ;;  %v497_v22 = vld [vmem:[#allocation2 + $0x68] sm:$0xfc]  ;;  %v682_v26 = vrot.slane %v508_v14, 2  ;;  %v683_v27 = vrot.slane %v510_v15, 2  ;;  %v687_v29 = vsel %vm645_vm2, %v685_v8, %v686_v30 }
  0x77   : > { %1545 = vmatprep.subr.bf16.mxu1 %v1514_v13  ;;  %v499_v23 = vld [vmem:[#allocation2 + $0x78] sm:$0x3]  ;;  %v654_v28 = vsel %vm645_vm2, %v652_v6, %v653_v7  ;;  %v512_v35 = vld [vmem:[#allocation2 + $0xe0] sm:$0xfc]  ;;  %v514_v36 = vld [vmem:[#allocation2 + $0xf0] sm:$0x3] }
  0x78   : > { %1513 = vmatpush1.bf16.msra.mxu0 %v1512_v34  ;;  %v681_v34 = vsel %vm645_vm2, %v679_v56, %v680_v57  ;;  %v667_v38 = vrot.slane %v497_v22, 2  ;;  %v668_v39 = vrot.slane %v499_v23, 2  ;;  %v496_v40 = vld [vmem:[#allocation2 + $0x60] sm:$0xfc]  ;;  %v684_v42 = vsel %vm645_vm2, %v682_v26, %v683_v27  ;;  %v902_v51 = vld [vmem:[%s2462_s4] sm:$0x3] }
  0x79   : > { %1515 = vmatprep.subr.bf16.mxu0 %v1514_v13  ;;  %v494_v13 = vld [vmem:[#allocation2 + $0x50] sm:$0x3]  ;;  %v688_v43 = vrot.slane %v512_v35, 2  ;;  %v689_v33 = vrot.slane %v514_v36, 2  ;;  %v664_v46 = vrot.slane %v496_v40, 2  ;;  %v907_v52 = vrot.slane %v902_v51, %v1992_v12 }
  0x7a   : > { %1561 = vmatpush1.bf16.msra.mxu1 %v1516_v18  ;;  %v669_v48 = vsel %vm645_vm2, %v667_v38, %v668_v39 }
  0x7b   : > { %1546 = vmatprep.subr.bf16.mxu1 %v1518_v19  ;;  %v690_v49 = vsel %vm645_vm2, %v688_v43, %v689_v33 }
  0x7c   : > { %1517 = vmatpush1.bf16.msra.mxu0 %v1516_v18  ;;  %v662_v18 = vrot.slane %v495_v3, 2 }
  0x7d   : > { %1519 = vmatprep.subr.bf16.mxu0 %v1518_v19  ;;  %v513_v19 = vld [vmem:[#allocation2 + $0xe8] sm:$0xfc] }
  0x7e   : > { %1562 = vmatpush1.bf16.msra.mxu1 %v1520_v24  ;;  %v663_v37 = vsel %vm645_vm2, %v661_v17, %v662_v18 }
  0x7f   : > { %1547 = vmatprep.subr.bf16.mxu1 %v1522_v25 }
  0x80   : > { %1521 = vmatpush1.bf16.msra.mxu0 %v1520_v24  ;;  %v658_v24 = vrot.slane %v492_v9, 2 }
  0x81   : > { %1523 = vmatprep.subr.bf16.mxu0 %v1522_v25  ;;  %v659_v25 = vrot.slane %v494_v13, 2 }
  0x82   : > { %1563 = vmatpush1.bf16.msra.mxu1 %v1524_v31 }
  0x83   : > { %1548 = vmatprep.subr.bf16.mxu1 %v1526_v32 }
  0x84   : > { %1525 = vmatpush1.bf16.msra.mxu0 %v1524_v31  ;;  %v691_v31 = vrot.slane %v513_v19, 2 }
  0x85   : > { %1527 = vmatprep.subr.bf16.mxu0 %v1526_v32  ;;  %v692_v32 = vrot.slane %v515_v20, 2 }
  0x86   : > { %1564 = vmatpush1.bf16.msra.mxu1 %v1528_v41 }
  0x87   : > { %1549 = vmatprep.subr.bf16.mxu1 %v1530_v44  ;;  %v693_v45 = vsel %vm645_vm2, %v691_v31, %v692_v32 }
  0x88   : > { %1529 = vmatpush1.bf16.msra.mxu0 %v1528_v41  ;;  %v498_v41 = vld [vmem:[#allocation2 + $0x70] sm:$0x3] }
  0x89   : > { %1531 = vmatprep.subr.bf16.mxu0 %v1530_v44  ;;  %v660_v44 = vsel %vm645_vm2, %v658_v24, %v659_v25  ;;  %v665_v47 = vrot.slane %v498_v41, 2 }
  0x8a   : > { %1565 = vmatpush1.bf16.msra.mxu1 %v1532_v55 }
  0x8b   : > { %v666_v50 = vsel %vm645_vm2, %v664_v46, %v665_v47 }
  0x8c   : > { %1533 = vmatpush1.bf16.msra.mxu0 %v1532_v55 }
  0x8d   : > { %1229 = vmatmul.mubr.f32.vlgmr.msra.gmra.mrb[16].mxu1 %v672_v1  ;;  %v2418_v1 = vrot.slane %v902_v51, %v1990_v11 }
  0x8e   : > { %1234 = vmatprep.mubr.f32.mxu1 %v681_v34 }
  0x8f   : > { %1205 = vmatmul.mubr.f32.vlgmr.msra.gmra.mrb[0].mxu0 %v648_v10 }
  0x90   : > { %1210 = vmatprep.mubr.f32.mxu0 %v657_v16 }
  0x91   : > { %1235 = vmatmul.mubr.f32.gmra.mrb[18].mxu1 %v678_v21 }
  0x92   : > { %1240 = vmatprep.mubr.f32.mxu1 %v687_v29 }
  0x93   : > { %1211 = vmatmul.mubr.f32.gmra.mrb[2].mxu0 %v654_v28 }
  0x94   : > { %1216 = vmatprep.mubr.f32.mxu0 %v663_v37 }
  0x95   : > { %1241 = vmatmul.mubr.f32.gmra.mrb[20].mxu1 %v684_v42 }
  0x96   : > { %1246 = vmatprep.mubr.f32.mxu1 %v693_v45 }
  0x97   : > { %1217 = vmatmul.mubr.f32.gmra.mrb[4].mxu0 %v660_v44 }
  0x98   : > { %1222 = vmatprep.mubr.f32.mxu0 %v669_v48 }
  0x99   : > { %1247 = vmatmul.mubr.f32.gmra.mrb[22].mxu1 %v690_v49 }
  0x9b   : > { %1223 = vmatmul.mubr.f32.gmra.mrb[6].mxu0 %v666_v50 }
 0x120   : > { %v980_v53 = vpop.f32.mrb[0].mxu1 }
 0x121   : > { %v981_v54 = vadd.f32 %v980_v53, %v907_v52  ;;  %v982_v55 = vpop.f32.mrb[1].mxu1 }
 0x122   : > { %v983_v36 = vadd.f32 %v982_v55, %v2418_v1 }
 0x124   : > { %v986_v56 = vpop.f32.mrb[2].mxu1 }
 0x125   : > { %v987_v57 = vadd.f32 %v986_v56, %v907_v52  ;;  %v988_v58 = vpop.f32.mrb[3].mxu1 }
 0x126   : > { %v989_v44 = vadd.f32 %v988_v58, %v2418_v1 }
 0x128   : > { %v992_v59 = vpop.f32.mrb[4].mxu1 }
 0x129   : > { %v2409_v60 = vadd.f32 %v992_v59, %v907_v52  ;;  %v2411_v61 = vpop.f32.mrb[5].mxu1 }
 0x12a   : > { %v995_v53 = vadd.f32 %v2411_v61, %v2418_v1 }
 0x12c   : > { %v998_v62 = vpop.f32.mrb[6].mxu1 }
 0x12d   : > { %v2413_v63 = vadd.f32 %v998_v62, %v907_v52  ;;  %v2415_v0 = vpop.f32.mrb[7].mxu1 }
 0x12e   : > { %v1001_v61 = vadd.f32 %v2415_v0, %v2418_v1 }
 0x130   : > { %v1004_v12 = vpop.f32.mrb[8].mxu1 }
 0x131   : > { %v1005_v2 = vadd.f32 %v1004_v12, %v907_v52  ;;  %v1006_v4 = vpop.f32.mrb[9].mxu1 }
 0x132   : > { %v1117_v5 = vpop.f32.mrb[8].mxu0  ;;  %v1007_v3 = vadd.f32 %v1006_v4, %v2418_v1 }
 0x133   : > { %v1119_v6 = vpop.f32.mrb[9].mxu0  ;;  %v1118_v7 = vadd.f32 %v1117_v5, %v1005_v2 }
 0x134   : > { %v1120_v8 = vadd.f32 %v1119_v6, %v1007_v3  ;;  %v1010_v30 = vpop.f32.mrb[10].mxu1 }
 0x135   : > { %v1011_v9 = vadd.f32 %v1010_v30, %v907_v52  ;;  %v1012_v10 = vpop.f32.mrb[11].mxu1 }
 0x136   : > { %v1123_v34 = vpop.f32.mrb[10].mxu0  ;;  %v1013_v13 = vadd.f32 %v1012_v10, %v2418_v1 }
 0x137   : > { %v1125_v14 = vpop.f32.mrb[11].mxu0  ;;  %v1124_v15 = vadd.f32 %v1123_v34, %v1011_v9 }
 0x138   : > { %v1126_v16 = vadd.f32 %v1125_v14, %v1013_v13  ;;  %v1016_v11 = vpop.f32.mrb[12].mxu1 }
 0x139   : > { %v1017_v17 = vadd.f32 %v1016_v11, %v907_v52  ;;  %v1018_v18 = vpop.f32.mrb[13].mxu1 }
 0x13a   : > { %v1129_v19 = vpop.f32.mrb[12].mxu0  ;;  %v1019_v20 = vadd.f32 %v1018_v18, %v2418_v1 }
 0x13b   : > { %v1131_v21 = vpop.f32.mrb[13].mxu0  ;;  %v1130_v22 = vadd.f32 %v1129_v19, %v1017_v17 }
 0x13c   : > { %v1132_v23 = vadd.f32 %v1131_v21, %v1019_v20  ;;  %v1022_v24 = vpop.f32.mrb[14].mxu1 }
 0x13d   : > { %v1023_v25 = vadd.f32 %v1022_v24, %v907_v52  ;;  %v1024_v26 = vpop.f32.mrb[15].mxu1 }
 0x13e   : > { %v1135_v27 = vpop.f32.mrb[14].mxu0  ;;  %v1025_v28 = vadd.f32 %v1024_v26, %v2418_v1 }
 0x13f   : > { %v1137_v29 = vpop.f32.mrb[15].mxu0  ;;  %v1136_v31 = vadd.f32 %v1135_v27, %v1023_v25 }
 0x140   : > { %v1138_v32 = vadd.f32 %v1137_v29, %v1025_v28 }
 0x160   : > { %v1230_v35 = vpop.f32.mrb[16].mxu1 }
 0x161   : > { %v1231_v38 = vadd.f32 %v1230_v35, %v1118_v7  ;;  %v1232_v39 = vpop.f32.mrb[17].mxu1 }
 0x162   : > { %v1206_v37 = vpop.f32.mrb[0].mxu0  ;;  %v1233_v42 = vadd.f32 %v1232_v39, %v1120_v8 }
 0x163   : > { %v1567_v40 = vadd.f32 %v1206_v37, %v981_v54  ;;  %v1208_v41 = vpop.f32.mrb[1].mxu0  ;;  %1261 = vst [vmem:[%s2429_s16 + $0x40] sm:$0xff] %v1231_v38 }
 0x164   : > { %v1569_v43 = vadd.f32 %v1208_v41, %v983_v36  ;;  %1262 = vst [vmem:[%s2429_s16 + $0x48] sm:$0xff] %v1233_v42  ;;  %v1236_v33 = vpop.f32.mrb[18].mxu1 }
 0x165   : > { %1253 = vst [vmem:[%s2429_s16] sm:$0xff] %v1567_v40  ;;  %v1237_v46 = vadd.f32 %v1236_v33, %v1124_v15  ;;  %v1238_v47 = vpop.f32.mrb[19].mxu1 }
 0x166   : > { %1254 = vst [vmem:[%s2429_s16 + $0x8] sm:$0xff] %v1569_v43  ;;  %v1212_v45 = vpop.f32.mrb[2].mxu0  ;;  %v1239_v50 = vadd.f32 %v1238_v47, %v1126_v16 }
 0x167   : > { %v1571_v48 = vadd.f32 %v1212_v45, %v987_v57  ;;  %v1214_v49 = vpop.f32.mrb[3].mxu0  ;;  %1263 = vst [vmem:[%s2429_s16 + $0x50] sm:$0xff] %v1237_v46 }
 0x168   : > { %v1573_v51 = vadd.f32 %v1214_v49, %v989_v44  ;;  %1264 = vst [vmem:[%s2429_s16 + $0x58] sm:$0xff] %v1239_v50  ;;  %v1242_v52 = vpop.f32.mrb[20].mxu1 }
 0x169   : > { %1255 = vst [vmem:[%s2429_s16 + $0x10] sm:$0xff] %v1571_v48  ;;  %v1243_v55 = vadd.f32 %v1242_v52, %v1130_v22  ;;  %v1244_v56 = vpop.f32.mrb[21].mxu1 }
 0x16a   : > { %1256 = vst [vmem:[%s2429_s16 + $0x18] sm:$0xff] %v1573_v51  ;;  %v1218_v54 = vpop.f32.mrb[4].mxu0  ;;  %v1245_v59 = vadd.f32 %v1244_v56, %v1132_v23 }
 0x16b   : > { %v1575_v57 = vadd.f32 %v1218_v54, %v2409_v60  ;;  %v1220_v58 = vpop.f32.mrb[5].mxu0  ;;  %1265 = vst [vmem:[%s2429_s16 + $0x60] sm:$0xff] %v1243_v55 }
 0x16c   : > { %v1577_v62 = vadd.f32 %v1220_v58, %v995_v53  ;;  %1266 = vst [vmem:[%s2429_s16 + $0x68] sm:$0xff] %v1245_v59  ;;  %v1248_v12 = vpop.f32.mrb[22].mxu1 }
 0x16d   : > { %1257 = vst [vmem:[%s2429_s16 + $0x20] sm:$0xff] %v1575_v57  ;;  %v1249_v4 = vadd.f32 %v1248_v12, %v1136_v31  ;;  %v1250_v5 = vpop.f32.mrb[23].mxu1 }
 0x16e   : > { %1258 = vst [vmem:[%s2429_s16 + $0x28] sm:$0xff] %v1577_v62  ;;  %v1224_v2 = vpop.f32.mrb[6].mxu0  ;;  %v1251_v6 = vadd.f32 %v1250_v5, %v1138_v32 }
 0x16f   : > { %v1579_v60 = vadd.f32 %v1224_v2, %v2413_v63  ;;  %v1226_v3 = vpop.f32.mrb[7].mxu0  ;;  %1267 = vst [vmem:[%s2429_s16 + $0x70] sm:$0xff] %v1249_v4 }
 0x170   : > { %v1581_v7 = vadd.f32 %v1226_v3, %v1001_v61  ;;  %1268 = vst [vmem:[%s2429_s16 + $0x78] sm:$0xff] %v1251_v6 }
 0x171   : > { %1259 = vst [vmem:[%s2429_s16 + $0x30] sm:$0xff] %v1579_v60 }
 0x172   : > { %1260 = vst [vmem:[%s2429_s16 + $0x38] sm:$0xff] %v1581_v7 }
 0x173 PF: > { %s15_s18 = sadd.s32 1, %s1629_s18  }
 0x174   : > { %p12_p4 = scmp.ge.s32.totalorder %s15_s18, 4  }
 0x176   :  { %14 = sbr.rel (!%p12_p4) target bundleno = 1 (0x1), region = 85 }

// kernel: _lambda_.7
= control target key start
LH: loop header
LB: loop body
LE: loop exit
PB: predicated region body
PF: predicated region fallthrough
CT: control target
= control target key end

     0   :  { %s1978_s18 = smov 0   ;;  %s2847_s0 = inlined_call_operand.vmem [shape: f32[128,1,256], index: 0, kind: input, shape index: {}]   ;;  %s2848_s1 = inlined_call_operand.vmem [shape: f32[1,256], index: 1, kind: input, shape index: {}]   ;;  %s2849_s2 = inlined_call_operand.vmem [shape: f32[1,256], index: 2, kind: input, shape index: {}]   ;;  %s2850_s3 = inlined_call_operand.vmem [shape: f32[256,256], index: 3, kind: input, shape index: {}]   ;;  %s2851_s4 = inlined_call_operand.vmem [shape: f32[1,256], index: 4, kind: input, shape index: {}]   ;;  %s2852_s5 = inlined_call_operand.vmem [shape: f32[128,1,256], index: 5, kind: output, shape index: {}]  }
   0x1 LB: > { %s1823_s19 = sadd.s32 4294967295, %s1945_s18   ;;  %p1827_p0 = scmp.ge.s32.totalorder %s1945_s18, 1  ;;  %s1945_s18 = sphi %s1978_s18, %s15_s18  }
   0x2   : > { %p188_p1 = scmp.lt.s32.totalorder %s1945_s18, 3 }
   0x4   : > { %p189_p2 = pnand %p1827_p0, %p188_p1 }
   0x5   : > { %v423_v0 = vld [vmem:[%s2850_s3 + $0x8] sm:$0xff] (!%p189_p2)  ;;  %v425_v1 = vld [vmem:[%s2850_s3 + $0x18] sm:$0xff] (!%p189_p2)  ;;  %v422_v2 = vld [vmem:[%s2850_s3] sm:$0xff] (!%p189_p2)  ;;  %s1828_s21 = sshll.u32 (!%p189_p2), %s1823_s19, 6  ;;  %v488_v20 = vlaneseq (!%p189_p2)  ;;  %v1947_v21 = vmov (!%p189_p2), 1966171168  }
   0x6   : > { %192 = sbr.rel (%p189_p2) target bundleno = 334 (0x14e), region = 40  ;;  %v1834_v3 = vpack.c.bf16 (!%p189_p2), %v425_v1, %v423_v0  ;;  %v424_v4 = vld [vmem:[%s2850_s3 + $0x10] sm:$0xff] (!%p189_p2)  ;;  %v427_v5 = vld [vmem:[%s2850_s3 + $0x28] sm:$0xff] (!%p189_p2)  ;;  %v429_v6 = vld [vmem:[%s2850_s3 + $0x38] sm:$0xff] (!%p189_p2)  ;;  %p217_p3 = scmp.lt.s32.totalorder (!%p189_p2), %s1828_s21, 127  ;;  %v567_v22 = vunpack.c.l.s4 (!%p189_p2), %v1947_v21 }
   0x7   : > { %v1836_v7 = vpack.c.bf16 (!%p189_p2), %v424_v4, %v422_v2  ;;  %v1838_v8 = vpack.c.bf16 (!%p189_p2), %v429_v6, %v427_v5  ;;  %v426_v9 = vld [vmem:[%s2850_s3 + $0x20] sm:$0xff] (!%p189_p2)  ;;  %v428_v10 = vld [vmem:[%s2850_s3 + $0x30] sm:$0xff] (!%p189_p2)  ;;  %v431_v11 = vld [vmem:[%s2850_s3 + $0x48] sm:$0xff] (!%p189_p2)  ;;  %v2068_v37 = vshrl.u32 (!%p189_p2), %v488_v20, 7  ;;  %vm2581_vm0 = vcmp.lt.s32.totalorder (!%p189_p2), %v488_v20, 256 }
   0x8   : > { %1835 = vmatprep.subr.bf16.mxu0 (!%p189_p2), %v1834_v3  ;;  %1898 = vmatprep.subr.bf16.mxu1 (!%p189_p2), %v1834_v3  ;;  %v433_v12 = vld [vmem:[%s2850_s3 + $0x58] sm:$0xff] (!%p189_p2)  ;;  %v1840_v13 = vpack.c.bf16 (!%p189_p2), %v428_v10, %v426_v9  ;;  %v430_v15 = vld [vmem:[%s2850_s3 + $0x40] sm:$0xff] (!%p189_p2)  ;;  %v432_v16 = vld [vmem:[%s2850_s3 + $0x50] sm:$0xff] (!%p189_p2)  ;;  %v568_v38 = vunpack.c.0.s8 (!%p189_p2), %v567_v22 }
   0x9   : > { %1837 = vmatpush1.bf16.msra.mxu0 (!%p189_p2), %v1836_v7  ;;  %1914 = vmatpush1.bf16.msra.mxu1 (!%p189_p2), %v1836_v7  ;;  %v1842_v14 = vpack.c.bf16 (!%p189_p2), %v433_v12, %v431_v11  ;;  %v435_v17 = vld [vmem:[%s2850_s3 + $0x68] sm:$0xff] (!%p189_p2)  ;;  %v437_v18 = vld [vmem:[%s2850_s3 + $0x78] sm:$0xff] (!%p189_p2)  ;;  %v1844_v19 = vpack.c.bf16 (!%p189_p2), %v432_v16, %v430_v15  ;;  %v434_v24 = vld [vmem:[%s2850_s3 + $0x60] sm:$0xff] (!%p189_p2) }
   0xa   : > { %1839 = vmatprep.subr.bf16.mxu0 (!%p189_p2), %v1838_v8  ;;  %1899 = vmatprep.subr.bf16.mxu1 (!%p189_p2), %v1838_v8  ;;  %v1846_v23 = vpack.c.bf16 (!%p189_p2), %v437_v18, %v435_v17  ;;  %v436_v25 = vld [vmem:[%s2850_s3 + $0x70] sm:$0xff] (!%p189_p2)  ;;  %v439_v26 = vld [vmem:[%s2850_s3 + $0x88] sm:$0xff] (!%p189_p2)  ;;  %v441_v27 = vld [vmem:[%s2850_s3 + $0x98] sm:$0xff] (!%p189_p2)  ;;  %v2147_v2 = vsub.s32 (!%p189_p2), %v568_v38, %v2068_v37 }
   0xb   : > { %v438_v28 = vld [vmem:[%s2850_s3 + $0x80] sm:$0xff] (!%p189_p2)  ;;  %v440_v29 = vld [vmem:[%s2850_s3 + $0x90] sm:$0xff] (!%p189_p2)  ;;  %v1848_v30 = vpack.c.bf16 (!%p189_p2), %v436_v25, %v434_v24  ;;  %v443_v31 = vld [vmem:[%s2850_s3 + $0xa8] sm:$0xff] (!%p189_p2)  ;;  %v1850_v39 = vpack.c.bf16 (!%p189_p2), %v441_v27, %v439_v26 }
   0xc   : > { %v445_v32 = vld [vmem:[%s2850_s3 + $0xb8] sm:$0xff] (!%p189_p2)  ;;  %v442_v33 = vld [vmem:[%s2850_s3 + $0xa0] sm:$0xff] (!%p189_p2)  ;;  %v444_v34 = vld [vmem:[%s2850_s3 + $0xb0] sm:$0xff] (!%p189_p2)  ;;  %v1852_v62 = vpack.c.bf16 (!%p189_p2), %v440_v29, %v438_v28 }
   0xd   : > { %1841 = vmatpush1.bf16.msra.mxu0 %v1840_v13  ;;  %1915 = vmatpush1.bf16.msra.mxu1 %v1840_v13  ;;  %v447_v35 = vld [vmem:[%s2850_s3 + $0xc8] sm:$0xff]  ;;  %v449_v36 = vld [vmem:[%s2850_s3 + $0xd8] sm:$0xff]  ;;  %s2856_s21 = smov (!%p217_p3, %s1828_s21), 127  ;;  %v446_v40 = vld [vmem:[%s2850_s3 + $0xc0] sm:$0xff]  ;;  %v1854_v3 = vpack.c.bf16 %v445_v32, %v443_v31  ;;  %v1856_v4 = vpack.c.bf16 %v444_v34, %v442_v33 }
   0xe   : > { %1843 = vmatprep.subr.bf16.mxu0 %v1842_v14  ;;  %1900 = vmatprep.subr.bf16.mxu1 %v1842_v14  ;;  %v448_v41 = vld [vmem:[%s2850_s3 + $0xd0] sm:$0xff]  ;;  %v451_v42 = vld [vmem:[%s2850_s3 + $0xe8] sm:$0xff]  ;;  %v453_v43 = vld [vmem:[%s2850_s3 + $0xf8] sm:$0xff]  ;;  %s1829_s30 = sshll.u32 %s2856_s21, 1  ;;  %v1858_v5 = vpack.c.bf16 %v449_v36, %v447_v35 }
   0xf   : > { %v450_v44 = vld [vmem:[%s2850_s3 + $0xe0] sm:$0xff]  ;;  %v452_v45 = vld [vmem:[%s2850_s3 + $0xf0] sm:$0xff]  ;;  %v455_v46 = vld [vmem:[%s2850_s3 + $0x108] sm:$0xff]  ;;  %v2158_v9 = vpack.c.bf16 %v448_v41, %v446_v40  ;;  %v2160_v10 = vpack.c.bf16 %v453_v43, %v451_v42  ;;  %s2197_s28 = scalar_lea.vmem %s2847_s0, %s1829_s30  ;;  %s2594_s24 = scalar_lea.vmem %s2852_s5, %s1829_s30 }
  0x10   : > { %v457_v47 = vld [vmem:[%s2850_s3 + $0x118] sm:$0xff]  ;;  %v454_v48 = vld [vmem:[%s2850_s3 + $0x100] sm:$0xff]  ;;  %v456_v49 = vld [vmem:[%s2850_s3 + $0x110] sm:$0xff]  ;;  %v2162_v11 = vpack.c.bf16 %v452_v45, %v450_v44 }
  0x11   : > { %1845 = vmatpush1.bf16.msra.mxu0 %v1844_v19  ;;  %1916 = vmatpush1.bf16.msra.mxu1 %v1844_v19  ;;  %v459_v50 = vld [vmem:[%s2850_s3 + $0x128] sm:$0xff]  ;;  %v461_v51 = vld [vmem:[%s2850_s3 + $0x138] sm:$0xff]  ;;  %v458_v52 = vld [vmem:[%s2850_s3 + $0x120] sm:$0xff]  ;;  %v2164_v12 = vpack.c.bf16 %v457_v47, %v455_v46  ;;  %v2175_v16 = vpack.c.bf16 %v456_v49, %v454_v48 }
  0x12   : > { %1847 = vmatprep.subr.bf16.mxu0 %v1846_v23  ;;  %1901 = vmatprep.subr.bf16.mxu1 %v1846_v23  ;;  %v460_v53 = vld [vmem:[%s2850_s3 + $0x130] sm:$0xff]  ;;  %v463_v54 = vld [vmem:[%s2850_s3 + $0x148] sm:$0xff]  ;;  %v465_v55 = vld [vmem:[%s2850_s3 + $0x158] sm:$0xff]  ;;  %v2177_v17 = vpack.c.bf16 %v461_v51, %v459_v50 }
  0x13   : > { %v462_v56 = vld [vmem:[%s2850_s3 + $0x140] sm:$0xff]  ;;  %v464_v57 = vld [vmem:[%s2850_s3 + $0x150] sm:$0xff]  ;;  %v467_v58 = vld [vmem:[%s2850_s3 + $0x168] sm:$0xff]  ;;  %v2179_v18 = vpack.c.bf16 %v460_v53, %v458_v52  ;;  %v2181_v19 = vpack.c.bf16 %v465_v55, %v463_v54 }
  0x14   : > { %v469_v59 = vld [vmem:[%s2850_s3 + $0x178] sm:$0xff]  ;;  %v466_v60 = vld [vmem:[%s2850_s3 + $0x160] sm:$0xff]  ;;  %v468_v61 = vld [vmem:[%s2850_s3 + $0x170] sm:$0xff]  ;;  %v2199_v24 = vpack.c.bf16 %v464_v57, %v462_v56 }
  0x15   : > { %1849 = vmatpush1.bf16.msra.mxu0 %v1848_v30  ;;  %1917 = vmatpush1.bf16.msra.mxu1 %v1848_v30  ;;  %v471_v63 = vld [vmem:[%s2850_s3 + $0x188] sm:$0xff]  ;;  %v473_v0 = vld [vmem:[%s2850_s3 + $0x198] sm:$0xff]  ;;  %v470_v1 = vld [vmem:[%s2850_s3 + $0x180] sm:$0xff]  ;;  %v2201_v25 = vpack.c.bf16 %v469_v59, %v467_v58  ;;  %v2203_v26 = vpack.c.bf16 %v468_v61, %v466_v60 }
  0x16   : > { %1851 = vmatprep.subr.bf16.mxu0 %v1850_v39  ;;  %1902 = vmatprep.subr.bf16.mxu1 %v1850_v39  ;;  %v472_v6 = vld [vmem:[%s2850_s3 + $0x190] sm:$0xff]  ;;  %v475_v7 = vld [vmem:[%s2850_s3 + $0x1a8] sm:$0xff]  ;;  %v477_v8 = vld [vmem:[%s2850_s3 + $0x1b8] sm:$0xff]  ;;  %v2214_v30 = vpack.c.bf16 %v473_v0, %v471_v63 }
  0x17   : > { %v474_v13 = vld [vmem:[%s2850_s3 + $0x1a0] sm:$0xff]  ;;  %v476_v14 = vld [vmem:[%s2850_s3 + $0x1b0] sm:$0xff]  ;;  %v479_v15 = vld [vmem:[%s2850_s3 + $0x1c8] sm:$0xff]  ;;  %v2216_v31 = vpack.c.bf16 %v472_v6, %v470_v1  ;;  %v2218_v32 = vpack.c.bf16 %v477_v8, %v475_v7 }
  0x18   : > { %v481_v21 = vld [vmem:[%s2850_s3 + $0x1d8] sm:$0xff]  ;;  %v478_v22 = vld [vmem:[%s2850_s3 + $0x1c0] sm:$0xff]  ;;  %v480_v23 = vld [vmem:[%s2850_s3 + $0x1d0] sm:$0xff]  ;;  %v2233_v36 = vpack.c.bf16 %v476_v14, %v474_v13 }
  0x19   : > { %1853 = vmatpush1.bf16.msra.mxu0 %v1852_v62  ;;  %1918 = vmatpush1.bf16.msra.mxu1 %v1852_v62  ;;  %v483_v27 = vld [vmem:[%s2850_s3 + $0x1e8] sm:$0xff]  ;;  %v485_v28 = vld [vmem:[%s2850_s3 + $0x1f8] sm:$0xff]  ;;  %v482_v29 = vld [vmem:[%s2850_s3 + $0x1e0] sm:$0xff]  ;;  %v2235_v38 = vpack.c.bf16 %v481_v21, %v479_v15  ;;  %v2237_v39 = vpack.c.bf16 %v480_v23, %v478_v22 }
  0x1a   : > { %1855 = vmatprep.subr.bf16.mxu0 %v1854_v3  ;;  %1903 = vmatprep.subr.bf16.mxu1 %v1854_v3  ;;  %v484_v33 = vld [vmem:[%s2850_s3 + $0x1f0] sm:$0xff]  ;;  %v2226_v34 = vld [vmem:[%s2848_s1] sm:$0x3]  ;;  %v2239_v40 = vpack.c.bf16 %v485_v28, %v483_v27  ;;  %v231_v42 = vld [vmem:[%s2197_s28 + $0x2] sm:$0x3] }
  0x1b   : > { %v2231_v35 = vld [vmem:[%s2849_s2] sm:$0x3]  ;;  %v232_v43 = vld [vmem:[%s2197_s28 + $0x4] sm:$0x3]  ;;  %v2244_v44 = vpack.c.bf16 %v484_v33, %v482_v29  ;;  %v233_v45 = vld [vmem:[%s2197_s28 + $0x6] sm:$0x3]  ;;  %v295_v49 = vmul.f32 %v231_v42, %v2226_v34 }
  0x1c   : > { %v230_v41 = vld [vmem:[%s2197_s28] sm:$0x3]  ;;  %v234_v46 = vld [vmem:[%s2197_s28 + $0x8] sm:$0x3]  ;;  %v235_v47 = vld [vmem:[%s2197_s28 + $0xa] sm:$0x3]  ;;  %v296_v50 = vmul.f32 %v232_v43, %v2226_v34  ;;  %v297_v53 = vmul.f32 %v233_v45, %v2226_v34 }
  0x1d   : > { %v294_v48 = vmul.f32 %v230_v41, %v2226_v34  ;;  %1857 = vmatpush1.bf16.msra.mxu0 %v1856_v4  ;;  %1919 = vmatpush1.bf16.msra.mxu1 %v1856_v4  ;;  %v236_v51 = vld [vmem:[%s2197_s28 + $0xc] sm:$0x3]  ;;  %v237_v52 = vld [vmem:[%s2197_s28 + $0xe] sm:$0x3]  ;;  %v298_v54 = vmul.f32 %v234_v46, %v2226_v34  ;;  %v299_v55 = vmul.f32 %v235_v47, %v2226_v34  ;;  %v262_v56 = vld [vmem:[%s2197_s28 + $0x40] sm:$0x3] }
  0x1e   : > { %1859 = vmatprep.subr.bf16.mxu0 %v1858_v5  ;;  %1904 = vmatprep.subr.bf16.mxu1 %v1858_v5  ;;  %v300_v57 = vmul.f32 %v236_v51, %v2226_v34  ;;  %v301_v58 = vmul.f32 %v237_v52, %v2226_v34  ;;  %v263_v60 = vld [vmem:[%s2197_s28 + $0x42] sm:$0x3]  ;;  %v359_v61 = vadd.f32 %v295_v49, %v2231_v35  ;;  %v264_v1 = vld [vmem:[%s2197_s28 + $0x44] sm:$0x3]  ;;  %v265_v6 = vld [vmem:[%s2197_s28 + $0x46] sm:$0x3] }
  0x1f   : > { %v358_v59 = vadd.f32 %v294_v48, %v2231_v35  ;;  %v360_v62 = vadd.f32 %v296_v50, %v2231_v35  ;;  %v361_v63 = vadd.f32 %v297_v53, %v2231_v35  ;;  %v362_v0 = vadd.f32 %v298_v54, %v2231_v35  ;;  %v266_v7 = vld [vmem:[%s2197_s28 + $0x48] sm:$0x3]  ;;  %v267_v15 = vld [vmem:[%s2197_s28 + $0x4a] sm:$0x3]  ;;  %v268_v21 = vld [vmem:[%s2197_s28 + $0x4c] sm:$0x3] }
  0x20   : > { %v363_v3 = vadd.f32 %v299_v55, %v2231_v35  ;;  %v364_v4 = vadd.f32 %v300_v57, %v2231_v35  ;;  %v365_v5 = vadd.f32 %v301_v58, %v2231_v35  ;;  %v326_v8 = vmul.f32 %v262_v56, %v2226_v34  ;;  %v269_v28 = vld [vmem:[%s2197_s28 + $0x4e] sm:$0x3] }
  0x21   : > { %1861 = vmatpush1.bf16.msra.mxu0 %v2158_v9  ;;  %1920 = vmatpush1.bf16.msra.mxu1 %v2158_v9  ;;  %v562_v13 = vcombine.low %v358_v59, %v359_v61  ;;  %v563_v14 = vcombine.low %v360_v62, %v361_v63  ;;  %v327_v22 = vmul.f32 %v263_v60, %v2226_v34  ;;  %v238_v62 = vld [vmem:[%s2197_s28 + $0x10] sm:$0x3]  ;;  %v239_v63 = vld [vmem:[%s2197_s28 + $0x12] sm:$0x3] }
  0x22   : > { %1863 = vmatprep.subr.bf16.mxu0 %v2160_v10  ;;  %1905 = vmatprep.subr.bf16.mxu1 %v2160_v10  ;;  %v564_v23 = vcombine.low %v362_v0, %v363_v3  ;;  %v565_v27 = vcombine.low %v364_v4, %v365_v5  ;;  %v328_v29 = vmul.f32 %v264_v1, %v2226_v34  ;;  %v240_v0 = vld [vmem:[%s2197_s28 + $0x14] sm:$0x3] }
  0x23   : > { %v572_v33 = vrot.slane %v562_v13, %v2147_v2  ;;  %v579_v41 = vrot.slane %v563_v14, %v2147_v2  ;;  %v329_v9 = vmul.f32 %v265_v6, %v2226_v34  ;;  %v330_v42 = vmul.f32 %v266_v7, %v2226_v34 }
  0x24   : > { %v586_v43 = vrot.slane %v564_v23, %v2147_v2  ;;  %v593_v45 = vrot.slane %v565_v27, %v2147_v2  ;;  %v331_v46 = vmul.f32 %v267_v15, %v2226_v34  ;;  %v332_v10 = vmul.f32 %v268_v21, %v2226_v34 }
  0x25   : > { %1865 = vmatpush1.bf16.msra.mxu0 %v2162_v11  ;;  %1921 = vmatpush1.bf16.msra.mxu1 %v2162_v11  ;;  %v595_v47 = vcombine.high %v572_v33, %v579_v41  ;;  %v333_v48 = vmul.f32 %v269_v28, %v2226_v34  ;;  %v390_v49 = vadd.f32 %v326_v8, %v2231_v35  ;;  %v241_v8 = vld [vmem:[%s2197_s28 + $0x16] sm:$0x3]  ;;  %v243_v28 = vld [vmem:[%s2197_s28 + $0x1a] sm:$0x3] }
  0x26   : > { %1867 = vmatprep.subr.bf16.mxu0 %v2164_v12  ;;  %1906 = vmatprep.subr.bf16.mxu1 %v2164_v12  ;;  %v597_v50 = vcombine.high %v586_v43, %v593_v45  ;;  %v391_v51 = vadd.f32 %v327_v22, %v2231_v35  ;;  %v392_v52 = vadd.f32 %v328_v29, %v2231_v35  ;;  %v244_v29 = vld [vmem:[%s2197_s28 + $0x1c] sm:$0x3] }
  0x27   : > { %v611_v53 = vrot.slane %v595_v47, %v2147_v2  ;;  %v393_v11 = vadd.f32 %v329_v9, %v2231_v35  ;;  %v394_v54 = vadd.f32 %v330_v42, %v2231_v35  ;;  %v395_v55 = vadd.f32 %v331_v46, %v2231_v35  ;;  %v245_v9 = vld [vmem:[%s2197_s28 + $0x1e] sm:$0x3] }
  0x28   : > { %v625_v56 = vrot.slane %v597_v50, %v2147_v2  ;;  %v396_v12 = vadd.f32 %v332_v10, %v2231_v35  ;;  %v397_v57 = vadd.f32 %v333_v48, %v2231_v35  ;;  %v826_v58 = vcombine.low %v390_v49, %v391_v51 }
  0x29   : > { %1869 = vmatpush1.bf16.msra.mxu0 %v2175_v16  ;;  %1922 = vmatpush1.bf16.msra.mxu1 %v2175_v16  ;;  %v827_v59 = vcombine.low %v392_v52, %v393_v11  ;;  %v828_v60 = vcombine.low %v394_v54, %v395_v55  ;;  %v594_v61 = vcombine.low %v572_v33, %v579_v41  ;;  %v270_v52 = vld [vmem:[%s2197_s28 + $0x50] sm:$0x3]  ;;  %v272_v55 = vld [vmem:[%s2197_s28 + $0x54] sm:$0x3] }
  0x2a   : > { %1871 = vmatprep.subr.bf16.mxu0 %v2177_v17  ;;  %1907 = vmatprep.subr.bf16.mxu1 %v2177_v17  ;;  %v627_v1 = vcombine.low %v611_v53, %v625_v56  ;;  %v829_v3 = vcombine.low %v396_v12, %v397_v57  ;;  %v836_v4 = vrot.slane %v826_v58, %v2147_v2  ;;  %v242_v17 = vld [vmem:[%s2197_s28 + $0x18] sm:$0x3]  ;;  %v271_v53 = vld [vmem:[%s2197_s28 + $0x52] sm:$0x3] }
  0x2b   : > { %v843_v5 = vrot.slane %v827_v59, %v2147_v2  ;;  %v850_v16 = vrot.slane %v828_v60, %v2147_v2  ;;  %v596_v6 = vcombine.low %v586_v43, %v593_v45  ;;  %v2316_v7 = vrot.slane %v594_v61, %v2147_v2  ;;  %v273_v59 = vld [vmem:[%s2197_s28 + $0x56] sm:$0x3]  ;;  %v274_v61 = vld [vmem:[%s2197_s28 + $0x58] sm:$0x3] }
  0x2c   : > { %1170 = vmatprep.mubr.f32.mxu0 %v627_v1  ;;  %v857_v13 = vrot.slane %v829_v3, %v2147_v2  ;;  %v302_v14 = vmul.f32 %v238_v62, %v2226_v34  ;;  %v303_v15 = vmul.f32 %v239_v63, %v2226_v34  ;;  %v304_v21 = vmul.f32 %v240_v0, %v2226_v34  ;;  %v275_v62 = vld [vmem:[%s2197_s28 + $0x5a] sm:$0x3] }
  0x2d   : > { %1873 = vmatpush1.bf16.msra.mxu0 %v2179_v18  ;;  %1923 = vmatpush1.bf16.msra.mxu1 %v2179_v18  ;;  %v859_v22 = vcombine.high %v836_v4, %v843_v5  ;;  %v2327_v23 = vrot.slane %v596_v6, %v2147_v2  ;;  %v858_v27 = vcombine.low %v836_v4, %v843_v5  ;;  %v276_v4 = vld [vmem:[%s2197_s28 + $0x5c] sm:$0x3]  ;;  %v277_v5 = vld [vmem:[%s2197_s28 + $0x5e] sm:$0x3] }
  0x2e   : > { %1875 = vmatprep.subr.bf16.mxu0 %v2181_v19  ;;  %1908 = vmatprep.subr.bf16.mxu1 %v2181_v19  ;;  %v861_v33 = vcombine.high %v850_v16, %v857_v13  ;;  %v860_v41 = vcombine.low %v850_v16, %v857_v13  ;;  %v305_v42 = vmul.f32 %v241_v8, %v2226_v34 }
  0x2f   : > { %v875_v18 = vrot.slane %v859_v22, %v2147_v2  ;;  %v626_v43 = vcombine.low %v2316_v7, %v2327_v23  ;;  %v2339_v45 = vrot.slane %v858_v27, %v2147_v2  ;;  %v306_v46 = vmul.f32 %v242_v17, %v2226_v34 }
  0x30   : > { %v889_v10 = vrot.slane %v861_v33, %v2147_v2  ;;  %v2344_v19 = vrot.slane %v860_v41, %v2147_v2  ;;  %v307_v47 = vmul.f32 %v243_v28, %v2226_v34  ;;  %v308_v48 = vmul.f32 %v244_v29, %v2226_v34 }
  0x31   : > { %1877 = vmatpush1.bf16.msra.mxu0 %v2199_v24  ;;  %1924 = vmatpush1.bf16.msra.mxu1 %v2199_v24  ;;  %v309_v49 = vmul.f32 %v245_v9, %v2226_v34  ;;  %v366_v50 = vadd.f32 %v302_v14, %v2231_v35  ;;  %v367_v51 = vadd.f32 %v303_v15, %v2231_v35 }
  0x32   : > { %1879 = vmatprep.subr.bf16.mxu0 %v2201_v25  ;;  %1909 = vmatprep.subr.bf16.mxu1 %v2201_v25  ;;  %v891_v11 = vcombine.low %v875_v18, %v889_v10  ;;  %v890_v54 = vcombine.low %v2339_v45, %v2344_v19  ;;  %v368_v24 = vadd.f32 %v304_v21, %v2231_v35 }
  0x33   : > { %v369_v56 = vadd.f32 %v305_v42, %v2231_v35  ;;  %v370_v12 = vadd.f32 %v306_v46, %v2231_v35  ;;  %v371_v57 = vadd.f32 %v307_v47, %v2231_v35  ;;  %v372_v58 = vadd.f32 %v308_v48, %v2231_v35 }
  0x34   : > { %1194 = vmatprep.mubr.f32.mxu1 %v891_v11  ;;  %v373_v25 = vadd.f32 %v309_v49, %v2231_v35  ;;  %v628_v60 = vcombine.low %v366_v50, %v367_v51  ;;  %v334_v63 = vmul.f32 %v270_v52, %v2226_v34  ;;  %v335_v0 = vmul.f32 %v271_v53, %v2226_v34  ;;  %v246_v53 = vld [vmem:[%s2197_s28 + $0x20] sm:$0x3]  ;;  %v247_v11 = vld [vmem:[%s2197_s28 + $0x22] sm:$0x3] }
  0x35   : > { %1881 = vmatpush1.bf16.msra.mxu0 %v2203_v26  ;;  %1925 = vmatpush1.bf16.msra.mxu1 %v2203_v26  ;;  %v629_v1 = vcombine.low %v368_v24, %v369_v56  ;;  %v630_v3 = vcombine.low %v370_v12, %v371_v57  ;;  %v336_v16 = vmul.f32 %v272_v55, %v2226_v34 }
  0x36   : > { %1883 = vmatprep.subr.bf16.mxu0 %v2214_v30  ;;  %1910 = vmatprep.subr.bf16.mxu1 %v2214_v30  ;;  %v631_v6 = vcombine.low %v372_v58, %v373_v25  ;;  %v638_v8 = vrot.slane %v628_v60, %v2147_v2  ;;  %v337_v13 = vmul.f32 %v273_v59, %v2226_v34  ;;  %v249_v60 = vld [vmem:[%s2197_s28 + $0x26] sm:$0x3] }
  0x37   : > { %v645_v17 = vrot.slane %v629_v1, %v2147_v2  ;;  %v652_v14 = vrot.slane %v630_v3, %v2147_v2  ;;  %v338_v26 = vmul.f32 %v274_v61, %v2226_v34  ;;  %v339_v15 = vmul.f32 %v275_v62, %v2226_v34  ;;  %v250_v61 = vld [vmem:[%s2197_s28 + $0x28] sm:$0x3] }
  0x38   : > { %v659_v21 = vrot.slane %v631_v6, %v2147_v2  ;;  %v340_v22 = vmul.f32 %v276_v4, %v2226_v34  ;;  %v341_v27 = vmul.f32 %v277_v5, %v2226_v34  ;;  %v398_v30 = vadd.f32 %v334_v63, %v2231_v35  ;;  %v251_v4 = vld [vmem:[%s2197_s28 + $0x2a] sm:$0x3]  ;;  %v252_v5 = vld [vmem:[%s2197_s28 + $0x2c] sm:$0x3] }
  0x39   : > { %1885 = vmatpush1.bf16.msra.mxu0 %v2216_v31  ;;  %1926 = vmatpush1.bf16.msra.mxu1 %v2216_v31  ;;  %v661_v28 = vcombine.high %v638_v8, %v645_v17  ;;  %v399_v29 = vadd.f32 %v335_v0, %v2231_v35  ;;  %v400_v33 = vadd.f32 %v336_v16, %v2231_v35  ;;  %v253_v16 = vld [vmem:[%s2197_s28 + $0x2e] sm:$0x3] }
  0x3a   : > { %1887 = vmatprep.subr.bf16.mxu0 %v2218_v32  ;;  %1911 = vmatprep.subr.bf16.mxu1 %v2218_v32  ;;  %v663_v41 = vcombine.high %v652_v14, %v659_v21  ;;  %v401_v9 = vadd.f32 %v337_v13, %v2231_v35  ;;  %v402_v42 = vadd.f32 %v338_v26, %v2231_v35 }
  0x3b   : > { %v2397_v18 = vrot.slane %v661_v28, %v2147_v2  ;;  %v403_v31 = vadd.f32 %v339_v15, %v2231_v35  ;;  %v404_v46 = vadd.f32 %v340_v22, %v2231_v35  ;;  %v405_v10 = vadd.f32 %v341_v27, %v2231_v35  ;;  %v278_v27 = vld [vmem:[%s2197_s28 + $0x60] sm:$0x3] }
  0x3c   : > { %v2403_v47 = vrot.slane %v663_v41, %v2147_v2  ;;  %v892_v32 = vcombine.low %v398_v30, %v399_v29  ;;  %v893_v48 = vcombine.low %v400_v33, %v401_v9  ;;  %v660_v49 = vcombine.low %v638_v8, %v645_v17  ;;  %v279_v33 = vld [vmem:[%s2197_s28 + $0x62] sm:$0x3] }
  0x3d   : > { %1889 = vmatpush1.bf16.msra.mxu0 %v2233_v36  ;;  %1927 = vmatpush1.bf16.msra.mxu1 %v2233_v36  ;;  %v894_v50 = vcombine.low %v402_v42, %v403_v31  ;;  %v895_v51 = vcombine.low %v404_v46, %v405_v10  ;;  %v662_v52 = vcombine.low %v652_v14, %v659_v21  ;;  %v280_v31 = vld [vmem:[%s2197_s28 + $0x64] sm:$0x3] }
  0x3e   : > { %1891 = vmatprep.subr.bf16.mxu0 %v2235_v38  ;;  %1912 = vmatprep.subr.bf16.mxu1 %v2235_v38  ;;  %v693_v24 = vcombine.low %v2397_v18, %v2403_v47  ;;  %v902_v55 = vrot.slane %v892_v32, %v2147_v2  ;;  %v909_v56 = vrot.slane %v893_v48, %v2147_v2  ;;  %v248_v38 = vld [vmem:[%s2197_s28 + $0x24] sm:$0x3]  ;;  %v281_v47 = vld [vmem:[%s2197_s28 + $0x66] sm:$0x3]  ;;  %v282_v32 = vld [vmem:[%s2197_s28 + $0x68] sm:$0x3] }
  0x3f   : > { %v916_v36 = vrot.slane %v894_v50, %v2147_v2  ;;  %v923_v12 = vrot.slane %v895_v51, %v2147_v2  ;;  %v2418_v57 = vrot.slane %v660_v49, %v2147_v2  ;;  %v2421_v58 = vrot.slane %v662_v52, %v2147_v2  ;;  %v283_v51 = vld [vmem:[%s2197_s28 + $0x6a] sm:$0x3]  ;;  %v284_v52 = vld [vmem:[%s2197_s28 + $0x6c] sm:$0x3] }
  0x40   : > { %v925_v59 = vcombine.high %v902_v55, %v909_v56  ;;  %v924_v25 = vcombine.low %v902_v55, %v909_v56  ;;  %v310_v62 = vmul.f32 %v246_v53, %v2226_v34  ;;  %v311_v63 = vmul.f32 %v247_v11, %v2226_v34  ;;  %v285_v53 = vld [vmem:[%s2197_s28 + $0x6e] sm:$0x3] }
  0x41   : > { %1893 = vmatpush1.bf16.msra.mxu0 %v2237_v39  ;;  %1928 = vmatpush1.bf16.msra.mxu1 %v2237_v39  ;;  %v927_v0 = vcombine.high %v916_v36, %v923_v12  ;;  %v692_v1 = vcombine.low %v2418_v57, %v2421_v58  ;;  %v926_v3 = vcombine.low %v916_v36, %v923_v12 }
  0x42   : > { %1895 = vmatprep.subr.bf16.mxu0 %v2239_v40  ;;  %1913 = vmatprep.subr.bf16.mxu1 %v2239_v40  ;;  %v941_v6 = vrot.slane %v925_v59, %v2147_v2  ;;  %v934_v8 = vrot.slane %v924_v25, %v2147_v2  ;;  %v312_v39 = vmul.f32 %v248_v38, %v2226_v34 }
  0x43   : > { %v955_v13 = vrot.slane %v927_v0, %v2147_v2  ;;  %v948_v17 = vrot.slane %v926_v3, %v2147_v2  ;;  %v313_v14 = vmul.f32 %v249_v60, %v2226_v34  ;;  %v314_v26 = vmul.f32 %v250_v61, %v2226_v34 }
  0x44   : > { %v315_v15 = vmul.f32 %v251_v4, %v2226_v34  ;;  %v316_v40 = vmul.f32 %v252_v5, %v2226_v34  ;;  %v317_v21 = vmul.f32 %v253_v16, %v2226_v34  ;;  %v374_v22 = vadd.f32 %v310_v62, %v2231_v35  ;;  %v254_v62 = vld [vmem:[%s2197_s28 + $0x30] sm:$0x3] }
  0x45   : > { %1897 = vmatpush1.bf16.msra.mxu0 %v2244_v44  ;;  %1929 = vmatpush1.bf16.msra.mxu1 %v2244_v44  ;;  %v957_v30 = vcombine.low %v941_v6, %v955_v13  ;;  %v956_v28 = vcombine.low %v934_v8, %v948_v17  ;;  %v375_v29 = vadd.f32 %v311_v63, %v2231_v35  ;;  %v255_v8 = vld [vmem:[%s2197_s28 + $0x32] sm:$0x3] }
  0x46   : > { %v376_v41 = vadd.f32 %v312_v39, %v2231_v35  ;;  %v377_v9 = vadd.f32 %v313_v14, %v2231_v35  ;;  %v378_v42 = vadd.f32 %v314_v26, %v2231_v35  ;;  %v379_v18 = vadd.f32 %v315_v15, %v2231_v35  ;;  %v256_v14 = vld [vmem:[%s2197_s28 + $0x34] sm:$0x3]  ;;  %v257_v26 = vld [vmem:[%s2197_s28 + $0x36] sm:$0x3] }
  0x47   : > { %v380_v46 = vadd.f32 %v316_v40, %v2231_v35  ;;  %v381_v44 = vadd.f32 %v317_v21, %v2231_v35  ;;  %v694_v10 = vcombine.low %v374_v22, %v375_v29  ;;  %v342_v48 = vmul.f32 %v278_v27, %v2226_v34 }
  0x48   : > { %1171 = vmatmul.mubr.f32.vlgmr.msra.gmra.mrb[0].mxu0 %v626_v43  ;;  %1195 = vmatmul.mubr.f32.vlgmr.msra.gmra.mrb[0].mxu1 %v890_v54  ;;  %v695_v49 = vcombine.low %v376_v41, %v377_v9  ;;  %v696_v50 = vcombine.low %v378_v42, %v379_v18  ;;  %v343_v11 = vmul.f32 %v279_v33, %v2226_v34  ;;  %v259_v41 = vld [vmem:[%s2197_s28 + $0x3a] sm:$0x3]  ;;  %v260_v9 = vld [vmem:[%s2197_s28 + $0x3c] sm:$0x3] }
  0x49   : > { %1176 = vmatprep.mubr.f32.mxu0 %v693_v24  ;;  %1200 = vmatprep.mubr.f32.mxu1 %v957_v30  ;;  %v697_v55 = vcombine.low %v380_v46, %v381_v44  ;;  %v704_v56 = vrot.slane %v694_v10, %v2147_v2  ;;  %v344_v36 = vmul.f32 %v280_v31, %v2226_v34  ;;  %v258_v30 = vld [vmem:[%s2197_s28 + $0x38] sm:$0x3]  ;;  %v261_v46 = vld [vmem:[%s2197_s28 + $0x3e] sm:$0x3] }
  0x4a   : > { %v711_v7 = vrot.slane %v695_v49, %v2147_v2  ;;  %v718_v23 = vrot.slane %v696_v50, %v2147_v2  ;;  %v345_v43 = vmul.f32 %v281_v47, %v2226_v34  ;;  %v346_v45 = vmul.f32 %v282_v32, %v2226_v34 }
  0x4b   : > { %v725_v19 = vrot.slane %v697_v55, %v2147_v2  ;;  %v347_v54 = vmul.f32 %v283_v51, %v2226_v34  ;;  %v348_v24 = vmul.f32 %v284_v52, %v2226_v34  ;;  %v349_v12 = vmul.f32 %v285_v53, %v2226_v34 }
  0x4c   : > { %1177 = vmatmul.mubr.f32.gmra.mrb[2].mxu0 %v692_v1  ;;  %1201 = vmatmul.mubr.f32.gmra.mrb[2].mxu1 %v956_v28  ;;  %v727_v57 = vcombine.high %v704_v56, %v711_v7  ;;  %v406_v58 = vadd.f32 %v342_v48, %v2231_v35  ;;  %v407_v38 = vadd.f32 %v343_v11, %v2231_v35 }
  0x4d   : > { %v729_v59 = vcombine.high %v718_v23, %v725_v19  ;;  %v408_v25 = vadd.f32 %v344_v36, %v2231_v35  ;;  %v409_v60 = vadd.f32 %v345_v43, %v2231_v35  ;;  %v410_v61 = vadd.f32 %v346_v45, %v2231_v35 }
  0x4e   : > { %v743_v63 = vrot.slane %v727_v57, %v2147_v2  ;;  %v411_v0 = vadd.f32 %v347_v54, %v2231_v35  ;;  %v412_v1 = vadd.f32 %v348_v24, %v2231_v35  ;;  %v413_v3 = vadd.f32 %v349_v12, %v2231_v35  ;;  %v287_v54 = vld [vmem:[%s2197_s28 + $0x72] sm:$0x3]  ;;  %v288_v24 = vld [vmem:[%s2197_s28 + $0x74] sm:$0x3]  ;;  %v289_v12 = vld [vmem:[%s2197_s28 + $0x76] sm:$0x3] }
  0x4f   : > { %v757_v4 = vrot.slane %v729_v59, %v2147_v2  ;;  %v958_v5 = vcombine.low %v406_v58, %v407_v38  ;;  %v959_v16 = vcombine.low %v408_v25, %v409_v60  ;;  %v726_v6 = vcombine.low %v704_v56, %v711_v7  ;;  %v286_v7 = vld [vmem:[%s2197_s28 + $0x70] sm:$0x3]  ;;  %v290_v25 = vld [vmem:[%s2197_s28 + $0x78] sm:$0x3] }
  0x50   : > { %v960_v39 = vcombine.low %v410_v61, %v411_v0  ;;  %v961_v13 = vcombine.low %v412_v1, %v413_v3  ;;  %v728_v17 = vcombine.low %v718_v23, %v725_v19  ;;  %v318_v15 = vmul.f32 %v254_v62, %v2226_v34  ;;  %v292_v0 = vld [vmem:[%s2197_s28 + $0x7c] sm:$0x3]  ;;  %v293_v1 = vld [vmem:[%s2197_s28 + $0x7e] sm:$0x3] }
  0x51   : > { %v759_v40 = vcombine.low %v743_v63, %v757_v4  ;;  %v968_v21 = vrot.slane %v958_v5, %v2147_v2  ;;  %v975_v22 = vrot.slane %v959_v16, %v2147_v2  ;;  %v736_v27 = vrot.slane %v726_v6, %v2147_v2  ;;  %v291_v63 = vld [vmem:[%s2197_s28 + $0x7a] sm:$0x3] }
  0x52   : > { %v982_v28 = vrot.slane %v960_v39, %v2147_v2  ;;  %v989_v29 = vrot.slane %v961_v13, %v2147_v2  ;;  %v750_v33 = vrot.slane %v728_v17, %v2147_v2  ;;  %v319_v42 = vmul.f32 %v255_v8, %v2226_v34 }
  0x53   : > { %1182 = vmatprep.mubr.f32.mxu0 %v759_v40  ;;  %v991_v18 = vcombine.high %v968_v21, %v975_v22  ;;  %v990_v31 = vcombine.low %v968_v21, %v975_v22  ;;  %v320_v44 = vmul.f32 %v256_v14, %v2226_v34  ;;  %v321_v10 = vmul.f32 %v257_v26, %v2226_v34 }
  0x54   : > { %v993_v47 = vcombine.high %v982_v28, %v989_v29  ;;  %v758_v32 = vcombine.low %v736_v27, %v750_v33  ;;  %v992_v48 = vcombine.low %v982_v28, %v989_v29  ;;  %v322_v49 = vmul.f32 %v258_v30, %v2226_v34 }
  0x55   : > { %v1007_v50 = vrot.slane %v991_v18, %v2147_v2  ;;  %v1000_v51 = vrot.slane %v990_v31, %v2147_v2  ;;  %v323_v52 = vmul.f32 %v259_v41, %v2226_v34  ;;  %v324_v53 = vmul.f32 %v260_v9, %v2226_v34 }
  0x56   : > { %v1021_v11 = vrot.slane %v993_v47, %v2147_v2  ;;  %1183 = vmatmul.mubr.f32.gmra.mrb[4].mxu0 %v758_v32  ;;  %v1014_v55 = vrot.slane %v992_v48, %v2147_v2  ;;  %v325_v56 = vmul.f32 %v261_v46, %v2226_v34  ;;  %v382_v36 = vadd.f32 %v318_v15, %v2231_v35 }
  0x57   : > { %v383_v23 = vadd.f32 %v319_v42, %v2231_v35  ;;  %v384_v43 = vadd.f32 %v320_v44, %v2231_v35  ;;  %v385_v45 = vadd.f32 %v321_v10, %v2231_v35  ;;  %v386_v19 = vadd.f32 %v322_v49, %v2231_v35 }
  0x58   : > { %v1023_v57 = vcombine.low %v1007_v50, %v1021_v11  ;;  %v1022_v58 = vcombine.low %v1000_v51, %v1014_v55  ;;  %v387_v38 = vadd.f32 %v323_v52, %v2231_v35  ;;  %v388_v59 = vadd.f32 %v324_v53, %v2231_v35 }
  0x59   : > { %v389_v60 = vadd.f32 %v325_v56, %v2231_v35  ;;  %v760_v61 = vcombine.low %v382_v36, %v383_v23  ;;  %v761_v62 = vcombine.low %v384_v43, %v385_v45  ;;  %v350_v3 = vmul.f32 %v286_v7, %v2226_v34 }
  0x5a   : > { %1206 = vmatprep.mubr.f32.mxu1 %v1023_v57  ;;  %v762_v4 = vcombine.low %v386_v19, %v387_v38  ;;  %v351_v5 = vmul.f32 %v287_v54, %v2226_v34  ;;  %v352_v16 = vmul.f32 %v288_v24, %v2226_v34  ;;  %v353_v6 = vmul.f32 %v289_v12, %v2226_v34 }
  0x5b   : > { %1207 = vmatmul.mubr.f32.gmra.mrb[4].mxu1 %v1022_v58  ;;  %v763_v8 = vcombine.low %v388_v59, %v389_v60  ;;  %v770_v39 = vrot.slane %v760_v61, %v2147_v2  ;;  %v777_v13 = vrot.slane %v761_v62, %v2147_v2  ;;  %v354_v17 = vmul.f32 %v290_v25, %v2226_v34  ;;  %v486_v58 = vld [vmem:[%s2851_s4] sm:$0x3] }
  0x5c   : > { %v784_v14 = vrot.slane %v762_v4, %v2147_v2  ;;  %v355_v26 = vmul.f32 %v291_v63, %v2226_v34  ;;  %v356_v15 = vmul.f32 %v292_v0, %v2226_v34  ;;  %v357_v40 = vmul.f32 %v293_v1, %v2226_v34 }
  0x5d   : > { %v791_v21 = vrot.slane %v763_v8, %v2147_v2  ;;  %v793_v22 = vcombine.high %v770_v39, %v777_v13  ;;  %v414_v27 = vadd.f32 %v350_v3, %v2231_v35  ;;  %v415_v30 = vadd.f32 %v351_v5, %v2231_v35 }
  0x5e   : > { %v416_v28 = vadd.f32 %v352_v16, %v2231_v35  ;;  %v417_v29 = vadd.f32 %v353_v6, %v2231_v35  ;;  %v418_v33 = vadd.f32 %v354_v17, %v2231_v35  ;;  %v419_v41 = vadd.f32 %v355_v26, %v2231_v35 }
  0x5f   : > { %v795_v9 = vcombine.high %v784_v14, %v791_v21  ;;  %v809_v42 = vrot.slane %v793_v22, %v2147_v2  ;;  %v420_v34 = vadd.f32 %v356_v15, %v2231_v35  ;;  %v421_v18 = vadd.f32 %v357_v40, %v2231_v35 }
  0x60   : > { %v1024_v31 = vcombine.low %v414_v27, %v415_v30  ;;  %v1025_v46 = vcombine.low %v416_v28, %v417_v29  ;;  %v1026_v44 = vcombine.low %v418_v33, %v419_v41  ;;  %v792_v10 = vcombine.low %v770_v39, %v777_v13 }
  0x61   : > { %v823_v47 = vrot.slane %v795_v9, %v2147_v2  ;;  %v1027_v32 = vcombine.low %v420_v34, %v421_v18  ;;  %v794_v48 = vcombine.low %v784_v14, %v791_v21  ;;  %v490_v57 = vsub.s32 0, %v2068_v37 }
  0x62   : > { %v1034_v49 = vrot.slane %v1024_v31, %v2147_v2  ;;  %v1041_v50 = vrot.slane %v1025_v46, %v2147_v2  ;;  %v1048_v51 = vrot.slane %v1026_v44, %v2147_v2  ;;  %v802_v52 = vrot.slane %v792_v10, %v2147_v2 }
  0x63   : > { %v825_v53 = vcombine.low %v809_v42, %v823_v47  ;;  %v1055_v11 = vrot.slane %v1027_v32, %v2147_v2  ;;  %v816_v35 = vrot.slane %v794_v48, %v2147_v2  ;;  %v494_v38 = vsub.s32 1, %v2068_v37 }
  0x64   : > { %v1057_v55 = vcombine.high %v1034_v49, %v1041_v50  ;;  %v1056_v56 = vcombine.low %v1034_v49, %v1041_v50  ;;  %v2572_v59 = vrot.slane %v486_v58, %v490_v57 }
  0x65   : > { %1188 = vmatprep.mubr.f32.mxu0 %v825_v53  ;;  %v1059_v36 = vcombine.high %v1048_v51, %v1055_v11  ;;  %v824_v7 = vcombine.low %v802_v52, %v816_v35  ;;  %v1058_v23 = vcombine.low %v1048_v51, %v1055_v11  ;;  %v2574_v25 = vrot.slane %v486_v58, %v494_v38 }
  0x66   : > { %v1073_v43 = vrot.slane %v1057_v55, %v2147_v2  ;;  %v1066_v45 = vrot.slane %v1056_v56, %v2147_v2 }
  0x67   : > { %v1087_v19 = vrot.slane %v1059_v36, %v2147_v2  ;;  %1189 = vmatmul.mubr.f32.gmra.mrb[6].mxu0 %v824_v7  ;;  %v1080_v54 = vrot.slane %v1058_v23, %v2147_v2 }
  0x69   : > { %v1089_v24 = vcombine.low %v1073_v43, %v1087_v19  ;;  %v1088_v12 = vcombine.low %v1066_v45, %v1080_v54 }
  0x6b   : > { %1212 = vmatprep.mubr.f32.mxu1 %v1089_v24 }
  0x6c   : > { %1213 = vmatmul.mubr.f32.gmra.mrb[6].mxu1 %v1088_v12 }
 0x11b   : > { %v1172_v60 = vpop.f32.mrb[0].mxu0  ;;  %v1196_v61 = vpop.f32.mrb[0].mxu1 }
 0x11c   : > { %v1173_v62 = vadd.f32 %v1172_v60, %v2572_v59  ;;  %v1197_v63 = vadd.f32 %v1196_v61, %v2572_v59  ;;  %v1174_v0 = vpop.f32.mrb[1].mxu0  ;;  %v1198_v1 = vpop.f32.mrb[1].mxu1 }
 0x11d   : > { %v1175_v3 = vadd.f32 %v1174_v0, %v2574_v25  ;;  %v1199_v4 = vadd.f32 %v1198_v1, %v2574_v25 }
 0x11f   : > { %v1235_v5 = vcombine.low %v1173_v62, %v1175_v3  ;;  %v1236_v16 = vcombine.high %v1173_v62, %v1175_v3  ;;  %v1435_v37 = vcombine.low %v1197_v63, %v1199_v4  ;;  %v1436_v6 = vcombine.high %v1197_v63, %v1199_v4  ;;  %v1178_v8 = vpop.f32.mrb[2].mxu0  ;;  %v1202_v39 = vpop.f32.mrb[2].mxu1 }
 0x120   : > { %v1180_v17 = vpop.f32.mrb[3].mxu0  ;;  %v1204_v14 = vpop.f32.mrb[3].mxu1  ;;  %v1179_v20 = vadd.f32 %v1178_v8, %v2572_v59  ;;  %v1203_v22 = vadd.f32 %v1202_v39, %v2572_v59 }
 0x121   : > { %v1243_v26 = vrot.slane %v1235_v5, %v2147_v2  ;;  %v1250_v15 = vrot.slane %v1236_v16, %v2147_v2  ;;  %v1443_v40 = vrot.slane %v1435_v37, %v2147_v2  ;;  %v1450_v21 = vrot.slane %v1436_v6, %v2147_v2 }
 0x122   : > { %v1181_v27 = vadd.f32 %v1180_v17, %v2574_v25  ;;  %v1205_v30 = vadd.f32 %v1204_v14, %v2574_v25 }
 0x123   : > { %v1251_v28 = vcombine.high %v1243_v26, %v1243_v26  ;;  %v1252_v29 = vcombine.high %v1250_v15, %v1250_v15  ;;  %v1259_v33 = vrot.slane %v1243_v26, %v2147_v2  ;;  %v1266_v41 = vrot.slane %v1250_v15, %v2147_v2 }
 0x124   : > { %v1451_v9 = vcombine.high %v1443_v40, %v1443_v40  ;;  %v1452_v42 = vcombine.high %v1450_v21, %v1450_v21  ;;  %v1459_v34 = vrot.slane %v1443_v40, %v2147_v2  ;;  %v1466_v18 = vrot.slane %v1450_v21, %v2147_v2 }
 0x125   : > { %v1273_v31 = vrot.slane %v1251_v28, %v2147_v2  ;;  %v1280_v46 = vrot.slane %v1252_v29, %v2147_v2  ;;  %v1281_v44 = vcombine.high %v1259_v33, %v1259_v33  ;;  %v1282_v10 = vcombine.high %v1266_v41, %v1266_v41  ;;  %1703 = vst.msk [vmem:[%s2594_s24] sm:$0x3] %vm2581_vm0, %v1259_v33 }
 0x126   : > { %1707 = vst.msk [vmem:[%s2594_s24 + $0x8] sm:$0x3] %vm2581_vm0, %v1266_v41  ;;  %v1473_v47 = vrot.slane %v1451_v9, %v2147_v2  ;;  %v1480_v32 = vrot.slane %v1452_v42, %v2147_v2  ;;  %v1481_v48 = vcombine.high %v1459_v34, %v1459_v34  ;;  %v1482_v49 = vcombine.high %v1466_v18, %v1466_v18 }
 0x127   : > { %1735 = vst.msk [vmem:[%s2594_s24 + $0x40] sm:$0x3] %vm2581_vm0, %v1459_v34  ;;  %1739 = vst.msk [vmem:[%s2594_s24 + $0x48] sm:$0x3] %vm2581_vm0, %v1466_v18  ;;  %v1283_v50 = vcombine.high %v1273_v31, %v1273_v31  ;;  %v1284_v51 = vcombine.high %v1280_v46, %v1280_v46  ;;  %v1285_v52 = vcombine.low %v1179_v20, %v1181_v27 }
 0x128   : > { %1704 = vst.msk [vmem:[%s2594_s24 + $0x2] sm:$0x3] %vm2581_vm0, %v1273_v31  ;;  %1705 = vst.msk [vmem:[%s2594_s24 + $0x4] sm:$0x3] %vm2581_vm0, %v1281_v44  ;;  %v1286_v53 = vcombine.high %v1179_v20, %v1181_v27  ;;  %v1483_v11 = vcombine.high %v1473_v47, %v1473_v47  ;;  %v1484_v35 = vcombine.high %v1480_v32, %v1480_v32 }
 0x129   : > { %1708 = vst.msk [vmem:[%s2594_s24 + $0xa] sm:$0x3] %vm2581_vm0, %v1280_v46  ;;  %1709 = vst.msk [vmem:[%s2594_s24 + $0xc] sm:$0x3] %vm2581_vm0, %v1282_v10  ;;  %v1485_v55 = vcombine.low %v1203_v22, %v1205_v30  ;;  %v1486_v56 = vcombine.high %v1203_v22, %v1205_v30  ;;  %v1293_v36 = vrot.slane %v1285_v52, %v2147_v2  ;;  %v1184_v23 = vpop.f32.mrb[4].mxu0 }
 0x12a   : > { %1736 = vst.msk [vmem:[%s2594_s24 + $0x42] sm:$0x3] %vm2581_vm0, %v1473_v47  ;;  %1737 = vst.msk [vmem:[%s2594_s24 + $0x44] sm:$0x3] %vm2581_vm0, %v1481_v48  ;;  %v1300_v7 = vrot.slane %v1286_v53, %v2147_v2  ;;  %v1185_v19 = vadd.f32 %v1184_v23, %v2572_v59  ;;  %v1186_v54 = vpop.f32.mrb[5].mxu0 }
 0x12b   : > { %1740 = vst.msk [vmem:[%s2594_s24 + $0x4a] sm:$0x3] %vm2581_vm0, %v1480_v32  ;;  %1741 = vst.msk [vmem:[%s2594_s24 + $0x4c] sm:$0x3] %vm2581_vm0, %v1482_v49  ;;  %v1493_v43 = vrot.slane %v1485_v55, %v2147_v2  ;;  %v1500_v45 = vrot.slane %v1486_v56, %v2147_v2  ;;  %v1301_v24 = vcombine.high %v1293_v36, %v1293_v36 }
 0x12c   : > { %1706 = vst.msk [vmem:[%s2594_s24 + $0x6] sm:$0x3] %vm2581_vm0, %v1283_v50  ;;  %1710 = vst.msk [vmem:[%s2594_s24 + $0xe] sm:$0x3] %vm2581_vm0, %v1284_v51  ;;  %v1302_v12 = vcombine.high %v1300_v7, %v1300_v7  ;;  %v1309_v57 = vrot.slane %v1293_v36, %v2147_v2  ;;  %v1316_v58 = vrot.slane %v1300_v7, %v2147_v2 }
 0x12d   : > { %1738 = vst.msk [vmem:[%s2594_s24 + $0x46] sm:$0x3] %vm2581_vm0, %v1483_v11  ;;  %1742 = vst.msk [vmem:[%s2594_s24 + $0x4e] sm:$0x3] %vm2581_vm0, %v1484_v35  ;;  %v1501_v38 = vcombine.high %v1493_v43, %v1493_v43  ;;  %v1502_v60 = vcombine.high %v1500_v45, %v1500_v45  ;;  %v1509_v61 = vrot.slane %v1493_v43, %v2147_v2 }
 0x12e   : > { %v1516_v62 = vrot.slane %v1500_v45, %v2147_v2  ;;  %v1323_v63 = vrot.slane %v1301_v24, %v2147_v2  ;;  %v1330_v0 = vrot.slane %v1302_v12, %v2147_v2  ;;  %v1331_v1 = vcombine.high %v1309_v57, %v1309_v57  ;;  %1711 = vst.msk [vmem:[%s2594_s24 + $0x10] sm:$0x3] %vm2581_vm0, %v1309_v57  ;;  %v1208_v6 = vpop.f32.mrb[4].mxu1 }
 0x12f   : > { %v1332_v3 = vcombine.high %v1316_v58, %v1316_v58  ;;  %1715 = vst.msk [vmem:[%s2594_s24 + $0x18] sm:$0x3] %vm2581_vm0, %v1316_v58  ;;  %v1523_v4 = vrot.slane %v1501_v38, %v2147_v2  ;;  %v1530_v5 = vrot.slane %v1502_v60, %v2147_v2  ;;  %v1531_v16 = vcombine.high %v1509_v61, %v1509_v61  ;;  %v1210_v26 = vpop.f32.mrb[5].mxu1 }
 0x130   : > { %v1532_v37 = vcombine.high %v1516_v62, %v1516_v62  ;;  %1743 = vst.msk [vmem:[%s2594_s24 + $0x50] sm:$0x3] %vm2581_vm0, %v1509_v61  ;;  %1747 = vst.msk [vmem:[%s2594_s24 + $0x58] sm:$0x3] %vm2581_vm0, %v1516_v62  ;;  %v1333_v8 = vcombine.high %v1323_v63, %v1323_v63  ;;  %v1334_v39 = vcombine.high %v1330_v0, %v1330_v0 }
 0x131   : > { %1712 = vst.msk [vmem:[%s2594_s24 + $0x12] sm:$0x3] %vm2581_vm0, %v1323_v63  ;;  %1713 = vst.msk [vmem:[%s2594_s24 + $0x14] sm:$0x3] %vm2581_vm0, %v1331_v1  ;;  %v1209_v17 = vadd.f32 %v1208_v6, %v2572_v59  ;;  %v1187_v14 = vadd.f32 %v1186_v54, %v2574_v25  ;;  %v1533_v15 = vcombine.high %v1523_v4, %v1523_v4 }
 0x132   : > { %1716 = vst.msk [vmem:[%s2594_s24 + $0x1a] sm:$0x3] %vm2581_vm0, %v1330_v0  ;;  %1717 = vst.msk [vmem:[%s2594_s24 + $0x1c] sm:$0x3] %vm2581_vm0, %v1332_v3  ;;  %v1534_v40 = vcombine.high %v1530_v5, %v1530_v5  ;;  %v1211_v21 = vadd.f32 %v1210_v26, %v2574_v25 }
 0x133   : > { %1744 = vst.msk [vmem:[%s2594_s24 + $0x52] sm:$0x3] %vm2581_vm0, %v1523_v4  ;;  %1745 = vst.msk [vmem:[%s2594_s24 + $0x54] sm:$0x3] %vm2581_vm0, %v1531_v16  ;;  %v1335_v20 = vcombine.low %v1185_v19, %v1187_v14  ;;  %v1336_v22 = vcombine.high %v1185_v19, %v1187_v14 }
 0x134   : > { %1748 = vst.msk [vmem:[%s2594_s24 + $0x5a] sm:$0x3] %vm2581_vm0, %v1530_v5  ;;  %1749 = vst.msk [vmem:[%s2594_s24 + $0x5c] sm:$0x3] %vm2581_vm0, %v1532_v37  ;;  %v1535_v27 = vcombine.low %v1209_v17, %v1211_v21  ;;  %v1536_v30 = vcombine.high %v1209_v17, %v1211_v21 }
 0x135   : > { %1714 = vst.msk [vmem:[%s2594_s24 + $0x16] sm:$0x3] %vm2581_vm0, %v1333_v8  ;;  %1718 = vst.msk [vmem:[%s2594_s24 + $0x1e] sm:$0x3] %vm2581_vm0, %v1334_v39  ;;  %v1343_v28 = vrot.slane %v1335_v20, %v2147_v2  ;;  %v1350_v29 = vrot.slane %v1336_v22, %v2147_v2 }
 0x136   : > { %1746 = vst.msk [vmem:[%s2594_s24 + $0x56] sm:$0x3] %vm2581_vm0, %v1533_v15  ;;  %1750 = vst.msk [vmem:[%s2594_s24 + $0x5e] sm:$0x3] %vm2581_vm0, %v1534_v40  ;;  %v1543_v33 = vrot.slane %v1535_v27, %v2147_v2  ;;  %v1550_v41 = vrot.slane %v1536_v30, %v2147_v2 }
 0x137   : > { %v1351_v9 = vcombine.high %v1343_v28, %v1343_v28  ;;  %v1352_v42 = vcombine.high %v1350_v29, %v1350_v29  ;;  %v1359_v34 = vrot.slane %v1343_v28, %v2147_v2  ;;  %v1366_v18 = vrot.slane %v1350_v29, %v2147_v2 }
 0x138   : > { %v1551_v31 = vcombine.high %v1543_v33, %v1543_v33  ;;  %v1552_v46 = vcombine.high %v1550_v41, %v1550_v41  ;;  %v1559_v44 = vrot.slane %v1543_v33, %v2147_v2  ;;  %v1566_v10 = vrot.slane %v1550_v41, %v2147_v2 }
 0x139   : > { %v1373_v47 = vrot.slane %v1351_v9, %v2147_v2  ;;  %v1380_v32 = vrot.slane %v1352_v42, %v2147_v2  ;;  %v1381_v48 = vcombine.high %v1359_v34, %v1359_v34  ;;  %v1382_v49 = vcombine.high %v1366_v18, %v1366_v18  ;;  %1719 = vst.msk [vmem:[%s2594_s24 + $0x20] sm:$0x3] %vm2581_vm0, %v1359_v34 }
 0x13a   : > { %1723 = vst.msk [vmem:[%s2594_s24 + $0x28] sm:$0x3] %vm2581_vm0, %v1366_v18  ;;  %v1573_v50 = vrot.slane %v1551_v31, %v2147_v2  ;;  %v1580_v51 = vrot.slane %v1552_v46, %v2147_v2  ;;  %v1581_v52 = vcombine.high %v1559_v44, %v1559_v44  ;;  %v1582_v53 = vcombine.high %v1566_v10, %v1566_v10  ;;  %v1190_v36 = vpop.f32.mrb[6].mxu0 }
 0x13b   : > { %1751 = vst.msk [vmem:[%s2594_s24 + $0x60] sm:$0x3] %vm2581_vm0, %v1559_v44  ;;  %1755 = vst.msk [vmem:[%s2594_s24 + $0x68] sm:$0x3] %vm2581_vm0, %v1566_v10  ;;  %v1383_v11 = vcombine.high %v1373_v47, %v1373_v47  ;;  %v1384_v35 = vcombine.high %v1380_v32, %v1380_v32  ;;  %v1191_v7 = vadd.f32 %v1190_v36, %v2572_v59  ;;  %v1192_v23 = vpop.f32.mrb[7].mxu0 }
 0x13c   : > { %1720 = vst.msk [vmem:[%s2594_s24 + $0x22] sm:$0x3] %vm2581_vm0, %v1373_v47  ;;  %1721 = vst.msk [vmem:[%s2594_s24 + $0x24] sm:$0x3] %vm2581_vm0, %v1381_v48  ;;  %v1583_v55 = vcombine.high %v1573_v50, %v1573_v50  ;;  %v1584_v56 = vcombine.high %v1580_v51, %v1580_v51  ;;  %v1193_v43 = vadd.f32 %v1192_v23, %v2574_v25 }
 0x13d   : > { %1724 = vst.msk [vmem:[%s2594_s24 + $0x2a] sm:$0x3] %vm2581_vm0, %v1380_v32  ;;  %1725 = vst.msk [vmem:[%s2594_s24 + $0x2c] sm:$0x3] %vm2581_vm0, %v1382_v49 }
 0x13e   : > { %1752 = vst.msk [vmem:[%s2594_s24 + $0x62] sm:$0x3] %vm2581_vm0, %v1573_v50  ;;  %1753 = vst.msk [vmem:[%s2594_s24 + $0x64] sm:$0x3] %vm2581_vm0, %v1581_v52  ;;  %v1385_v45 = vcombine.low %v1191_v7, %v1193_v43  ;;  %v1386_v19 = vcombine.high %v1191_v7, %v1193_v43 }
 0x13f   : > { %1756 = vst.msk [vmem:[%s2594_s24 + $0x6a] sm:$0x3] %vm2581_vm0, %v1580_v51  ;;  %1757 = vst.msk [vmem:[%s2594_s24 + $0x6c] sm:$0x3] %vm2581_vm0, %v1582_v53  ;;  %v1214_v54 = vpop.f32.mrb[6].mxu1 }
 0x140   : > { %1722 = vst.msk [vmem:[%s2594_s24 + $0x26] sm:$0x3] %vm2581_vm0, %v1383_v11  ;;  %1726 = vst.msk [vmem:[%s2594_s24 + $0x2e] sm:$0x3] %vm2581_vm0, %v1384_v35  ;;  %v1215_v24 = vadd.f32 %v1214_v54, %v2572_v59  ;;  %v1393_v12 = vrot.slane %v1385_v45, %v2147_v2  ;;  %v1400_v57 = vrot.slane %v1386_v19, %v2147_v2  ;;  %v1216_v58 = vpop.f32.mrb[7].mxu1 }
 0x141   : > { %1754 = vst.msk [vmem:[%s2594_s24 + $0x66] sm:$0x3] %vm2581_vm0, %v1583_v55  ;;  %1758 = vst.msk [vmem:[%s2594_s24 + $0x6e] sm:$0x3] %vm2581_vm0, %v1584_v56  ;;  %v1217_v38 = vadd.f32 %v1216_v58, %v2574_v25 }
 0x142   : > { %v1401_v60 = vcombine.high %v1393_v12, %v1393_v12  ;;  %v1402_v61 = vcombine.high %v1400_v57, %v1400_v57  ;;  %v1409_v62 = vrot.slane %v1393_v12, %v2147_v2  ;;  %v1416_v63 = vrot.slane %v1400_v57, %v2147_v2 }
 0x143   : > { %v1585_v0 = vcombine.low %v1215_v24, %v1217_v38  ;;  %v1586_v59 = vcombine.high %v1215_v24, %v1217_v38 }
 0x144   : > { %v1423_v1 = vrot.slane %v1401_v60, %v2147_v2  ;;  %v1430_v3 = vrot.slane %v1402_v61, %v2147_v2  ;;  %v1431_v4 = vcombine.high %v1409_v62, %v1409_v62  ;;  %v1432_v5 = vcombine.high %v1416_v63, %v1416_v63  ;;  %1727 = vst.msk [vmem:[%s2594_s24 + $0x30] sm:$0x3] %vm2581_vm0, %v1409_v62 }
 0x145   : > { %1731 = vst.msk [vmem:[%s2594_s24 + $0x38] sm:$0x3] %vm2581_vm0, %v1416_v63  ;;  %v1593_v25 = vrot.slane %v1585_v0, %v2147_v2  ;;  %v1600_v16 = vrot.slane %v1586_v59, %v2147_v2 }
 0x146   : > { %v1433_v37 = vcombine.high %v1423_v1, %v1423_v1  ;;  %v1434_v6 = vcombine.high %v1430_v3, %v1430_v3  ;;  %1728 = vst.msk [vmem:[%s2594_s24 + $0x32] sm:$0x3] %vm2581_vm0, %v1423_v1  ;;  %1729 = vst.msk [vmem:[%s2594_s24 + $0x34] sm:$0x3] %vm2581_vm0, %v1431_v4 }
 0x147   : > { %1732 = vst.msk [vmem:[%s2594_s24 + $0x3a] sm:$0x3] %vm2581_vm0, %v1430_v3  ;;  %1733 = vst.msk [vmem:[%s2594_s24 + $0x3c] sm:$0x3] %vm2581_vm0, %v1432_v5  ;;  %v1601_v8 = vcombine.high %v1593_v25, %v1593_v25  ;;  %v1602_v39 = vcombine.high %v1600_v16, %v1600_v16  ;;  %v1609_v17 = vrot.slane %v1593_v25, %v2147_v2 }
 0x148   : > { %v1616_v14 = vrot.slane %v1600_v16, %v2147_v2  ;;  %1730 = vst.msk [vmem:[%s2594_s24 + $0x36] sm:$0x3] %vm2581_vm0, %v1433_v37  ;;  %1734 = vst.msk [vmem:[%s2594_s24 + $0x3e] sm:$0x3] %vm2581_vm0, %v1434_v6 }
 0x149   : > { %v1623_v26 = vrot.slane %v1601_v8, %v2147_v2  ;;  %v1630_v15 = vrot.slane %v1602_v39, %v2147_v2  ;;  %v1631_v40 = vcombine.high %v1609_v17, %v1609_v17  ;;  %1759 = vst.msk [vmem:[%s2594_s24 + $0x70] sm:$0x3] %vm2581_vm0, %v1609_v17 }
 0x14a   : > { %v1632_v21 = vcombine.high %v1616_v14, %v1616_v14  ;;  %1763 = vst.msk [vmem:[%s2594_s24 + $0x78] sm:$0x3] %vm2581_vm0, %v1616_v14 }
 0x14b   : > { %v1633_v20 = vcombine.high %v1623_v26, %v1623_v26  ;;  %v1634_v22 = vcombine.high %v1630_v15, %v1630_v15  ;;  %1760 = vst.msk [vmem:[%s2594_s24 + $0x72] sm:$0x3] %vm2581_vm0, %v1623_v26  ;;  %1761 = vst.msk [vmem:[%s2594_s24 + $0x74] sm:$0x3] %vm2581_vm0, %v1631_v40 }
 0x14c   : > { %1764 = vst.msk [vmem:[%s2594_s24 + $0x7a] sm:$0x3] %vm2581_vm0, %v1630_v15  ;;  %1765 = vst.msk [vmem:[%s2594_s24 + $0x7c] sm:$0x3] %vm2581_vm0, %v1632_v21 }
 0x14d   : > { %1762 = vst.msk [vmem:[%s2594_s24 + $0x76] sm:$0x3] %vm2581_vm0, %v1633_v20  ;;  %1766 = vst.msk [vmem:[%s2594_s24 + $0x7e] sm:$0x3] %vm2581_vm0, %v1634_v22 }
 0x14e PF: > { %s15_s18 = sadd.s32 1, %s1945_s18  }
 0x14f   : > { %p12_p4 = scmp.ge.s32.totalorder %s15_s18, 4  }
 0x151   :  { %14 = sbr.rel (!%p12_p4) target bundleno = 1 (0x1), region = 70 }

</bundles_post_ra>
